<compile_context>
chip_gen: v6e
topology: v6e:2x2x1
jax: 0.10.0
libtpu: 0.0.40
codegen_flags: <defaults>
</compile_context>

<pallas_src>
import functools

import jax
import jax.numpy as jnp
from jax.experimental import pallas as pl
from jax.experimental.pallas import tpu as pltpu


def _convblock2_kernel(x_ref, idx_ref, w1_ref, w2_ref, b1_ref, scale_ref,
                       shift_ref, o_ref, *, C, D, H, W, KH, KW, KT):
  """One batch element in lane-dense (C, D*H*W) layout.

  x_ref    : (C, D*H*W)   input                                 (VMEM)
  idx_ref  : (3, D*H*W)   int32 rows = (d, h, w) index per lane (VMEM)
  w1_ref   : (C, KH*KW)   depthwise conv1 taps                  (VMEM)
  w2_ref   : (KT, C, C)   conv2 weights, [t, o, c]              (VMEM)
  b1_ref   : (C, 1)       conv1 bias                            (VMEM)
  scale_ref: (C, 1)       folded BN scale                       (VMEM)
  shift_ref: (C, 1)       folded BN shift (includes conv2 bias) (VMEM)
  o_ref    : (C, D*H*W)   output                                (VMEM)
  """
  HW = H * W
  DHW = D * HW

  x = x_ref[...]                       # (C, DHW) f32
  w1 = w1_ref[...]                     # (C, KH*KW)
  idx = idx_ref[...]                   # (3, DHW) i32
  d_idx = idx[0:1, :]
  h_idx = idx[1:2, :]
  w_idx = idx[2:3, :]

  # ---- conv1: depthwise (1, KH, KW), padding (0, 1, 1) --------------------
  # H/W shifts are lane rolls (XLU); the zero halo is realized with boundary
  # masks rather than a padded HBM copy or lane-crossing slices.
  h1 = jnp.zeros((C, DHW), jnp.float32)
  for ki in range(KH):
    for kj in range(KW):
      di, dj = ki - 1, kj - 1          # padding = 1 in H and W
      s = di * W + dj
      xs = x if s == 0 else pltpu.roll(x, (-s) % DHW, axis=1)
      conds = []
      if di < 0:
        conds.append(h_idx >= -di)
      if di > 0:
        conds.append(h_idx < H - di)
      if dj < 0:
        conds.append(w_idx >= -dj)
      if dj > 0:
        conds.append(w_idx < W - dj)
      if conds:
        valid = conds[0]
        for cnd in conds[1:]:
          valid = valid & cnd
        xs = jnp.where(valid, xs, 0.0)
      tap = w1[:, ki * KW + kj: ki * KW + kj + 1]    # (C, 1) per-channel tap
      h1 = h1 + xs * tap
  h1 = h1 + b1_ref[...]                # conv1 bias (inside conv2's zero pad)

  # ---- conv2: (KT, 1, 1) channel mix, padding (1, 0, 0), on the MXU -------
  # Depth taps = 256-lane rolls of h1, zero-masked at the depth boundary;
  # each tap is one (C, C) x (C, DHW) fp32 matmul accumulated on the MXU.
  y = jnp.zeros((C, DHW), jnp.float32)
  for kt in range(KT):
    dt = kt - 1                        # depth padding = 1
    r = h1 if dt == 0 else pltpu.roll(h1, (-dt * HW) % DHW, axis=1)
    if dt < 0:
      r = jnp.where(d_idx >= -dt, r, 0.0)
    elif dt > 0:
      r = jnp.where(d_idx < D - dt, r, 0.0)
    y = y + jnp.dot(w2_ref[kt], r,
                    preferred_element_type=jnp.float32,
                    precision=jax.lax.Precision.HIGHEST)

  # ---- BatchNorm3d (eval, folded) + ELU; Dropout3d is identity in eval ----
  y = y * scale_ref[...] + shift_ref[...]
  # ELU(alpha=1); clamp the exp argument so the dead branch never overflows.
  o_ref[...] = jnp.where(y > 0, y, jnp.exp(jnp.minimum(y, 0.0)) - 1.0)


def convblock2_forward(x, params, *, eps=1e-5):
  """Pallas ConvBlock2 forward.  x: (N, C, D, H, W) float32 (NCDHW)."""
  w1, b1, w2, b2, gamma, beta, rmean, rvar = params
  N, C, D, H, W = x.shape
  KH, KW = w1.shape[-2], w1.shape[-1]
  KT = w2.shape[2]
  if (KH, KW, KT) != (3, 3, 3):
    # The folded-lane kernel relies on output dims == input dims, which the
    # module's fixed padding (0,1,1)/(1,0,0) only yields for 3x3x3 kernels.
    raise NotImplementedError("ConvBlock2 Pallas kernel assumes ks=[3,3,3]")
  DHW = D * H * W

  # Fold BatchNorm (eval) and conv2 bias into per-channel scale/shift (glue).
  scale = gamma / jnp.sqrt(rvar + eps)
  shift = b2 * scale + (beta - rmean * scale)

  # Layout plumbing (free metadata reshapes / tiny constants) --------------
  xf = x.reshape(N, C, DHW).astype(jnp.float32)
  w1m = w1.reshape(C, KH * KW).astype(jnp.float32)
  # w2k[t, o, c] = w2[o, c, t]
  w2k = jnp.transpose(w2[:, :, :, 0, 0], (2, 0, 1)).astype(jnp.float32)
  b1c = b1.reshape(C, 1).astype(jnp.float32)
  scalec = scale.reshape(C, 1).astype(jnp.float32)
  shiftc = shift.reshape(C, 1).astype(jnp.float32)
  # Per-lane (d, h, w) indices of the folded axis, used for boundary masks.
  dd, hh, ww = jnp.meshgrid(jnp.arange(D, dtype=jnp.int32),
                            jnp.arange(H, dtype=jnp.int32),
                            jnp.arange(W, dtype=jnp.int32), indexing="ij")
  idx = jnp.stack([dd.reshape(-1), hh.reshape(-1), ww.reshape(-1)], axis=0)

  kernel = functools.partial(_convblock2_kernel, C=C, D=D, H=H, W=W,
                             KH=KH, KW=KW, KT=KT)

  out = pl.pallas_call(
      kernel,
      out_shape=jax.ShapeDtypeStruct((N, C, DHW), jnp.float32),
      grid=(N,),
      in_specs=[
          pl.BlockSpec((None, C, DHW), lambda n: (n, 0, 0)),   # x (lane-dense)
          pl.BlockSpec((3, DHW), lambda n: (0, 0)),            # idx
          pl.BlockSpec((C, KH * KW), lambda n: (0, 0)),        # w1
          pl.BlockSpec((KT, C, C), lambda n: (0, 0, 0)),       # w2
          pl.BlockSpec((C, 1), lambda n: (0, 0)),              # b1
          pl.BlockSpec((C, 1), lambda n: (0, 0)),              # BN scale
          pl.BlockSpec((C, 1), lambda n: (0, 0)),              # BN shift (+b2)
      ],
      out_specs=pl.BlockSpec((None, C, DHW), lambda n: (n, 0, 0)),
      compiler_params=pltpu.CompilerParams(
          dimension_semantics=("parallel",)),
  )(xf, idx, w1m, w2k, b1c, scalec, shiftc)
  return out.reshape(N, C, D, H, W)


def convblock2_reference(x, params, *, eps=1e-5):
  """Pure-JAX reference (inference semantics) for verification."""
  w1, b1, w2, b2, gamma, beta, rmean, rvar = params
  C = x.shape[1]
  dn = ('NCDHW', 'OIDHW', 'NCDHW')
  y = jax.lax.conv_general_dilated(
      x, w1, (1, 1, 1), [(0, 0), (1, 1), (1, 1)], dimension_numbers=dn,
      feature_group_count=C, precision=jax.lax.Precision.HIGHEST)
  y = y + b1.reshape(1, C, 1, 1, 1)
  y = jax.lax.conv_general_dilated(
      y, w2, (1, 1, 1), [(1, 1), (0, 0), (0, 0)], dimension_numbers=dn,
      precision=jax.lax.Precision.HIGHEST)
  y = y + b2.reshape(1, C, 1, 1, 1)
  y = (y - rmean.reshape(1, C, 1, 1, 1)) / jnp.sqrt(
      rvar.reshape(1, C, 1, 1, 1) + eps)
  y = y * gamma.reshape(1, C, 1, 1, 1) + beta.reshape(1, C, 1, 1, 1)
  y = jnp.where(y > 0, y, jnp.exp(jnp.minimum(y, 0.0)) - 1.0)
  return y


if __name__ == "__main__":
  # Small shapes consistent with the module: chans=4, ks=[3,3,3]
  N, C, D, H, W = 2, 4, 8, 16, 16
  KH = KW = KT = 3

  key = jax.random.PRNGKey(0)
  ks = jax.random.split(key, 9)
  w1 = 0.2 * jax.random.normal(ks[0], (C, 1, 1, KH, KW), jnp.float32)   # depthwise
  b1 = 0.1 * jax.random.normal(ks[1], (C,), jnp.float32)
  w2 = 0.2 * jax.random.normal(ks[2], (C, C, KT, 1, 1), jnp.float32)
  b2 = 0.1 * jax.random.normal(ks[3], (C,), jnp.float32)
  gamma = 1.0 + 0.1 * jax.random.normal(ks[4], (C,), jnp.float32)
  beta = 0.1 * jax.random.normal(ks[5], (C,), jnp.float32)
  rmean = 0.1 * jax.random.normal(ks[6], (C,), jnp.float32)
  rvar = jax.random.uniform(ks[7], (C,), jnp.float32, minval=0.5, maxval=1.5)
  x = jax.random.normal(ks[8], (N, C, D, H, W), jnp.float32)

  params = (w1, b1, w2, b2, gamma, beta, rmean, rvar)

  out = convblock2_forward(x, params)
  out = jax.block_until_ready(out)

  ref = convblock2_reference(x, params)
  assert out.shape == ref.shape, (out.shape, ref.shape)
  err = float(jnp.max(jnp.abs(out - ref)))
  assert jnp.allclose(out, ref, atol=1e-4, rtol=1e-4), err

  print("KERNEL_OK")
</pallas_src>

<mosaic_0001>
module attributes {stable_mosaic.version = 11 : i64} {
  func.func @_convblock2_kernel(%arg0: i32, %arg1: memref<1x4x2048xf32, #tpu.memory_space<vmem>>, %arg2: memref<3x2048xi32, #tpu.memory_space<vmem>>, %arg3: memref<4x9xf32, #tpu.memory_space<vmem>>, %arg4: memref<3x4x4xf32, #tpu.memory_space<vmem>>, %arg5: memref<4x1xf32, #tpu.memory_space<vmem>>, %arg6: memref<4x1xf32, #tpu.memory_space<vmem>>, %arg7: memref<4x1xf32, #tpu.memory_space<vmem>>, %arg8: memref<1x4x2048xf32, #tpu.memory_space<vmem>>) attributes {dimension_semantics = [#tpu.dimension_semantics<parallel>], iteration_bounds = array<i64: 2>, scalar_prefetch = 0 : i64, scratch_operands = 0 : i64, tpu.core_type = #tpu.core_type<tc>, window_params = [{transform_indices = @transform_0, window_bounds = array<i64: 1, 4, 2048>}, {pipeline_mode = #tpu.pipeline_mode<synchronous>, transform_indices = @transform_1, window_bounds = array<i64: 3, 2048>}, {pipeline_mode = #tpu.pipeline_mode<synchronous>, transform_indices = @transform_2, window_bounds = array<i64: 4, 9>}, {pipeline_mode = #tpu.pipeline_mode<synchronous>, transform_indices = @transform_3, window_bounds = array<i64: 3, 4, 4>}, {pipeline_mode = #tpu.pipeline_mode<synchronous>, transform_indices = @transform_4, window_bounds = array<i64: 4, 1>}, {pipeline_mode = #tpu.pipeline_mode<synchronous>, transform_indices = @transform_5, window_bounds = array<i64: 4, 1>}, {pipeline_mode = #tpu.pipeline_mode<synchronous>, transform_indices = @transform_6, window_bounds = array<i64: 4, 1>}, {transform_indices = @transform_7, window_bounds = array<i64: 1, 4, 2048>}]} {
    %c0 = arith.constant 0 : index
    %c0_0 = arith.constant 0 : index
    %c0_1 = arith.constant 0 : index
    %0 = vector.load %arg1[%c0, %c0_0, %c0_1] : memref<1x4x2048xf32, #tpu.memory_space<vmem>>, vector<1x4x2048xf32>
    %1 = vector.shape_cast %0 : vector<1x4x2048xf32> to vector<4x2048xf32>
    %c0_2 = arith.constant 0 : index
    %c0_3 = arith.constant 0 : index
    %2 = vector.load %arg3[%c0_2, %c0_3] : memref<4x9xf32, #tpu.memory_space<vmem>>, vector<4x9xf32>
    %c0_4 = arith.constant 0 : index
    %c0_5 = arith.constant 0 : index
    %3 = vector.load %arg2[%c0_4, %c0_5] : memref<3x2048xi32, #tpu.memory_space<vmem>>, vector<3x2048xi32>
    %4 = vector.extract_strided_slice %3 {offsets = [0, 0], sizes = [1, 2048], strides = [1, 1]} : vector<3x2048xi32> to vector<1x2048xi32>
    %5 = vector.extract_strided_slice %3 {offsets = [1, 0], sizes = [1, 2048], strides = [1, 1]} : vector<3x2048xi32> to vector<1x2048xi32>
    %6 = vector.extract_strided_slice %3 {offsets = [2, 0], sizes = [1, 2048], strides = [1, 1]} : vector<3x2048xi32> to vector<1x2048xi32>
    %cst = arith.constant 0.000000e+00 : f32
    %7 = vector.broadcast %cst : f32 to vector<4x2048xf32>
    %c17_i32 = arith.constant 17 : i32
    %8 = tpu.dynamic_rotate %1 by %c17_i32 dim 1 : vector<4x2048xf32>, i32 -> vector<4x2048xf32>
    %c1_i32 = arith.constant 1 : i32
    %9 = vector.broadcast %c1_i32 : i32 to vector<1x2048xi32>
    %10 = arith.cmpi sge, %5, %9 : vector<1x2048xi32>
    %c1_i32_6 = arith.constant 1 : i32
    %11 = vector.broadcast %c1_i32_6 : i32 to vector<1x2048xi32>
    %12 = arith.cmpi sge, %6, %11 : vector<1x2048xi32>
    %13 = arith.andi %10, %12 : vector<1x2048xi1>
    %cst_7 = arith.constant 0.000000e+00 : f32
    %14 = vector.shape_cast %13 : vector<1x2048xi1> to vector<1x2048xi1>
    %15 = vector.broadcast %14 : vector<1x2048xi1> to vector<4x2048xi1>
    %16 = vector.broadcast %cst_7 : f32 to vector<4x2048xf32>
    %17 = arith.select %15, %8, %16 : vector<4x2048xi1>, vector<4x2048xf32>
    %18 = vector.extract_strided_slice %2 {offsets = [0, 0], sizes = [4, 1], strides = [1, 1]} : vector<4x9xf32> to vector<4x1xf32>
    %19 = vector.broadcast %18 : vector<4x1xf32> to vector<4x2048xf32>
    %20 = arith.mulf %17, %19 : vector<4x2048xf32>
    %21 = arith.addf %7, %20 : vector<4x2048xf32>
    %c16_i32 = arith.constant 16 : i32
    %22 = tpu.dynamic_rotate %1 by %c16_i32 dim 1 : vector<4x2048xf32>, i32 -> vector<4x2048xf32>
    %c1_i32_8 = arith.constant 1 : i32
    %23 = vector.broadcast %c1_i32_8 : i32 to vector<1x2048xi32>
    %24 = arith.cmpi sge, %5, %23 : vector<1x2048xi32>
    %cst_9 = arith.constant 0.000000e+00 : f32
    %25 = vector.shape_cast %24 : vector<1x2048xi1> to vector<1x2048xi1>
    %26 = vector.broadcast %25 : vector<1x2048xi1> to vector<4x2048xi1>
    %27 = vector.broadcast %cst_9 : f32 to vector<4x2048xf32>
    %28 = arith.select %26, %22, %27 : vector<4x2048xi1>, vector<4x2048xf32>
    %29 = vector.extract_strided_slice %2 {offsets = [0, 1], sizes = [4, 1], strides = [1, 1]} : vector<4x9xf32> to vector<4x1xf32>
    %30 = vector.broadcast %29 : vector<4x1xf32> to vector<4x2048xf32>
    %31 = arith.mulf %28, %30 : vector<4x2048xf32>
    %32 = arith.addf %21, %31 : vector<4x2048xf32>
    %c15_i32 = arith.constant 15 : i32
    %33 = tpu.dynamic_rotate %1 by %c15_i32 dim 1 : vector<4x2048xf32>, i32 -> vector<4x2048xf32>
    %c1_i32_10 = arith.constant 1 : i32
    %34 = vector.broadcast %c1_i32_10 : i32 to vector<1x2048xi32>
    %35 = arith.cmpi sge, %5, %34 : vector<1x2048xi32>
    %c15_i32_11 = arith.constant 15 : i32
    %36 = vector.broadcast %c15_i32_11 : i32 to vector<1x2048xi32>
    %37 = arith.cmpi slt, %6, %36 : vector<1x2048xi32>
    %38 = arith.andi %35, %37 : vector<1x2048xi1>
    %cst_12 = arith.constant 0.000000e+00 : f32
    %39 = vector.shape_cast %38 : vector<1x2048xi1> to vector<1x2048xi1>
    %40 = vector.broadcast %39 : vector<1x2048xi1> to vector<4x2048xi1>
    %41 = vector.broadcast %cst_12 : f32 to vector<4x2048xf32>
    %42 = arith.select %40, %33, %41 : vector<4x2048xi1>, vector<4x2048xf32>
    %43 = vector.extract_strided_slice %2 {offsets = [0, 2], sizes = [4, 1], strides = [1, 1]} : vector<4x9xf32> to vector<4x1xf32>
    %44 = vector.broadcast %43 : vector<4x1xf32> to vector<4x2048xf32>
    %45 = arith.mulf %42, %44 : vector<4x2048xf32>
    %46 = arith.addf %32, %45 : vector<4x2048xf32>
    %c1_i32_13 = arith.constant 1 : i32
    %47 = tpu.dynamic_rotate %1 by %c1_i32_13 dim 1 : vector<4x2048xf32>, i32 -> vector<4x2048xf32>
    %c1_i32_14 = arith.constant 1 : i32
    %48 = vector.broadcast %c1_i32_14 : i32 to vector<1x2048xi32>
    %49 = arith.cmpi sge, %6, %48 : vector<1x2048xi32>
    %cst_15 = arith.constant 0.000000e+00 : f32
    %50 = vector.shape_cast %49 : vector<1x2048xi1> to vector<1x2048xi1>
    %51 = vector.broadcast %50 : vector<1x2048xi1> to vector<4x2048xi1>
    %52 = vector.broadcast %cst_15 : f32 to vector<4x2048xf32>
    %53 = arith.select %51, %47, %52 : vector<4x2048xi1>, vector<4x2048xf32>
    %54 = vector.extract_strided_slice %2 {offsets = [0, 3], sizes = [4, 1], strides = [1, 1]} : vector<4x9xf32> to vector<4x1xf32>
    %55 = vector.broadcast %54 : vector<4x1xf32> to vector<4x2048xf32>
    %56 = arith.mulf %53, %55 : vector<4x2048xf32>
    %57 = arith.addf %46, %56 : vector<4x2048xf32>
    %58 = vector.extract_strided_slice %2 {offsets = [0, 4], sizes = [4, 1], strides = [1, 1]} : vector<4x9xf32> to vector<4x1xf32>
    %59 = vector.broadcast %58 : vector<4x1xf32> to vector<4x2048xf32>
    %60 = arith.mulf %1, %59 : vector<4x2048xf32>
    %61 = arith.addf %57, %60 : vector<4x2048xf32>
    %c2047_i32 = arith.constant 2047 : i32
    %62 = tpu.dynamic_rotate %1 by %c2047_i32 dim 1 : vector<4x2048xf32>, i32 -> vector<4x2048xf32>
    %c15_i32_16 = arith.constant 15 : i32
    %63 = vector.broadcast %c15_i32_16 : i32 to vector<1x2048xi32>
    %64 = arith.cmpi slt, %6, %63 : vector<1x2048xi32>
    %cst_17 = arith.constant 0.000000e+00 : f32
    %65 = vector.shape_cast %64 : vector<1x2048xi1> to vector<1x2048xi1>
    %66 = vector.broadcast %65 : vector<1x2048xi1> to vector<4x2048xi1>
    %67 = vector.broadcast %cst_17 : f32 to vector<4x2048xf32>
    %68 = arith.select %66, %62, %67 : vector<4x2048xi1>, vector<4x2048xf32>
    %69 = vector.extract_strided_slice %2 {offsets = [0, 5], sizes = [4, 1], strides = [1, 1]} : vector<4x9xf32> to vector<4x1xf32>
    %70 = vector.broadcast %69 : vector<4x1xf32> to vector<4x2048xf32>
    %71 = arith.mulf %68, %70 : vector<4x2048xf32>
    %72 = arith.addf %61, %71 : vector<4x2048xf32>
    %c2033_i32 = arith.constant 2033 : i32
    %73 = tpu.dynamic_rotate %1 by %c2033_i32 dim 1 : vector<4x2048xf32>, i32 -> vector<4x2048xf32>
    %c15_i32_18 = arith.constant 15 : i32
    %74 = vector.broadcast %c15_i32_18 : i32 to vector<1x2048xi32>
    %75 = arith.cmpi slt, %5, %74 : vector<1x2048xi32>
    %c1_i32_19 = arith.constant 1 : i32
    %76 = vector.broadcast %c1_i32_19 : i32 to vector<1x2048xi32>
    %77 = arith.cmpi sge, %6, %76 : vector<1x2048xi32>
    %78 = arith.andi %75, %77 : vector<1x2048xi1>
    %cst_20 = arith.constant 0.000000e+00 : f32
    %79 = vector.shape_cast %78 : vector<1x2048xi1> to vector<1x2048xi1>
    %80 = vector.broadcast %79 : vector<1x2048xi1> to vector<4x2048xi1>
    %81 = vector.broadcast %cst_20 : f32 to vector<4x2048xf32>
    %82 = arith.select %80, %73, %81 : vector<4x2048xi1>, vector<4x2048xf32>
    %83 = vector.extract_strided_slice %2 {offsets = [0, 6], sizes = [4, 1], strides = [1, 1]} : vector<4x9xf32> to vector<4x1xf32>
    %84 = vector.broadcast %83 : vector<4x1xf32> to vector<4x2048xf32>
    %85 = arith.mulf %82, %84 : vector<4x2048xf32>
    %86 = arith.addf %72, %85 : vector<4x2048xf32>
    %c2032_i32 = arith.constant 2032 : i32
    %87 = tpu.dynamic_rotate %1 by %c2032_i32 dim 1 : vector<4x2048xf32>, i32 -> vector<4x2048xf32>
    %c15_i32_21 = arith.constant 15 : i32
    %88 = vector.broadcast %c15_i32_21 : i32 to vector<1x2048xi32>
    %89 = arith.cmpi slt, %5, %88 : vector<1x2048xi32>
    %cst_22 = arith.constant 0.000000e+00 : f32
    %90 = vector.shape_cast %89 : vector<1x2048xi1> to vector<1x2048xi1>
    %91 = vector.broadcast %90 : vector<1x2048xi1> to vector<4x2048xi1>
    %92 = vector.broadcast %cst_22 : f32 to vector<4x2048xf32>
    %93 = arith.select %91, %87, %92 : vector<4x2048xi1>, vector<4x2048xf32>
    %94 = vector.extract_strided_slice %2 {offsets = [0, 7], sizes = [4, 1], strides = [1, 1]} : vector<4x9xf32> to vector<4x1xf32>
    %95 = vector.broadcast %94 : vector<4x1xf32> to vector<4x2048xf32>
    %96 = arith.mulf %93, %95 : vector<4x2048xf32>
    %97 = arith.addf %86, %96 : vector<4x2048xf32>
    %c2031_i32 = arith.constant 2031 : i32
    %98 = tpu.dynamic_rotate %1 by %c2031_i32 dim 1 : vector<4x2048xf32>, i32 -> vector<4x2048xf32>
    %c15_i32_23 = arith.constant 15 : i32
    %99 = vector.broadcast %c15_i32_23 : i32 to vector<1x2048xi32>
    %100 = arith.cmpi slt, %5, %99 : vector<1x2048xi32>
    %c15_i32_24 = arith.constant 15 : i32
    %101 = vector.broadcast %c15_i32_24 : i32 to vector<1x2048xi32>
    %102 = arith.cmpi slt, %6, %101 : vector<1x2048xi32>
    %103 = arith.andi %100, %102 : vector<1x2048xi1>
    %cst_25 = arith.constant 0.000000e+00 : f32
    %104 = vector.shape_cast %103 : vector<1x2048xi1> to vector<1x2048xi1>
    %105 = vector.broadcast %104 : vector<1x2048xi1> to vector<4x2048xi1>
    %106 = vector.broadcast %cst_25 : f32 to vector<4x2048xf32>
    %107 = arith.select %105, %98, %106 : vector<4x2048xi1>, vector<4x2048xf32>
    %108 = vector.extract_strided_slice %2 {offsets = [0, 8], sizes = [4, 1], strides = [1, 1]} : vector<4x9xf32> to vector<4x1xf32>
    %109 = vector.broadcast %108 : vector<4x1xf32> to vector<4x2048xf32>
    %110 = arith.mulf %107, %109 : vector<4x2048xf32>
    %111 = arith.addf %97, %110 : vector<4x2048xf32>
    %c0_26 = arith.constant 0 : index
    %c0_27 = arith.constant 0 : index
    %112 = vector.load %arg5[%c0_26, %c0_27] : memref<4x1xf32, #tpu.memory_space<vmem>>, vector<4x1xf32>
    %113 = vector.broadcast %112 : vector<4x1xf32> to vector<4x2048xf32>
    %114 = arith.addf %111, %113 : vector<4x2048xf32>
    %cst_28 = arith.constant 0.000000e+00 : f32
    %115 = vector.broadcast %cst_28 : f32 to vector<4x2048xf32>
    %c256_i32 = arith.constant 256 : i32
    %116 = tpu.dynamic_rotate %114 by %c256_i32 dim 1 : vector<4x2048xf32>, i32 -> vector<4x2048xf32>
    %c1_i32_29 = arith.constant 1 : i32
    %117 = vector.broadcast %c1_i32_29 : i32 to vector<1x2048xi32>
    %118 = arith.cmpi sge, %4, %117 : vector<1x2048xi32>
    %cst_30 = arith.constant 0.000000e+00 : f32
    %119 = vector.shape_cast %118 : vector<1x2048xi1> to vector<1x2048xi1>
    %120 = vector.broadcast %119 : vector<1x2048xi1> to vector<4x2048xi1>
    %121 = vector.broadcast %cst_30 : f32 to vector<4x2048xf32>
    %122 = arith.select %120, %116, %121 : vector<4x2048xi1>, vector<4x2048xf32>
    %c0_31 = arith.constant 0 : index
    %c0_32 = arith.constant 0 : index
    %c0_33 = arith.constant 0 : index
    %123 = vector.load %arg4[%c0_31, %c0_32, %c0_33] : memref<3x4x4xf32, #tpu.memory_space<vmem>>, vector<1x4x4xf32>
    %124 = vector.shape_cast %123 : vector<1x4x4xf32> to vector<4x4xf32>
    %cst_34 = arith.constant dense<0.000000e+00> : vector<4x2048xf32>
    %125 = tpu.matmul %124, %122, %cst_34 {dimension_numbers = #tpu.dot_dimension_numbers<[1], [0], [0], [1], [0, 0, 1, 1], [], []>, precision = #tpu.contract_precision<fp32>} : vector<4x4xf32>, vector<4x2048xf32>, vector<4x2048xf32> -> vector<4x2048xf32>
    %126 = arith.addf %115, %125 : vector<4x2048xf32>
    %c1 = arith.constant 1 : index
    %c0_35 = arith.constant 0 : index
    %c0_36 = arith.constant 0 : index
    %127 = vector.load %arg4[%c1, %c0_35, %c0_36] : memref<3x4x4xf32, #tpu.memory_space<vmem>>, vector<1x4x4xf32>
    %128 = vector.shape_cast %127 : vector<1x4x4xf32> to vector<4x4xf32>
    %cst_37 = arith.constant dense<0.000000e+00> : vector<4x2048xf32>
    %129 = tpu.matmul %128, %114, %cst_37 {dimension_numbers = #tpu.dot_dimension_numbers<[1], [0], [0], [1], [0, 0, 1, 1], [], []>, precision = #tpu.contract_precision<fp32>} : vector<4x4xf32>, vector<4x2048xf32>, vector<4x2048xf32> -> vector<4x2048xf32>
    %130 = arith.addf %126, %129 : vector<4x2048xf32>
    %c1792_i32 = arith.constant 1792 : i32
    %131 = tpu.dynamic_rotate %114 by %c1792_i32 dim 1 : vector<4x2048xf32>, i32 -> vector<4x2048xf32>
    %c7_i32 = arith.constant 7 : i32
    %132 = vector.broadcast %c7_i32 : i32 to vector<1x2048xi32>
    %133 = arith.cmpi slt, %4, %132 : vector<1x2048xi32>
    %cst_38 = arith.constant 0.000000e+00 : f32
    %134 = vector.shape_cast %133 : vector<1x2048xi1> to vector<1x2048xi1>
    %135 = vector.broadcast %134 : vector<1x2048xi1> to vector<4x2048xi1>
    %136 = vector.broadcast %cst_38 : f32 to vector<4x2048xf32>
    %137 = arith.select %135, %131, %136 : vector<4x2048xi1>, vector<4x2048xf32>
    %c2 = arith.constant 2 : index
    %c0_39 = arith.constant 0 : index
    %c0_40 = arith.constant 0 : index
    %138 = vector.load %arg4[%c2, %c0_39, %c0_40] : memref<3x4x4xf32, #tpu.memory_space<vmem>>, vector<1x4x4xf32>
    %139 = vector.shape_cast %138 : vector<1x4x4xf32> to vector<4x4xf32>
    %cst_41 = arith.constant dense<0.000000e+00> : vector<4x2048xf32>
    %140 = tpu.matmul %139, %137, %cst_41 {dimension_numbers = #tpu.dot_dimension_numbers<[1], [0], [0], [1], [0, 0, 1, 1], [], []>, precision = #tpu.contract_precision<fp32>} : vector<4x4xf32>, vector<4x2048xf32>, vector<4x2048xf32> -> vector<4x2048xf32>
    %141 = arith.addf %130, %140 : vector<4x2048xf32>
    %c0_42 = arith.constant 0 : index
    %c0_43 = arith.constant 0 : index
    %142 = vector.load %arg6[%c0_42, %c0_43] : memref<4x1xf32, #tpu.memory_space<vmem>>, vector<4x1xf32>
    %143 = vector.broadcast %142 : vector<4x1xf32> to vector<4x2048xf32>
    %144 = arith.mulf %141, %143 : vector<4x2048xf32>
    %c0_44 = arith.constant 0 : index
    %c0_45 = arith.constant 0 : index
    %145 = vector.load %arg7[%c0_44, %c0_45] : memref<4x1xf32, #tpu.memory_space<vmem>>, vector<4x1xf32>
    %146 = vector.broadcast %145 : vector<4x1xf32> to vector<4x2048xf32>
    %147 = arith.addf %144, %146 : vector<4x2048xf32>
    %cst_46 = arith.constant 0.000000e+00 : f32
    %148 = vector.broadcast %cst_46 : f32 to vector<4x2048xf32>
    %149 = arith.cmpf ogt, %147, %148 : vector<4x2048xf32>
    %cst_47 = arith.constant 0.000000e+00 : f32
    %150 = vector.broadcast %cst_47 : f32 to vector<4x2048xf32>
    %151 = arith.minimumf %147, %150 : vector<4x2048xf32>
    %152 = math.exp %151 : vector<4x2048xf32>
    %cst_48 = arith.constant 1.000000e+00 : f32
    %153 = vector.broadcast %cst_48 : f32 to vector<4x2048xf32>
    %154 = arith.subf %152, %153 : vector<4x2048xf32>
    %155 = arith.select %149, %147, %154 : vector<4x2048xi1>, vector<4x2048xf32>
    %c0_49 = arith.constant 0 : index
    %c0_50 = arith.constant 0 : index
    %c0_51 = arith.constant 0 : index
    %156 = vector.load %arg8[%c0_49, %c0_50, %c0_51] : memref<1x4x2048xf32, #tpu.memory_space<vmem>>, vector<1x4x2048xf32>
    %157 = vector.shape_cast %156 : vector<1x4x2048xf32> to vector<4x2048xf32>
    %158 = vector.shape_cast %155 : vector<4x2048xf32> to vector<1x4x2048xf32>
    tpu.vector_store %arg8[%c0_49, %c0_50, %c0_51], %158 {strides = array<i32>} : memref<1x4x2048xf32, #tpu.memory_space<vmem>>, vector<1x4x2048xf32>,
    return
  }
  func.func @transform_0(%arg0: i32) -> (i32, i32, i32) {
    %c0_i32 = arith.constant 0 : i32
    %c0_i32_0 = arith.constant 0 : i32
    %c0_i32_1 = arith.constant 0 : i32
    return %arg0, %c0_i32, %c0_i32_0 : i32, i32, i32
  }
  func.func @transform_1(%arg0: i32) -> (i32, i32) {
    %c0_i32 = arith.constant 0 : i32
    %c0_i32_0 = arith.constant 0 : i32
    %c0_i32_1 = arith.constant 0 : i32
    return %c0_i32, %c0_i32_0 : i32, i32
  }
  func.func @transform_2(%arg0: i32) -> (i32, i32) {
    %c0_i32 = arith.constant 0 : i32
    %c0_i32_0 = arith.constant 0 : i32
    %c0_i32_1 = arith.constant 0 : i32
    return %c0_i32, %c0_i32_0 : i32, i32
  }
  func.func @transform_3(%arg0: i32) -> (i32, i32, i32) {
    %c0_i32 = arith.constant 0 : i32
    %c0_i32_0 = arith.constant 0 : i32
    %c0_i32_1 = arith.constant 0 : i32
    %c0_i32_2 = arith.constant 0 : i32
    return %c0_i32, %c0_i32_0, %c0_i32_1 : i32, i32, i32
  }
  func.func @transform_4(%arg0: i32) -> (i32, i32) {
    %c0_i32 = arith.constant 0 : i32
    %c0_i32_0 = arith.constant 0 : i32
    %c0_i32_1 = arith.constant 0 : i32
    return %c0_i32, %c0_i32_0 : i32, i32
  }
  func.func @transform_5(%arg0: i32) -> (i32, i32) {
    %c0_i32 = arith.constant 0 : i32
    %c0_i32_0 = arith.constant 0 : i32
    %c0_i32_1 = arith.constant 0 : i32
    return %c0_i32, %c0_i32_0 : i32, i32
  }
  func.func @transform_6(%arg0: i32) -> (i32, i32) {
    %c0_i32 = arith.constant 0 : i32
    %c0_i32_0 = arith.constant 0 : i32
    %c0_i32_1 = arith.constant 0 : i32
    return %c0_i32, %c0_i32_0 : i32, i32
  }
  func.func @transform_7(%arg0: i32) -> (i32, i32, i32) {
    %c0_i32 = arith.constant 0 : i32
    %c0_i32_0 = arith.constant 0 : i32
    %c0_i32_1 = arith.constant 0 : i32
    return %arg0, %c0_i32, %c0_i32_0 : i32, i32, i32
  }
}

</mosaic_0001>

<bundles_post_ra>
// kernel: tpu_custom_call.1
= control target key start
LH: loop header
LB: loop body
LE: loop exit
PB: predicated region body
PF: predicated region fallthrough
CT: control target
= control target key end

     0   :  { %s19098_s0 = inlined_call_operand.hbm [shape: f32[2,4,2048], index: 0, kind: input, shape index: {}]   ;;  %s19099_s1 = inlined_call_operand.hbm [shape: s32[3,2048], index: 1, kind: input, shape index: {}]   ;;  %s19100_s2 = inlined_call_operand.vmem [shape: f32[4,9], index: 2, kind: input, shape index: {}]   ;;  %s19101_s3 = inlined_call_operand.vmem [shape: f32[3,4,4], index: 3, kind: input, shape index: {}]   ;;  %s19102_s4 = inlined_call_operand.vmem [shape: f32[4,1], index: 4, kind: input, shape index: {}]   ;;  %s19103_s5 = inlined_call_operand.vmem [shape: f32[4,1], index: 5, kind: input, shape index: {}]   ;;  %s19104_s6 = inlined_call_operand.vmem [shape: f32[4,1], index: 6, kind: input, shape index: {}]   ;;  %s19105_s7 = inlined_call_operand.hbm [shape: f32[2,4,2048], index: 7, kind: output, shape index: {}]  }
   0x1   :  { %19334 = sst [smem:[#allocation70_spill]] %s19099_s1 }
   0x2   :  { %12 = vsyncpa [#allocation3], 0 }
   0x3   :  { %14 = vsyncpa [#allocation3 + $0x1], 0 }
   0x4   :  { %15 = vsyncpa [#allocation6], 0 }
   0x5   :  { %16 = vsyncpa [#allocation4], 0 }
   0x6   :  { %18 = vsyncpa [#allocation4 + $0x1], 0  ;;  %s14860_s24 = smov 0   ;;  %s14862_s25 = smov 0  }
   0x7   :  { %s14864_s26 = smov 0   ;;  %s14866_s27 = smov 0  }
   0x8 LB: > { %s14881_s28 = sadd.s32 4294967295, %s14796_s27   ;;  %s14484_s29 = sadd.s32 4294967294, %s14796_s27   ;;  %s14796_s27 = sphi %s14866_s27, %s19950_s27   ;;  %s14792_s26 = sphi %s14864_s26, %s19949_s26   ;;  %s14788_s25 = sphi %s14862_s25, %s19948_s25   ;;  %s14784_s24 = sphi %s14860_s24, %s19947_s24  }
   0x9   : > { %p44_p0 = scmp.ne.s32.totalorder %s14788_s25, %s14784_s24  ;;  %p19106_p1 = scmp.eq.s32.totalorder %s14881_s28, 0 }
   0xa   : > { %p200_p3 = scmp.eq.s32.totalorder %s14484_s29, 1  ;;  %p14485_p5 = scmp.ge.s32.totalorder %s14796_s27, 1 }
   0xb   : > { %p14890_p4 = por %p19106_p1, %p44_p0  ;;  %p207_p7 = scmp.lt.s32.totalorder %s14796_s27, 3 }
   0xc   : > { %p14895_p6 = por %p200_p3, %p44_p0  ;;  %s14798_s10 = smov [#allocation5]  }
   0xd   : > { %s19335_s30 = scalar_select %p14890_p4, 1, 0 }
   0xe   : > { %s19336_s8 = scalar_select %p14895_p6, 1, 0 }
   0xf   : > { %p14900_p8 = pnand %p14485_p5, %p207_p7  ;;  %s220_s11 = sshll.u32 %s14798_s10, 4  ;;  %s221_s11 = int_to_ptr.vmem [resolvable:$true] %s220_s11 }
  0x10   : > { %s14908_s12 = sadd.s32 1, %s14796_s27   ;;  %s31_s16 = sadd.s32 1, %s14792_s26 }
  0x11   : > { %s19337_s9 = scalar_select %p14900_p8, 1, 0 }
  0x12   : > { %p14544_p10 = pneg %p14900_p8  ;;  %s28_s14 = ssub.s32 %s14796_s27, %s14908_s12 }
  0x13   : > { %p14918_p12 = scmp.eq.s32.totalorder %s28_s14, 0  ;;  %p38_p13 = scmp.ne.s32.totalorder %s14792_s26, %s14788_s25 }
  0x14   : > { %p14912_p11 = pnand %p14544_p10, %p19106_p1  ;;  %s14685_s17 = scalar_lea.vmem %s221_s11, 1024 }
  0x15   : > { %p14686_p3 = scmp.ne.s32.totalorder %s221_s11, %s14685_s17  ;;  %p14693_p9 = scmp.lt.s32.totalorder %s221_s11, %s221_s11 }
  0x16   : > { %p14676_p0 = pneg %p14912_p11  ;;  %p14694_p2 = scmp.lt.s32.totalorder %s14685_s17, %s14685_s17 }
  0x18   : > { %p14688_p5 = pnand %p14686_p3, %p14676_p0  ;;  %p14695_p10 = por %p14694_p2, %p14693_p9 }
  0x1a   : > { %p14689_p7 = pneg %p14688_p5 }
  0x1c   : > { %p14696_p1 = pnand %p14695_p10, %p14689_p7 }
  0x1e   : > { %14699 = shalt.err (!%p14696_p1)
}
  0x1f   : > { %s19340_s1 = sld [smem:[#allocation70_spill]]  ;;  %p39_p1 = scmp.eq.s32.totalorder %s14796_s27, 0 }
  0x20   : > { %s14935_s20 = scalar_select %p14918_p12, %s14792_s26, %s31_s16  }
  0x21   : > { %p19342_p2 = scmp.eq.s32.totalorder %s14881_s28, 1  ;;  %p14557_p0 = scmp.lt.s32.totalorder %s14796_s27, 2 }
  0x22   : > { %19341 = sst [smem:[#allocation11_spill]] %s14935_s20  ;;  %s246_s22 = sand.u32 1, %s14792_s26  }
  0x23   : > { %p14943_p9 = por %p19342_p2, %p38_p13  ;;  %p40_p3 = por %p39_p1, %p38_p13 }
  0x24   : > { %s14488_s23 = sshll.u32 %s246_s22, 6  ;;  %s14534_s29 = sshll.u32 %s14796_s27, 10 }
  0x25   : > { %14547 = dma.hbm_to_vmem [thread:$0]  (!%p14912_p11), %s19340_s1, 1024, %s221_s11, [#allocation6]  }
  0x26   : > { %s19343_s21 = scalar_select %p14943_p9, 1, 0 }
  0x27   : > { %s14956_s11 = scalar_lea.hbm %s19098_s0, %s14534_s29  ;;  %s250_s14 = scalar_lea.vmem [#allocation2], %s14488_s23 }
  0x28   : > { %s258_s15 = sshll.u32 %s250_s14, 4  ;;  %p14958_p11 = pnand %p14557_p0, %p40_p3  ;;  %s259_s15 = int_to_ptr.vmem [resolvable:$true] %s258_s15 }
  0x29   : > { %s247_s17 = scalar_lea.sflag [#allocation3], %s246_s22  ;;  %s14700_s18 = scalar_lea.hbm %s14956_s11, 1024 }
  0x2a   : > { %p14701_p12 = scmp.ne.s32.totalorder %s14956_s11, %s14700_s18  ;;  %p14702_p13 = pneg %p14958_p11 }
  0x2b   : > { %s14705_s10 = scalar_lea.hbm %s19098_s0, 2048  ;;  %p14706_p10 = scmp.lt.s32.totalorder %s14956_s11, %s19098_s0 }
  0x2c   : > { %p14703_p5 = pnand %p14702_p13, %p14701_p12  ;;  %p14707_p1 = scmp.lt.s32.totalorder %s14705_s10, %s14700_s18 }
  0x2e   : > { %p14704_p7 = pneg %p14703_p5  ;;  %p14708_p2 = por %p14707_p1, %p14706_p10 }
  0x30   : > { %p14709_p0 = pnand %p14708_p2, %p14704_p7 }
  0x32   : > { %14712 = shalt.err (!%p14709_p0)
}
  0x33   : > { %s14713_s14 = scalar_lea.vmem %s259_s15, 1024  ;;  %s14799_s22 = smov [#allocation2]  }
  0x34   : > { %p14714_p3 = scmp.ne.s32.totalorder %s259_s15, %s14713_s14  ;;  %s14718_s1 = sshll.u32 %s14799_s22, 4  ;;  %s14719_s1 = int_to_ptr.vmem [resolvable:$false] %s14718_s1 }
  0x35   : > { %s14720_s20 = scalar_lea.vmem %s14719_s1, 2048  ;;  %p14721_p12 = scmp.lt.s32.totalorder %s259_s15, %s14719_s1 }
  0x36   : > { %p14716_p6 = pnand %p14714_p3, %p14702_p13  ;;  %p14722_p5 = scmp.lt.s32.totalorder %s14720_s20, %s14713_s14 }
  0x38   : > { %p14717_p9 = pneg %p14716_p6  ;;  %p14723_p4 = por %p14722_p5, %p14721_p12 }
  0x3a   : > { %p14724_p8 = pnand %p14723_p4, %p14717_p9 }
  0x3c   : > { %14727 = shalt.err (!%p14724_p8)
}
  0x3d   : > { %14551 = dma.hbm_to_vmem [thread:$0]  (!%p14958_p11), %s14956_s11, 1024, %s259_s15, %s247_s17  }
  0x3e   : > { %p19345_p7 = scmp.ne.s32.totalorder %s19337_s9, 0 }
  0x40   : > { %267 = sbr.rel (%p19345_p7) target bundleno = 996 (0x3e4), region = 48 }
  0x45   : > { %s14979_s18 = sand.u32 1, %s14788_s25   ;;  %p19346_p4 = scmp.ne.s32.totalorder %s19335_s30, 0 }
  0x46   : > { %s14492_s19 = sshll.u32 %s14979_s18, 6  ;;  %s270_s1 = scalar_lea.sflag [#allocation3], %s14979_s18 }
  0x47   : > { %s14985_s20 = scalar_lea.vmem [#allocation2], %s14492_s19 }
  0x48   : > { %14771 = dma.done.wait (%p19346_p4), %s270_s1, 1024  }
  0x49   : > { %14773 = vsyncadd (%p19346_p4), %s270_s1, 4294966272  ;;  %p19347_p6 = scmp.eq.s32.totalorder %s14881_s28, 0 }
  0x4b   : > { %14775 = dma.done.wait (%p19347_p6), [#allocation6], 1024   ;;  %p19348_p8 = pmov %p19347_p6 }
  0x4c   : > { %v14800_v0 = vmov 2   ;;  %v14801_v1 = vmov 1   ;;  %v316_v2 = vld [vmem:[%s19100_s2] sm:$0xf]  ;;  %v14802_v5 = vmov 4   ;;  %s14803_s30 = smov 17   ;;  %v381_v42 = vlaneseq }
  0x4d   : > { %14777 = vsyncadd (%p19348_p8), [#allocation6], 4294966272  ;;  %14613 = vset.pattern.permute.xlu1 %v14800_v0  ;;  %14612 = vset.pattern.permute.xlu0 %v14801_v1  ;;  %v14999_v3 = vld [vmem:[%s14985_s20] sm:$0xff]  ;;  %v315_v6 = vld [vmem:[%s14985_s20 + $0x38] sm:$0xff]  ;;  %v14804_v7 = vmov 5   ;;  %s14805_s15 = smov 16  }
  0x4e   : > { %1164 = vperm.xlu1 %14613, %v316_v2   ;;  %863 = vperm.xlu0 %14612, %v316_v2   ;;  %v15003_v4 = vcombine.high %v14999_v3, %v14999_v3  ;;  %v15010_v8 = vcombine.high %v315_v6, %v315_v6  ;;  %v14806_v9 = vmov 3   ;;  %s14807_s16 = smov 15   ;;  %s14808_s17 = smov 1   ;;  %v14809_v10 = vmov 6   ;;  %v15031_v11 = vld [vmem:[%s14985_s20 + $0x8] sm:$0xff]  ;;  %v310_v17 = vld [vmem:[%s14985_s20 + $0x10] sm:$0xff] }
  0x4f   : > { %19350 = vst [vmem:[#allocation13_spill] sm:$0xff] %v15031_v11  ;;  %s14810_s29 = smov 127   ;;  %v14811_v12 = vmov 7   ;;  %v19112_v13 = vmov 0   ;;  %v14813_v14 = vmov 8   ;;  %s14814_s10 = smov 113   ;;  %v334_v15 = vcombine.high %v15031_v11, %v15031_v11 }
  0x50   : > { %19349 = vst [vmem:[#allocation12_spill] sm:$0xff] %v15010_v8  ;;  %s14815_s13 = smov 112   ;;  %s14816_s23 = smov 111   ;;  %v2515_v16 = vld [vmem:[%s19102_s4] sm:$0xf]  ;;  %v19110_v18 = vmov 0.0   ;;  %v335_v19 = vcombine.high %v310_v17, %v310_v17 }
  0x51   : > { %2819 = vmatprep.mubr.f32.mxu0 %v19110_v18  ;;  %2905 = vmatprep.mubr.f32.mxu1 %v19110_v18  ;;  %v311_v20 = vld [vmem:[%s14985_s20 + $0x18] sm:$0xff]  ;;  %v15130_v30 = vld [vmem:[#allocation5] sm:$0x77]  ;;  %v15156_v37 = vld [vmem:[#allocation5 + $0x8] sm:$0x77]  ;;  %v15182_v47 = vshrl.u32 %v381_v42, 7 }
  0x52   : > { %14614 = vset.pattern.permute.xlu1 %v14802_v5  ;;  %351 = vrot.lane.b32.xlu0 %v15003_v4, %s14803_s30  ;;  %v15114_v25 = vcombine.high %v311_v20, %v311_v20  ;;  %vm400_vm0 = vcmp.ge.s32.totalorder %v15130_v30, 1  ;;  %vm947_vm1 = vcmp.lt.s32.totalorder %v15130_v30, 15  ;;  %v15167_v41 = vld [vmem:[%s14985_s20 + $0x20] sm:$0xff]  ;;  %vm401_vm2 = vcmp.ge.s32.totalorder %v15156_v37, 1  ;;  %s14390_s9 = scalar_lea.sflag [#allocation4], %s14979_s18  ;;  %p19943_p11 = scmp.ne.s32.totalorder %s19343_s21, 0 }
  0x53   : > { %1445 = vperm.xlu1 %14614, %v316_v2   ;;  %14616 = vset.pattern.permute.xlu0 %v14804_v7  ;;  %v15147_v35 = vsel %vm400_vm0, 1, %v19112_v13  ;;  %v15162_v39 = vsel %vm947_vm1, 1, %v19112_v13  ;;  %19364 = vst [vmem:[#allocation25_spill] sm:$0xff] %v15182_v47  ;;  %v15191_v48 = vsel %vm401_vm2, 1, %v19112_v13  ;;  %vm948_vm4 = vcmp.lt.s32.totalorder %v15156_v37, 15  ;;  %s14819_s11 = smov [#allocation7]  }
  0x54   : > { %19358 = vst [vmem:[#allocation21_spill] sm:$0xff] %v15147_v35  ;;  %v14495_v38 = vrot.slane %v15147_v35, 9  ;;  %v14503_v43 = vrot.slane %v15162_v39, 9  ;;  %19365 = vst [vmem:[#allocation26_spill] sm:$0xff] %v15191_v48  ;;  %v14818_v51 = vmov 839922192   ;;  %v15249_v6 = vcombine.high %v15167_v41, %v15167_v41 }
  0x55   : > { %v1448_v52 = vunpack.c.l.s4 %v14818_v51  ;;  %v14496_v54 = vrot.slane %v15191_v48, 9  ;;  %v15208_v55 = vsub.s32 5, %v15182_v47  ;;  %v15217_v56 = vsel %vm948_vm4, 1, %v19112_v13 }
  0x56   : > { %655 = vrot.lane.b32.xlu0 %v15003_v4, %s14805_s15  ;;  %vm15176_vm3 = vcmp.ne.s32.totalorder %v14495_v38, 0  ;;  %vm15198_vm6 = vcmp.ne.s32.totalorder %v14503_v43, 0  ;;  %v15220_v57 = vsub.s32 1, %v15182_v47  ;;  %v14504_v1 = vrot.slane %v15217_v56, 9 }
  0x57   : > { %349 = vrot.lane.b32.xlu1 %v14999_v3, %s14803_s30  ;;  %vm440_vm5 = vmand %vm400_vm0, %vm15176_vm3  ;;  %v709_v59 = vrot.slane %v15147_v35, %v15208_v55  ;;  %v1449_v61 = vunpack.c.0.s8 %v1448_v52  ;;  %vm15235_vm8 = vcmp.ne.s32.totalorder %v14496_v54, 0  ;;  %v15251_v7 = vand.u32 127, %v381_v42 }
  0x58   : > { %14615 = vset.pattern.permute.xlu1 %v14806_v9  ;;  %v448_v58 = vsel %vm440_vm5, 1, %v19112_v13  ;;  %vm987_vm7 = vmand %vm400_vm0, %vm15198_vm6  ;;  %v705_v62 = vrot.slane %v15147_v35, %v15220_v57  ;;  %vm15289_vm11 = vcmp.ne.s32.totalorder %v14504_v1, 0 }
  0x59   : > { %v995_v5 = vsel %vm987_vm7, 1, %v19112_v13  ;;  %vm15257_vm9 = vmand %vm947_vm1, %vm15176_vm3  ;;  %vm19147_vm13 = vcmp.lt.s32.totalorder %v15251_v7, 17  ;;  %vm19131_vm14 = vcmp.lt.s32.totalorder %v15251_v7, 16  ;;  %vm19142_vm7 = vcmp.lt.s32.totalorder %v15251_v7, 15 }
  0x5a   : > { %683 = vrot.lane.b32.xlu0 %v15010_v8, %s14805_s15  ;;  %vm15274_vm10 = vmand %vm401_vm2, %vm15235_vm8  ;;  %v15297_v51 = vrot.slane %v705_v62, %v15220_v57  ;;  %v1805_v54 = vsel %vm15257_vm9, 1, %v19112_v13 }
  0x5b   : > { %653 = vrot.lane.b32.xlu1 %v14999_v3, %s14805_s15  ;;  %vm15327_vm0 = vmand %vm401_vm2, %vm15289_vm11  ;;  %v1820_v18 = vrot.slane %v1805_v54, %v15208_v55 }
  0x5c   : > { %vm830_vm3 = vcmp.eq.s32.totalorder %v15297_v51, 1 }
  0x5d   : > { %v15404_v49 = vrot.slane %v1820_v18, %v15220_v57 }
  0x5e   : > { %898 = vrot.lane.b32.xlu0 %v14999_v3, %s14807_s16 }
  0x5f   : > { %379 = vrot.lane.b32.xlu1 %v15010_v8, %s14803_s30 }
  0x62   : > { %928 = vrot.lane.b32.xlu0 %v15010_v8, %s14807_s16 }
  0x63   : > { %1409 = vperm.xlu1 %14615, %v316_v2  }
  0x66   : > { %1201 = vrot.lane.b32.xlu0 %v15003_v4, %s14808_s17 }
  0x67   : > { %900 = vrot.lane.b32.xlu1 %v15003_v4, %s14807_s16 }
  0x68   : > { %14617 = vset.pattern.permute.xlu1 %v14809_v10  ;;  %v15261_v10 = vld [vmem:[#allocation5 + $0x10] sm:$0x77] }
  0x69   : > { %19375 = vst [vmem:[#allocation30_spill] sm:$0xff] %v15261_v10  ;;  %vm402_vm12 = vcmp.ge.s32.totalorder %v15261_v10, 1 }
  0x6a   : > { %1713 = vperm.xlu0 %14616, %v316_v2  }
  0x6b   : > { %1199 = vrot.lane.b32.xlu1 %v14999_v3, %s14808_s17 }
  0x6e   : > { %1507 = vrot.lane.b32.xlu0 %v15031_v11, %s14810_s29 }
  0x6f   : > { %1229 = vrot.lane.b32.xlu1 %v15010_v8, %s14808_s17  ;;  %14618 = vset.pattern.permute.xlu0 %v14811_v12  ;;  %v15264_v12 = vsub.s32 6, %v15182_v47 }
  0x71   : > { %19376 = vst [vmem:[#allocation31_spill] sm:$0xff] %v15264_v12 }
  0x72   : > { %2219 = vperm.xlu0 %14618, %v316_v2  }
  0x73   : > { %1974 = vperm.xlu1 %14617, %v316_v2  }
  0x76   : > { %14619 = vset.pattern.permute.xlu0 %v19112_v13 }
  0x77   : > { %1505 = vrot.lane.b32.xlu1 %v15003_v4, %s14810_s29  ;;  %618 = vperm.xlu0 %14619, %v316_v2  }
  0x78   : > { %14620 = vset.pattern.permute.xlu1 %v14813_v14  ;;  %v15267_v14 = vrot.slane %v709_v59, %v15220_v57  ;;  %v1255_v59 = vrot.slane %v15147_v35, %v15264_v12 }
  0x7a   : > { %vm831_vm15 = vcmp.eq.s32.totalorder %v15267_v14, 1 }
  0x7b   : > { %1503 = vrot.lane.b32.xlu1 %v14999_v3, %s14810_s29  ;;  %1748 = vrot.lane.b32.xlu0 %v14999_v3, %s14814_s10 }
  0x7f   : > { %1750 = vrot.lane.b32.xlu1 %v15003_v4, %s14814_s10  ;;  %353 = vrot.lane.b32.xlu0 %v15031_v11, %s14803_s30 }
  0x83   : > { %1752 = vrot.lane.b32.xlu1 %v15031_v11, %s14814_s10  ;;  %657 = vrot.lane.b32.xlu0 %v15031_v11, %s14805_s15 }
  0x87   : > { %2480 = vperm.xlu1 %14620, %v316_v2   ;;  %2011 = vrot.lane.b32.xlu0 %v15003_v4, %s14815_s13  ;;  %v463_v2 = vrot.slane %v448_v58, %v15208_v55 }
  0x89   : > { %v15294_v45 = vrot.slane %v463_v2, %v15220_v57  ;;  %v1559_v2 = vrot.slane %v15162_v39, %v15264_v12 }
  0x8b   : > { %2009 = vrot.lane.b32.xlu0 %v14999_v3, %s14815_s13  ;;  %355 = vrot.lane.b32.xlu1 %v334_v15, %s14803_s30  ;;  %vm585_vm2 = vcmp.eq.s32.totalorder %v15294_v45, 1 }
  0x8c   : > { %14621 = vset.pattern.permute.xlu1 %v19112_v13 }
  0x8f   : > { %904 = vrot.lane.b32.xlu0 %v334_v15, %s14807_s16  ;;  %659 = vrot.lane.b32.xlu1 %v334_v15, %s14805_s15 }
  0x93   : > { %2258 = vrot.lane.b32.xlu0 %v15031_v11, %s14816_s23  ;;  %2013 = vrot.lane.b32.xlu1 %v15031_v11, %s14815_s13 }
  0x97   : > { %2518 = vperm.xlu0 %14619, %v2515_v16   ;;  %902 = vrot.lane.b32.xlu1 %v15031_v11, %s14807_s16  ;;  %v1816_v16 = vrot.slane %v1805_v54, %v15220_v57 }
  0x9b   : > { %1509 = vrot.lane.b32.xlu0 %v334_v15, %s14810_s29  ;;  %2256 = vrot.lane.b32.xlu1 %v15003_v4, %s14816_s23  ;;  %v459_v4 = vrot.slane %v448_v58, %v15220_v57  ;;  %v449_v58 = vsel %vm15274_vm10, 1, %v19112_v13 }
  0x9d   : > { %v15300_v52 = vrot.slane %v459_v4, %v15220_v57 }
  0x9f   : > { %1754 = vrot.lane.b32.xlu0 %v334_v15, %s14814_s10  ;;  %2254 = vrot.lane.b32.xlu1 %v14999_v3, %s14816_s23  ;;  %vm584_vm5 = vcmp.eq.s32.totalorder %v15300_v52, 1 }
  0xa3   : > { %357 = vrot.lane.b32.xlu0 %v310_v17, %s14803_s30  ;;  %1203 = vrot.lane.b32.xlu1 %v15031_v11, %s14808_s17 }
  0xa7   : > { %661 = vrot.lane.b32.xlu0 %v310_v17, %s14805_s15  ;;  %1205 = vrot.lane.b32.xlu1 %v334_v15, %s14808_s17 }
  0xab   : > { %2015 = vrot.lane.b32.xlu0 %v334_v15, %s14815_s13  ;;  %1511 = vrot.lane.b32.xlu1 %v310_v17, %s14810_s29 }
  0xaf   : > { %906 = vrot.lane.b32.xlu0 %v310_v17, %s14807_s16  ;;  %1756 = vrot.lane.b32.xlu1 %v310_v17, %s14814_s10 }
  0xb3   : > { %2260 = vrot.lane.b32.xlu0 %v334_v15, %s14816_s23  ;;  %359 = vrot.lane.b32.xlu1 %v335_v19, %s14803_s30  ;;  %v1010_v15 = vrot.slane %v995_v5, %v15208_v55 }
  0xb7   : > { %1207 = vrot.lane.b32.xlu0 %v310_v17, %s14808_s17  ;;  %663 = vrot.lane.b32.xlu1 %v335_v19, %s14805_s15 }
  0xbb   : > { %1513 = vrot.lane.b32.xlu0 %v335_v19, %s14810_s29  ;;  %2017 = vrot.lane.b32.xlu1 %v310_v17, %s14815_s13 }
  0xbf   : > { %1758 = vrot.lane.b32.xlu0 %v335_v19, %s14814_s10  ;;  %908 = vrot.lane.b32.xlu1 %v335_v19, %s14807_s16 }
  0xc3   : > { %361 = vrot.lane.b32.xlu0 %v311_v20, %s14803_s30  ;;  %2262 = vrot.lane.b32.xlu1 %v310_v17, %s14816_s23  ;;  %v15279_v17 = vsub.s32 2, %v15182_v47 }
  0xc5   : > { %19379 = vst [vmem:[#allocation32_spill] sm:$0xff] %v15279_v17  ;;  %v1555_v4 = vrot.slane %v15162_v39, %v15279_v17  ;;  %v15366_v11 = vrot.slane %v1255_v59, %v15279_v17  ;;  %v15374_v54 = vrot.slane %v1559_v2, %v15279_v17  ;;  %v2061_v59 = vrot.slane %v15162_v39, %v15220_v57 }
  0xc6   : > { %v15393_v2 = vrot.slane %v1816_v16, %v15220_v57 }
  0xc7   : > { %665 = vrot.lane.b32.xlu0 %v311_v20, %s14805_s15  ;;  %1209 = vrot.lane.b32.xlu1 %v335_v19, %s14808_s17 }
  0xc9   : > { %v15102_v21 = vpop.permute.xlu1 %1164  ;;  %v15104_v22 = vpop.permute.xlu0 %863 }
  0xca   : > { %19351 = vst [vmem:[#allocation14_spill] sm:$0xff] %v15104_v22 }
  0xcb   : > { %2019 = vrot.lane.b32.xlu0 %v335_v19, %s14815_s13  ;;  %1515 = vrot.lane.b32.xlu1 %v311_v20, %s14810_s29 }
  0xcd   : > { %v15108_v23 = vpop.permute.xlu0 %351 }
  0xce   : > { %19352 = vst [vmem:[#allocation15_spill] sm:$0xff] %v15108_v23  ;;  %v15110_v24 = vpop.permute.xlu1 %1445 }
  0xcf   : > { %910 = vrot.lane.b32.xlu0 %v311_v20, %s14807_s16  ;;  %1760 = vrot.lane.b32.xlu1 %v311_v20, %s14814_s10 }
  0xd1   : > { %v15116_v26 = vpop.permute.xlu0 %655 }
  0xd2   : > { %19353 = vst [vmem:[#allocation16_spill] sm:$0xff] %v15116_v26  ;;  %v15118_v27 = vpop.permute.xlu1 %349 }
  0xd3   : > { %2264 = vrot.lane.b32.xlu0 %v335_v19, %s14816_s23  ;;  %363 = vrot.lane.b32.xlu1 %v15114_v25, %s14803_s30  ;;  %v15282_v19 = vsub.s32 %v1449_v61, %v15182_v47  ;;  %v1251_v61 = vrot.slane %v15147_v35, %v15279_v17  ;;  %v471_v35 = vrot.slane %v449_v58, %v15208_v55  ;;  %v19388_v47 = vmov 0  }
  0xd4   : > { %v996_v8 = vsel %vm15327_vm0, 1, %v19388_v47  ;;  %vm2303_vm0 = vmand %vm947_vm1, %vm15198_vm6  ;;  %vm19144_vm1 = vcmp.lt.s32.totalorder %v15261_v10, 15 }
  0xd5   : > { %v15123_v28 = vpop.permute.xlu0 %683  ;;  %v15412_v16 = vrot.slane %v471_v35, %v15220_v57  ;;  %v19392_v35 = vmov 0 }
  0xd6   : > { %19354 = vst [vmem:[#allocation17_spill] sm:$0xff] %v15123_v28  ;;  %v15125_v29 = vpop.permute.xlu1 %653 }
  0xd7   : > { %1211 = vrot.lane.b32.xlu0 %v311_v20, %s14808_s17  ;;  %667 = vrot.lane.b32.xlu1 %v15114_v25, %s14805_s15  ;;  %19391 = vst [vmem:[#allocation39_spill] sm:$0xff] %v15412_v16  ;;  %v700_v18 = vsel %vm19131_vm14, %v15125_v29, %v15116_v26  ;;  %v14511_v26 = vld [vmem:[%s19101_s3 + $0x4] sm:$0xf] }
  0xd9   : > { %v15132_v31 = vpop.permute.xlu0 %898 }
  0xda   : > { %v15134_v32 = vpop.permute.xlu1 %379 }
  0xdb   : > { %19355 = vst [vmem:[#allocation18_spill] sm:$0xff] %v15134_v32  ;;  %1517 = vrot.lane.b32.xlu0 %v15114_v25, %s14810_s29  ;;  %2021 = vrot.lane.b32.xlu1 %v311_v20, %s14815_s13 }
  0xdd   : > { %v15140_v33 = vpop.permute.xlu0 %928 }
  0xde   : > { %19356 = vst [vmem:[#allocation19_spill] sm:$0xff] %v15140_v33  ;;  %v15142_v34 = vpop.permute.xlu1 %1409  ;;  %v946_v52 = vsel %vm19142_vm7, %v15140_v33, %v15132_v31 }
  0xdf   : > { %19357 = vst [vmem:[#allocation20_spill] sm:$0xff] %v15142_v34  ;;  %1762 = vrot.lane.b32.xlu0 %v15114_v25, %s14814_s10  ;;  %912 = vrot.lane.b32.xlu1 %v15114_v25, %s14807_s16 }
  0xe1   : > { %v15154_v36 = vpop.permute.xlu0 %1201 }
  0xe2   : > { %19359 = vst [vmem:[#allocation22_spill] sm:$0xff] %v15154_v36  ;;  %v15164_v40 = vpop.permute.xlu1 %900 }
  0xe3   : > { %19360 = vst [vmem:[#allocation23_spill] sm:$0xff] %v15164_v40  ;;  %365 = vrot.lane.b32.xlu0 %v15167_v41, %s14803_s30  ;;  %2266 = vrot.lane.b32.xlu1 %v311_v20, %s14816_s23  ;;  %v1006_v20 = vrot.slane %v995_v5, %v15220_v57  ;;  %v945_v14 = vsel %vm19142_vm7, %v15132_v31, %v15164_v40  ;;  %vm19410_vm7 = vcmp.eq.s32.totalorder %v15366_v11, 1 }
  0xe5   : > { %v15174_v44 = vpop.permute.xlu0 %1713  ;;  %v15332_v1 = vrot.slane %v1006_v20, %v15220_v57  ;;  %v467_v20 = vrot.slane %v449_v58, %v15220_v57  ;;  %v15377_v58 = vrot.slane %v1555_v4, %v15279_v17 }
  0xe6   : > { %19361 = vst [vmem:[#allocation24_spill] sm:$0xff] %v15174_v44  ;;  %v15180_v46 = vpop.permute.xlu1 %1199 }
  0xe7   : > { %669 = vrot.lane.b32.xlu0 %v15167_v41, %s14805_s15  ;;  %1213 = vrot.lane.b32.xlu1 %v15114_v25, %s14808_s17  ;;  %v15396_v4 = vrot.slane %v467_v20, %v15220_v57  ;;  %v1018_v20 = vrot.slane %v996_v8, %v15208_v55 }
  0xe9   : > { %v15202_v50 = vpop.permute.xlu0 %1507  ;;  %19390 = vst [vmem:[#allocation38_spill] sm:$0xff] %v15396_v4 }
  0xea   : > { %v15204_v53 = vpop.permute.xlu1 %1229 }
  0xeb   : > { %19368 = vst [vmem:[#allocation27_spill] sm:$0xff] %v15204_v53  ;;  %2023 = vrot.lane.b32.xlu0 %v15114_v25, %s14815_s13  ;;  %1519 = vrot.lane.b32.xlu1 %v15167_v41, %s14810_s29 }
  0xed   : > { %v15229_v60 = vpop.permute.xlu0 %2219 }
  0xee   : > { %19369 = vst [vmem:[#allocation28_spill] sm:$0xff] %v15229_v60  ;;  %v15233_v63 = vpop.permute.xlu1 %1974  ;;  %v15369_v60 = vrot.slane %v1251_v61, %v15279_v17  ;;  %v717_v61 = vrot.slane %v15191_v48, %v15208_v55 }
  0xef   : > { %19370 = vst [vmem:[#allocation29_spill] sm:$0xff] %v15233_v63  ;;  %914 = vrot.lane.b32.xlu0 %v15167_v41, %s14807_s16  ;;  %1764 = vrot.lane.b32.xlu1 %v15167_v41, %s14814_s10 }
  0xf0   : > { %v15439_v4 = vrot.slane %v717_v61, %v15220_v57  ;;  %vm1376_vm10 = vcmp.eq.s32.totalorder %v15369_v60, 1 }
  0xf2   : > { %v15285_v38 = vpop.permute.xlu1 %1505  ;;  %v15287_v42 = vpop.permute.xlu0 %618  ;;  %19396 = vst [vmem:[#allocation42_spill] sm:$0xff] %v15439_v4 }
  0xf3   : > { %19380 = vst [vmem:[#allocation33_spill] sm:$0xff] %v15287_v42  ;;  %2268 = vrot.lane.b32.xlu0 %v15114_v25, %s14816_s23  ;;  %367 = vrot.lane.b32.xlu1 %v15249_v6, %s14803_s30  ;;  %v15317_v25 = vrot.slane %v1010_v15, %v15220_v57  ;;  %v15345_v15 = vsel %vm402_vm12, 1, %v19112_v13  ;;  %v713_v13 = vrot.slane %v15191_v48, %v15220_v57 }
  0xf4   : > { %19387 = vst [vmem:[#allocation36_spill] sm:$0xff] %v15345_v15  ;;  %v14497_v63 = vrot.slane %v15345_v15, 9 }
  0xf5   : > { %vm1132_vm9 = vcmp.eq.s32.totalorder %v15317_v25, 1  ;;  %v15407_v30 = vrot.slane %v713_v13, %v15220_v57  ;;  %v15425_v13 = vsel %vm2303_vm0, 1, %v19388_v47  ;;  %vm19141_vm0 = vcmask 31744  }
  0xf6   : > { %v15338_v5 = vpop.permute.xlu1 %1503  ;;  %v15340_v9 = vpop.permute.xlu0 %1748  ;;  %vm15427_vm6 = vcmp.ne.s32.totalorder %v14497_v63, 0  ;;  %v701_v63 = vsel %vm19131_vm14, %v15123_v28, %v15125_v29  ;;  %vm15466_vm14 = vmand %vm948_vm4, %vm15235_vm8  ;;  %v847_v28 = vsel %vm831_vm15, %v700_v18, 0.0  ;;  %v2326_v0 = vrot.slane %v15425_v13, %v15208_v55 }
  0xf7   : > { %19385 = vst [vmem:[#allocation34_spill] sm:$0xff] %v15338_v5  ;;  %19386 = vst [vmem:[#allocation35_spill] sm:$0xff] %v15340_v9  ;;  %1215 = vrot.lane.b32.xlu0 %v15167_v41, %s14808_s17  ;;  %671 = vrot.lane.b32.xlu1 %v15249_v6, %s14805_s15  ;;  %v1014_v9 = vrot.slane %v996_v8, %v15220_v57  ;;  %v19393_v35 = vsel %vm15427_vm6, 4294967295, %v19392_v35  ;;  %vm19223_vm15 = vcmp.lt.s32.totalorder %v15251_v7, 127  ;;  %v846_v18 = vsel %vm830_vm3, %v701_v63, 0.0 }
  0xf8   : > { %19394 = vst [vmem:[#allocation40_spill] sm:$0xff] %v19393_v35  ;;  %vm15485_vm8 = vmand %vm402_vm12, %vm15427_vm6  ;;  %v15517_v35 = vsel %vm15466_vm14, 1, %v19388_v47  ;;  %v867_v51 = vmul.f32 %v15104_v22, %v847_v28  ;;  %vm19332_vm14 = vcmp.lt.s32.totalorder %v15251_v7, 113  ;;  %v1148_v28 = vsel %vm1132_vm9, %v945_v14, 0.0 }
  0xf9   : > { %v15460_v4 = vrot.slane %v1014_v9, %v15220_v57  ;;  %v15538_v31 = vrot.slane %v2326_v0, %v15220_v57  ;;  %v866_v33 = vmul.f32 %v15104_v22, %v846_v18  ;;  %vm1681_vm3 = vcmp.eq.s32.totalorder %v15374_v54, 1 }
  0xfa   : > { %v15379_v62 = vpop.permute.xlu1 %1750  ;;  %v15381_v44 = vpop.permute.xlu0 %353  ;;  %vm2041_vm9 = vcmp.lt.s32.totalorder %v15251_v7, 112 }
  0xfb   : > { %19389 = vst [vmem:[#allocation37_spill] sm:$0xff] %v15381_v44  ;;  %1521 = vrot.lane.b32.xlu0 %v15249_v6, %s14810_s29  ;;  %v2065_v44 = vrot.slane %v15162_v39, %v15208_v55  ;;  %2025 = vrot.lane.b32.xlu1 %v15167_v41, %s14815_s13  ;;  %v398_v39 = vsel %vm19147_vm13, %v15118_v27, %v15108_v23 }
  0xfc   : > { %v15436_v23 = vrot.slane %v2061_v59, %v15220_v57  ;;  %v399_v59 = vsel %vm19147_vm13, %v15134_v32, %v15118_v27  ;;  %v601_v27 = vsel %vm585_vm2, %v398_v39, 0.0  ;;  %v15498_v39 = vsel %vm19144_vm1, 1, %v19388_v47 }
  0xfd   : > { %v15457_v61 = vrot.slane %v2065_v44, %v15220_v57  ;;  %v15477_v44 = vrot.slane %v1018_v20, %v15220_v57  ;;  %v622_v9 = vmul.f32 %v15287_v42, %v601_v27  ;;  %v2702_v20 = vsel %vm19141_vm0, %v14511_v26, 0  ;;  %v15510_v27 = vld [vmem:[%s14985_s20 + $0x28] sm:$0xff] }
  0xfe   : > { %v15431_v8 = vpop.permute.xlu1 %1752  ;;  %v15433_v16 = vpop.permute.xlu0 %657  ;;  %v600_v32 = vsel %vm584_vm5, %v399_v59, 0.0  ;;  %19403 = vst [vmem:[#allocation45_spill] sm:$0xff] %v15510_v27  ;;  %v1563_v26 = vrot.slane %v15217_v56, %v15279_v17  ;;  %v15530_v59 = vsel %vm15485_vm8, 1, %v19388_v47  ;;  %v14505_v29 = vrot.slane %v15498_v39, 9 }
  0xff   : > { %19395 = vst [vmem:[#allocation41_spill] sm:$0xff] %v15431_v8  ;;  %1766 = vrot.lane.b32.xlu0 %v15249_v6, %s14814_s10  ;;  %916 = vrot.lane.b32.xlu1 %v15249_v6, %s14807_s16  ;;  %19399 = vst [vmem:[#allocation43_spill] sm:$0xff] %v15477_v44  ;;  %v621_v63 = vmul.f32 %v15287_v42, %v600_v32  ;;  %v15540_v32 = vand.u32 4294901760, %v2702_v20  ;;  %vm19405_vm2 = vcmp.lt.s32.totalorder %v15251_v7, 1  ;;  %vm1942_vm5 = vcmp.eq.s32.totalorder %v15404_v49, 1 }
 0x100   : > { %v1246_v45 = vsel %vm19405_vm2, %v15180_v46, %v15154_v36  ;;  %v883_v25 = vadd.f32 %v867_v51, %v622_v9  ;;  %vm19406_vm8 = vcmp.eq.s32.totalorder %v15332_v1, 1  ;;  %v1824_v42 = vrot.slane %v15517_v35, %v15220_v57 }
 0x101   : > { %19404 = vst [vmem:[#allocation46_spill] sm:$0xff] %v15540_v32  ;;  %v1147_v0 = vsel %vm19406_vm8, %v946_v52, 0.0  ;;  %v1259_v36 = vrot.slane %v15191_v48, %v15279_v17  ;;  %v475_v9 = vrot.slane %v15530_v59, %v15220_v57  ;;  %v1168_v1 = vmul.f32 %v15102_v21, %v1148_v28 }
 0x102   : > { %v15505_v44 = vpop.permute.xlu1 %2480  ;;  %v15507_v40 = vpop.permute.xlu0 %2011  ;;  %v1247_v51 = vsel %vm19405_vm2, %v15204_v53, %v15180_v46  ;;  %vm1680_vm8 = vcmp.eq.s32.totalorder %v15377_v58, 1  ;;  %v882_v52 = vadd.f32 %v866_v33, %v621_v63  ;;  %vm2187_vm0 = vcmp.eq.s32.totalorder %v15457_v61, 1 }
 0x103   : > { %19402 = vst [vmem:[#allocation44_spill] sm:$0xff] %v15505_v44  ;;  %369 = vrot.lane.b32.xlu0 %v15510_v27, %s14803_s30  ;;  %2270 = vrot.lane.b32.xlu1 %v15167_v41, %s14816_s23  ;;  %v2322_v41 = vrot.slane %v15425_v13, %v15220_v57  ;;  %v15567_v13 = vrot.slane %v15110_v24, %v15282_v19  ;;  %vm15587_vm2 = vcmp.ne.s32.totalorder %v14505_v29, 0  ;;  %v19412_v46 = vmov 0 }
 0x104   : > { %v1263_v24 = vrot.slane %v15191_v48, %v15264_v12  ;;  %v15585_v19 = vsub.f32 %v2702_v20, %v15540_v32  ;;  %v19413_v46 = vsel %vm15587_vm2, 4294967295, %v19412_v46  ;;  %v1167_v33 = vmul.f32 %v15102_v21, %v1147_v0 }
 0x105   : > { %19409 = vst [vmem:[#allocation49_spill] sm:$0xff] %v15567_v13  ;;  %19414 = vst [vmem:[#allocation51_spill] sm:$0xff] %v19413_v46  ;;  %vm1941_vm1 = vcmp.eq.s32.totalorder %v15393_v2, 1  ;;  %v1184_v63 = vadd.f32 %v1168_v1, %v883_v25  ;;  %v15594_v11 = vrot.slane %v1563_v26, %v15279_v17  ;;  %v15597_v28 = vrot.slane %v2322_v41, %v15220_v57 }
 0x106   : > { %v15555_v14 = vpop.permute.xlu1 %355  ;;  %v15557_v18 = vpop.permute.xlu0 %2009  ;;  %19411 = vst [vmem:[#allocation50_spill] sm:$0xff] %v15585_v19  ;;  %v15606_v48 = vrot.slane %v1824_v42, %v15220_v57  ;;  %v15610_v0 = vcombine.high %v15510_v27, %v15510_v27  ;;  %v721_v26 = vrot.slane %v15345_v15, %v15220_v57  ;;  %v1455_v60 = vmul.f32 %v15567_v13, %v14999_v3 }
 0x107   : > { %19407 = vst [vmem:[#allocation47_spill] sm:$0xff] %v15555_v14  ;;  %19408 = vst [vmem:[#allocation48_spill] sm:$0xff] %v15557_v18  ;;  %673 = vrot.lane.b32.xlu0 %v15510_v27, %s14805_s15  ;;  %v1393_v14 = vsel %vm19410_vm7, %v1246_v45, 0.0  ;;  %1217 = vrot.lane.b32.xlu1 %v15249_v6, %s14808_s17  ;;  %v1392_v45 = vsel %vm1376_vm10, %v1247_v51, 0.0  ;;  %v1183_v41 = vadd.f32 %v1167_v33, %v882_v52  ;;  %vm2186_vm7 = vcmp.eq.s32.totalorder %v15436_v23, 1 }
 0x108   : > { %v1413_v25 = vmul.f32 %v15142_v34, %v1393_v14  ;;  %v15621_v42 = vrot.slane %v1259_v36, %v15279_v17  ;;  %vm15627_vm10 = vmand %vm402_vm12, %vm15587_vm2  ;;  %v15631_v14 = vld [vmem:[#allocation5 + $0x18] sm:$0x77]  ;;  %v15637_v3 = vrot.slane %v475_v9, %v15220_v57  ;;  %v15640_v36 = vrot.slane %v1263_v24, %v15279_v17 }
 0x109   : > { %19418 = vst [vmem:[#allocation53_spill] sm:$0xff] %v15631_v14  ;;  %v1567_v51 = vrot.slane %v15217_v56, %v15264_v12  ;;  %v15645_v52 = vand.u32 4294901760, %v15585_v19  ;;  %v1412_v33 = vmul.f32 %v15142_v34, %v1392_v45  ;;  %v1549_v53 = vsel %vm19223_vm15, %v15285_v38, %v15202_v50  ;;  %vm15675_vm12 = vmand %vm948_vm4, %vm15289_vm11 }
 0x10a   : > { %v15601_v20 = vpop.permute.xlu1 %659  ;;  %v15603_v29 = vpop.permute.xlu0 %904  ;;  %v1429_v46 = vadd.f32 %v1413_v25, %v1184_v63  ;;  %v1794_v9 = vsel %vm19332_vm14, %v15379_v62, %v15431_v8  ;;  %v2069_v45 = vrot.slane %v15217_v56, %v15220_v57  ;;  %v15669_v63 = vsel %vm15627_vm10, 1, %v19388_v47  ;;  %v19428_v25 = vld [vmem:[#allocation24_spill] sm:$0xff] }
 0x10b   : > { %19415 = vst [vmem:[#allocation52_spill] sm:$0xff] %v15603_v29  ;;  %2027 = vrot.lane.b32.xlu0 %v15249_v6, %s14815_s13  ;;  %1523 = vrot.lane.b32.xlu1 %v15510_v27, %s14810_s29  ;;  %19419 = vst [vmem:[#allocation54_spill] sm:$0xff] %v15645_v52  ;;  %v15662_v29 = vrot.slane %v721_v26, %v15220_v57  ;;  %vm19174_vm13 = vcmp.ge.s32.totalorder %v15631_v14, 1  ;;  %v1428_v26 = vadd.f32 %v1412_v33, %v1183_v41  ;;  %v19424_v33 = vld [vmem:[#allocation35_spill] sm:$0xff] }
 0x10c   : > { %v1550_v8 = vsel %vm19223_vm15, %v15338_v5, %v15285_v38  ;;  %v1471_v12 = vcombine.high %v1455_v60, %v1455_v60  ;;  %v1697_v37 = vsel %vm1681_vm3, %v1549_v53, 0.0  ;;  %v1958_v41 = vsel %vm1942_vm5, %v1794_v9, 0.0  ;;  %v19425_v53 = vld [vmem:[#allocation38_spill] sm:$0xff] }
 0x10d   : > { %vm832_vm4 = vcmp.eq.s32.totalorder %v15407_v30, 1  ;;  %v15698_v38 = vrot.slane %v1567_v51, %v15279_v17  ;;  %v2823_v1 = vsub.f32 %v15585_v19, %v15645_v52  ;;  %v1795_v54 = vsel %vm19332_vm14, %v19424_v33, %v15379_v62  ;;  %v19429_v33 = vld [vmem:[#allocation29_spill] sm:$0xff] }
 0x10e   : > { %v15657_v24 = vpop.permute.xlu1 %2013  ;;  %v15659_v32 = vpop.permute.xlu0 %2258  ;;  %vm586_vm11 = vcmp.eq.s32.totalorder %v19425_v53, 1  ;;  %v1488_v49 = vadd.f32 %v1471_v12, %v1429_v46  ;;  %vm2447_vm3 = vcmp.eq.s32.totalorder %v15597_v28, 1  ;;  %v1828_v9 = vrot.slane %v15517_v35, %v15208_v55 }
 0x10f   : > { %19420 = vst [vmem:[#allocation55_spill] sm:$0xff] %v15657_v24  ;;  %v2055_v43 = vsel %vm2041_vm9, %v15507_v40, %v15657_v24  ;;  %918 = vrot.lane.b32.xlu0 %v15510_v27, %s14807_s16  ;;  %1768 = vrot.lane.b32.xlu1 %v15510_v27, %s14814_s10  ;;  %19423 = vst [vmem:[#allocation56_spill] sm:$0xff] %v15698_v38  ;;  %v15713_v51 = vsel %vm15675_vm12, 1, %v19388_v47  ;;  %v1696_v5 = vsel %vm1680_vm8, %v1550_v8, 0.0  ;;  %vm1133_vm5 = vcmp.eq.s32.totalorder %v15460_v4, 1 }
 0x110   : > { %v2203_v52 = vsel %vm2187_vm0, %v2055_v43, 0.0  ;;  %v1022_v35 = vrot.slane %v15669_v63, %v15220_v57  ;;  %v15729_v46 = vsel %vm19174_vm13, 1, %v19388_v47  ;;  %v1717_v58 = vmul.f32 %v19428_v25, %v1697_v37 }
 0x111   : > { %19427 = vst [vmem:[#allocation57_spill] sm:$0xff] %v15729_v46  ;;  %v1487_v8 = vadd.f32 %v1455_v60, %v1428_v26  ;;  %v1978_v61 = vmul.f32 %v19429_v33, %v1958_v41  ;;  %v2056_v43 = vsel %vm2041_vm9, %v15557_v18, %v15507_v40  ;;  %v1957_v19 = vsel %vm1941_vm1, %v1795_v54, 0.0 }
 0x112   : > { %v15720_v62 = vpop.permute.xlu1 %902  ;;  %v15722_v12 = vpop.permute.xlu0 %2518  ;;  %vm19179_vm0 = vcmask 1043456   ;;  %v15744_v37 = vrot.slane %v2069_v45, %v15220_v57  ;;  %v479_v60 = vrot.slane %v15530_v59, %v15208_v55  ;;  %v2330_v26 = vrot.slane %v15713_v51, %v15220_v57 }
 0x113   : > { %19426 = vst [vmem:[#allocation38_spill] sm:$0xff] %v15722_v12  ;;  %2272 = vrot.lane.b32.xlu0 %v15249_v6, %s14816_s23  ;;  %371 = vrot.lane.b32.xlu1 %v15610_v0, %s14803_s30  ;;  %v1716_v40 = vmul.f32 %v19428_v25, %v1696_v5  ;;  %v1733_v41 = vadd.f32 %v1717_v58, %v1488_v49  ;;  %v19430_v6 = vld [vmem:[#allocation28_spill] sm:$0xff]  ;;  %vm1378_vm1 = vcmp.eq.s32.totalorder %v15621_v42, 1  ;;  %v15753_v2 = vand.u32 4294901760, %v2823_v1 }
 0x114   : > { %v2223_v18 = vmul.f32 %v19430_v6, %v2203_v52  ;;  %v2202_v54 = vsel %vm2186_vm7, %v2056_v43, 0.0  ;;  %v15760_v59 = vrot.slane %v1828_v9, %v15220_v57  ;;  %v15763_v38 = vrot.slane %v1022_v35, %v15220_v57  ;;  %v19434_v1 = vld [vmem:[#allocation16_spill] sm:$0xff]  ;;  %v19439_v43 = vld [vmem:[#allocation15_spill] sm:$0xff] }
 0x115   : > { %19431 = vst [vmem:[#allocation24_spill] sm:$0xff] %v15753_v2  ;;  %v14498_v5 = vrot.slane %v15729_v46, 9  ;;  %v1732_v49 = vadd.f32 %v1716_v40, %v1487_v8  ;;  %v1977_v52 = vmul.f32 %v19429_v33, %v1957_v19  ;;  %v1994_v58 = vadd.f32 %v1978_v61, %v1733_v41  ;;  %v19438_v61 = vld [vmem:[#allocation37_spill] sm:$0xff] }
 0x116   : > { %v2257_v45 = vpop.permute.xlu1 %2256  ;;  %v15757_v24 = vpop.permute.xlu0 %1509  ;;  %19432 = vst [vmem:[#allocation58_spill] sm:$0xff] %v15760_v59  ;;  %vm19433_vm8 = vcmp.lt.s32.totalorder %v15251_v7, 111  ;;  %vm19435_vm7 = vcmp.lt.s32.totalorder %v15251_v7, 16  ;;  %vm19436_vm10 = vcmp.eq.s32.totalorder %v15538_v31, 1  ;;  %v15781_v19 = vrot.slane %v479_v60, %v15220_v57 }
 0x117   : > { %v2300_v23 = vsel %vm19433_vm8, %v2257_v45, %v15659_v32  ;;  %1219 = vrot.lane.b32.xlu0 %v15510_v27, %s14808_s17  ;;  %v699_v9 = vsel %vm19435_vm7, %v19434_v1, %v15433_v16  ;;  %675 = vrot.lane.b32.xlu1 %v15610_v0, %s14805_s15  ;;  %v15784_v8 = vrot.slane %v2330_v26, %v15220_v57  ;;  %vm19440_vm12 = vcmp.lt.s32.totalorder %v15251_v7, 17  ;;  %v19445_v26 = vld [vmem:[#allocation23_spill] sm:$0xff] }
 0x118   : > { %v2464_v35 = vsel %vm19436_vm10, %v2300_v23, 0.0  ;;  %19437 = vst [vmem:[#allocation16_spill] sm:$0xff] %v15781_v19  ;;  %v397_v40 = vsel %vm19440_vm12, %v19439_v43, %v19438_v61  ;;  %v2222_v41 = vmul.f32 %v19430_v6, %v2202_v54  ;;  %v2239_v1 = vadd.f32 %v2223_v18, %v1994_v58 }
 0x119   : > { %v2484_v31 = vmul.f32 %v15505_v44, %v2464_v35  ;;  %vm19442_vm8 = vcmp.lt.s32.totalorder %v15261_v10, 15  ;;  %vm19446_vm10 = vcmp.lt.s32.totalorder %v15251_v7, 15  ;;  %v725_v18 = vrot.slane %v15345_v15, %v15208_v55 }
 0x11a   : > { %vm15796_vm7 = vmand %vm19442_vm8, %vm15427_vm6  ;;  %v944_v19 = vsel %vm19446_vm10, %v19445_v26, %v15720_v62  ;;  %v15804_v59 = vpop.permute.xlu1 %2254  ;;  %v15806_v43 = vpop.permute.xlu0 %1754  ;;  %v1267_v54 = vrot.slane %v15345_v15, %v15279_v17  ;;  %vm15812_vm12 = vcmp.ne.s32.totalorder %v14498_v5, 0  ;;  %v19448_v58 = vmov 0 }
 0x11b   : > { %19447 = vst [vmem:[#allocation37_spill] sm:$0xff] %v15804_v59  ;;  %v19449_v58 = vsel %vm15812_vm12, 4294967295, %v19448_v58  ;;  %v1993_v35 = vadd.f32 %v1977_v52, %v1732_v49  ;;  %v848_v23 = vsel %vm832_vm4, %v699_v9, 0.0  ;;  %v2500_v10 = vadd.f32 %v2484_v31, %v2239_v1  ;;  %1525 = vrot.lane.b32.xlu0 %v15610_v0, %s14810_s29  ;;  %2029 = vrot.lane.b32.xlu1 %v15510_v27, %s14815_s13  ;;  %v19453_v52 = vld [vmem:[#allocation42_spill] sm:$0xff]  ;;  %v19458_v31 = vld [vmem:[#allocation39_spill] sm:$0xff] }
 0x11c   : > { %19450 = vst [vmem:[#allocation15_spill] sm:$0xff] %v19449_v58  ;;  %vm19451_vm6 = vcmp.lt.s32.totalorder %v15251_v7, 111  ;;  %v602_v6 = vsel %vm586_vm11, %v397_v40, 0.0  ;;  %v2073_v30 = vrot.slane %v15217_v56, %v15208_v55  ;;  %v15834_v49 = vsel %vm15796_vm7, 1, %v19388_v47 }
 0x11d   : > { %v2301_v26 = vsel %vm19451_vm6, %v15804_v59, %v2257_v45  ;;  %19452 = vst [vmem:[#allocation40_spill] sm:$0xff] %v15834_v49  ;;  %v2238_v45 = vadd.f32 %v2222_v41, %v1993_v35  ;;  %vm833_vm4 = vcmp.eq.s32.totalorder %v19453_v52, 1  ;;  %v1149_v53 = vsel %vm1133_vm5, %v944_v19, 0.0  ;;  %v19462_v59 = vld [vmem:[#allocation43_spill] sm:$0xff] }
 0x11e   : > { %v2463_v5 = vsel %vm2447_vm3, %v2301_v26, 0.0  ;;  %v15840_v28 = vadd.f32 %v15722_v12, %v2500_v10  ;;  %v868_v40 = vmul.f32 %v15104_v22, %v848_v23  ;;  %vm1682_vm11 = vcmp.eq.s32.totalorder %v15594_v11, 1  ;;  %v15845_v56 = vpop.permute.xlu1 %1203  ;;  %v15847_v1 = vpop.permute.xlu0 %357  ;;  %vm15860_vm3 = vmand %vm19174_vm13, %vm15812_vm12  ;;  %v19461_v26 = vld [vmem:[#allocation33_spill] sm:$0xff] }
 0x11f   : > { %v2483_v9 = vmul.f32 %v15505_v44, %v2463_v5  ;;  %v15850_v41 = vrot.slane %v725_v18, %v15220_v57  ;;  %v1571_v4 = vrot.slane %v15498_v39, %v15279_v17  ;;  %v1026_v10 = vrot.slane %v15669_v63, %v15208_v55  ;;  %v19459_v18 = vld [vmem:[#allocation22_spill] sm:$0xff]  ;;  %1770 = vrot.lane.b32.xlu0 %v15610_v0, %s14814_s10 }
 0x120   : > { %19454 = vst [vmem:[#allocation23_spill] sm:$0xff] %v15840_v28  ;;  %vm587_vm5 = vcmp.eq.s32.totalorder %v19458_v31, 1  ;;  %vm19460_vm8 = vcmp.lt.s32.totalorder %v15251_v7, 1  ;;  %v2709_v63 = vsel %vm19179_vm0, %v15840_v28, 0  ;;  %v1832_v23 = vrot.slane %v15834_v49, %v15220_v57  ;;  %920 = vrot.lane.b32.xlu1 %v15610_v0, %s14807_s16 }
 0x121   : > { %19455 = vst [vmem:[#allocation42_spill] sm:$0xff] %v15850_v41  ;;  %v2499_v60 = vadd.f32 %v2483_v9, %v2238_v45  ;;  %v1245_v35 = vsel %vm19460_vm8, %v19459_v18, %v15845_v56  ;;  %v623_v5 = vmul.f32 %v19461_v26, %v602_v6  ;;  %vm1134_vm7 = vcmp.eq.s32.totalorder %v19462_v59, 1 }
 0x122   : > { %v1169_v45 = vmul.f32 %v15102_v21, %v1149_v53  ;;  %v1394_v9 = vsel %vm1378_vm1, %v1245_v35, 0.0  ;;  %v15880_v18 = vand.u32 4294901760, %v2709_v63  ;;  %vm834_vm10 = vcmp.eq.s32.totalorder %v15662_v29, 1 }
 0x123   : > { %v15885_v28 = vadd.f32 %v15722_v12, %v2499_v60  ;;  %v15889_v6 = vrot.slane %v1267_v54, %v15279_v17  ;;  %v15892_v58 = vrot.slane %v2073_v30, %v15220_v57  ;;  %v15897_v42 = vsel %vm15860_vm3, 1, %v19388_v47  ;;  %v15902_v60 = vpop.permute.xlu1 %1205  ;;  %v15905_v54 = vpop.permute.xlu0 %661  ;;  %v15908_v30 = vld [vmem:[%s14985_s20 + $0x30] sm:$0xff] }
 0x124   : > { %19464 = vst [vmem:[#allocation22_spill] sm:$0xff] %v15897_v42  ;;  %v884_v53 = vadd.f32 %v868_v40, %v623_v5  ;;  %vm1943_vm1 = vcmp.eq.s32.totalorder %v15606_v48, 1  ;;  %v1414_v35 = vmul.f32 %v15142_v34, %v1394_v9  ;;  %vm1379_vm6 = vcmp.eq.s32.totalorder %v15640_v36, 1  ;;  %2784 = vmatprep.subr.mxu0 %v15880_v18  ;;  %373 = vrot.lane.b32.xlu0 %v15908_v30, %s14803_s30  ;;  %v19476_v42 = vld [vmem:[#allocation52_spill] sm:$0xff] }
 0x125   : > { %19463 = vst [vmem:[#allocation39_spill] sm:$0xff] %v15885_v28  ;;  %v2862_v12 = vsub.f32 %v2709_v63, %v15880_v18  ;;  %vm19183_vm3 = vcmp.lt.s32.totalorder %v15631_v14, 15  ;;  %v2706_v40 = vsel %vm19179_vm0, %v15885_v28, 0  ;;  %vm1135_vm13 = vcmp.eq.s32.totalorder %v15763_v38, 1  ;;  %2274 = vrot.lane.b32.xlu1 %v15510_v27, %s14816_s23 }
 0x126   : > { %v15919_v19 = vrot.slane %v1571_v4, %v15279_v17  ;;  %v15922_v5 = vrot.slane %v1026_v10, %v15220_v57  ;;  %v2334_v63 = vrot.slane %v15713_v51, %v15208_v55  ;;  %v1185_v9 = vadd.f32 %v1169_v45, %v884_v53  ;;  %v19473_v17 = vld [vmem:[#allocation13_spill] sm:$0xff] }
 0x127   : > { %v15926_v41 = vand.u32 4294901760, %v2706_v40  ;;  %vm2188_vm8 = vcmp.eq.s32.totalorder %v15744_v37, 1  ;;  %v2863_v49 = vand.u32 4294901760, %v2862_v12  ;;  %v15932_v28 = vrot.slane %v1832_v23, %v15220_v57 }
 0x128   : > { %19465 = vst [vmem:[#allocation33_spill] sm:$0xff] %v15919_v19  ;;  %19466 = vst [vmem:[#allocation43_spill] sm:$0xff] %v15922_v5  ;;  %vm19468_vm0 = vcmp.lt.s32.totalorder %v15251_v7, 16  ;;  %v15940_v51 = vcombine.high %v15908_v30, %v15908_v30  ;;  %v15947_v45 = vsel %vm19183_vm3, 1, %v19388_v47  ;;  %v1548_v23 = vsel %vm19223_vm15, %v15202_v50, %v15757_v24  ;;  %v19471_v5 = vld [vmem:[#allocation47_spill] sm:$0xff]  ;;  %677 = vrot.lane.b32.xlu0 %v15908_v30, %s14805_s15 }
 0x129   : > { %19467 = vst [vmem:[#allocation59_spill] sm:$0xff] %v15932_v28  ;;  %v698_v4 = vsel %vm19468_vm0, %v15433_v16, %v15601_v20  ;;  %19470 = vst [vmem:[#allocation61_spill] sm:$0xff] %v15947_v45  ;;  %v1430_v53 = vadd.f32 %v1414_v35, %v1185_v9  ;;  %v15953_v28 = vpop.permute.xlu1 %1511  ;;  %2786 = vmatpush1.msra.mxu0 %v15926_v41  ;;  %v15956_v16 = vpop.permute.xlu0 %2015  ;;  %v2868_v27 = vsub.f32 %v2706_v40, %v15926_v41  ;;  %v19475_v9 = vld [vmem:[#allocation31_spill] sm:$0xff]  ;;  %v19490_v38 = vmov 0 }
 0x12a   : > { %19469 = vst [vmem:[#allocation60_spill] sm:$0xff] %v15940_v51  ;;  %v2864_v10 = vsub.f32 %v2862_v12, %v2863_v49  ;;  %vm2449_vm0 = vcmp.eq.s32.totalorder %v15784_v8, 1  ;;  %vm19472_vm3 = vcmp.lt.s32.totalorder %v15251_v7, 17  ;;  %v15966_v50 = vmul.f32 %v15567_v13, %v19473_v17  ;;  %2825 = vmatmul.mubr.f32.vlgmr.msra.gmra.mxu0 %v15753_v2  ;;  %2945 = vmatprep.subr.mxu0 %v2862_v12  ;;  %v19506_v8 = vld [vmem:[#allocation49_spill] sm:$0xff] }
 0x12b   : > { %v396_v19 = vsel %vm19472_vm3, %v19438_v61, %v19471_v5  ;;  %v15971_v35 = vrot.slane %v2334_v63, %v15220_v57  ;;  %v849_v51 = vsel %vm833_vm4, %v698_v4, 0.0  ;;  %vm19477_vm3 = vcmp.lt.s32.totalorder %v15251_v7, 15  ;;  %2948 = vmatpush1.msra.mxu0 %v2868_v27  ;;  %1221 = vrot.lane.b32.xlu1 %v15610_v0, %s14808_s17 }
 0x12c   : > { %v943_v61 = vsel %vm19477_vm3, %v15720_v62, %v19476_v42  ;;  %v2865_v17 = vand.u32 4294901760, %v2864_v10  ;;  %v2869_v13 = vand.u32 4294901760, %v2868_v27  ;;  %v1698_v63 = vsel %vm1682_vm11, %v1548_v23, 0.0  ;;  %3099 = vmatprep.subr.mxu0 %v2863_v49  ;;  %2031 = vrot.lane.b32.xlu0 %v15610_v0, %s14815_s13 }
 0x12d   : > { %19474 = vst [vmem:[#allocation47_spill] sm:$0xff] %v15971_v35  ;;  %v19478_v35 = vld [vmem:[#allocation41_spill] sm:$0xff]  ;;  %vm19479_vm4 = vcmp.lt.s32.totalorder %v15251_v7, 16  ;;  %v19480_v62 = vmov 0.0   ;;  %v14506_v12 = vrot.slane %v15947_v45, 9  ;;  %v603_v4 = vsel %vm587_vm5, %v396_v19, 0.0  ;;  %v16001_v23 = vpop.permute.xlu1 %1756 }
 0x12e   : > { %v1793_v40 = vsel %vm19332_vm14, %v19478_v35, %v15806_v43  ;;  %v697_v52 = vsel %vm19479_vm4, %v15601_v20, %v15905_v54  ;;  %2981 = vmatprep.mubr.f32.mxu0 %v19480_v62  ;;  %v1489_v11 = vadd.f32 %v15966_v50, %v1430_v53  ;;  %vm19481_vm11 = vcmp.lt.s32.totalorder %v15251_v7, 1  ;;  %2866 = vmatprep.subr.mxu1 %v2865_v17  ;;  %v16003_v20 = vpop.permute.xlu0 %906  ;;  %v19484_v53 = vld [vmem:[#allocation56_spill] sm:$0xff] }
 0x12f   : > { %v1244_v10 = vsel %vm19481_vm11, %v15845_v56, %v15902_v60  ;;  %19482 = vst [vmem:[#allocation13_spill] sm:$0xff] %v16003_v20  ;;  %v2870_v35 = vsub.f32 %v2868_v27, %v2869_v13  ;;  %v869_v2 = vmul.f32 %v15104_v22, %v849_v51  ;;  %v1150_v31 = vsel %vm1134_vm7, %v943_v61, 0.0  ;;  %v19486_v56 = vld [vmem:[#allocation55_spill] sm:$0xff]  ;;  %v19487_v51 = vld [vmem:[#allocation50_spill] sm:$0xff]  ;;  %1527 = vrot.lane.b32.xlu1 %v15908_v30, %s14810_s29 }
 0x130   : > { %vm19483_vm5 = vcmp.lt.s32.totalorder %v15251_v7, 17  ;;  %vm1683_vm3 = vcmp.eq.s32.totalorder %v19484_v53, 1  ;;  %vm19485_vm4 = vcmp.lt.s32.totalorder %v15251_v7, 15  ;;  %v1718_v27 = vmul.f32 %v19428_v25, %v1698_v63  ;;  %2984 = vmatmul.mubr.f32.vlgmr.msra.gmra.mxu0 %v19487_v51  ;;  %922 = vrot.lane.b32.xlu0 %v15908_v30, %s14807_s16 }
 0x131   : > { %v395_v19 = vsel %vm19483_vm5, %v19471_v5, %v15847_v1  ;;  %v942_v49 = vsel %vm19485_vm4, %v19476_v42, %v16003_v20  ;;  %v850_v59 = vsel %vm834_vm10, %v697_v52, 0.0  ;;  %v2054_v5 = vsel %vm2041_vm9, %v19486_v56, %v15956_v16  ;;  %3103 = vmatpush1.msra.mxu0 %v2869_v13  ;;  %3136 = vmatprep.mubr.f32.mxu0 %v19480_v62  ;;  %v16042_v48 = vpop.permute.xlu1 %359  ;;  %v19495_v56 = vld [vmem:[#allocation58_spill] sm:$0xff] }
 0x132   : > { %v2871_v61 = vand.u32 4294901760, %v2870_v35  ;;  %v624_v42 = vmul.f32 %v19461_v26, %v603_v4  ;;  %v1959_v17 = vsel %vm1943_vm1, %v1793_v40, 0.0  ;;  %v1395_v20 = vsel %vm1379_vm6, %v1244_v10, 0.0  ;;  %v16044_v36 = vpop.permute.xlu0 %2260 }
 0x133   : > { %v729_v29 = vrot.slane %v15729_v46, %v15220_v57  ;;  %v1170_v63 = vmul.f32 %v15102_v21, %v1150_v31  ;;  %vm19488_vm7 = vcmp.eq.s32.totalorder %v15637_v3, 1  ;;  %v1734_v35 = vadd.f32 %v1718_v27, %v1489_v11  ;;  %v19494_v27 = vld [vmem:[#allocation28_spill] sm:$0xff]  ;;  %1772 = vrot.lane.b32.xlu1 %v15908_v30, %s14814_s10 }
 0x134   : > { %v604_v52 = vsel %vm19488_vm7, %v395_v19, 0.0  ;;  %v1151_v4 = vsel %vm1135_vm13, %v942_v49, 0.0  ;;  %2872 = vmatpush1.msra.mxu1 %v2871_v61  ;;  %v870_v13 = vmul.f32 %v15104_v22, %v850_v59  ;;  %v2204_v40 = vsel %vm2188_vm8, %v2054_v5, 0.0  ;;  %v19493_v19 = vld [vmem:[#allocation46_spill] sm:$0xff]  ;;  %2276 = vrot.lane.b32.xlu0 %v15610_v0, %s14816_s23 }
 0x135   : > { %vm19489_vm10 = vcmp.lt.s32.totalorder %v15251_v7, 111  ;;  %vm16055_vm1 = vcmp.ne.s32.totalorder %v14506_v12, 0  ;;  %v885_v11 = vadd.f32 %v869_v2, %v624_v42  ;;  %v1979_v10 = vmul.f32 %v19429_v33, %v1959_v17  ;;  %2907 = vmatmul.mubr.f32.vlgmr.msra.gmra.mxu1 %v19493_v19  ;;  %3021 = vmatprep.subr.mxu1 %v15880_v18  ;;  %v16075_v5 = vpop.permute.xlu1 %663 }
 0x136   : > { %v2299_v3 = vsel %vm19489_vm10, %v15659_v32, %v16044_v36  ;;  %v19491_v38 = vsel %vm16055_vm1, 4294967295, %v19490_v38  ;;  %v1415_v31 = vmul.f32 %v15142_v34, %v1395_v20  ;;  %vm1380_vm13 = vcmp.eq.s32.totalorder %v15889_v6, 1  ;;  %3023 = vmatpush1.msra.mxu1 %v15926_v41  ;;  %3056 = vmatprep.mubr.f32.mxu1 %v19480_v62  ;;  %v16077_v61 = vpop.permute.xlu0 %1207 }
 0x137   : > { %19492 = vst [vmem:[#allocation52_spill] sm:$0xff] %v19491_v38  ;;  %v625_v32 = vmul.f32 %v19461_v26, %v604_v52  ;;  %v1171_v37 = vmul.f32 %v15102_v21, %v1151_v4  ;;  %v2465_v12 = vsel %vm2449_vm0, %v2299_v3, 0.0  ;;  %v1575_v2 = vrot.slane %v15498_v39, %v19475_v9  ;;  %3175 = vmatprep.subr.mxu1 %v15880_v18  ;;  %v19500_v52 = vld [vmem:[#allocation30_spill] sm:$0xff] }
 0x138   : > { %v1186_v20 = vadd.f32 %v1170_v63, %v885_v11  ;;  %v1995_v49 = vadd.f32 %v1979_v10, %v1734_v35  ;;  %v2224_v59 = vmul.f32 %v19494_v27, %v2204_v40  ;;  %vm1944_vm6 = vcmp.eq.s32.totalorder %v19495_v56, 1  ;;  %3138 = vmatmul.mubr.f32.vlgmr.msra.gmra.mxu0 %v19493_v19  ;;  %1223 = vrot.lane.b32.xlu0 %v15908_v30, %s14808_s17  ;;  %v19508_v63 = vld [vmem:[#allocation22_spill] sm:$0xff] }
 0x139   : > { %vm19496_vm8 = vcmp.ge.s32.totalorder %v15631_v14, 1  ;;  %v886_v42 = vadd.f32 %v870_v13, %v625_v32  ;;  %v1547_v18 = vsel %vm19223_vm15, %v15757_v24, %v15953_v28  ;;  %v1243_v17 = vsel %vm19481_vm11, %v15902_v60, %v16077_v61  ;;  %v19504_v13 = vld [vmem:[#allocation54_spill] sm:$0xff]  ;;  %3284 = vmatprep.mubr.f32.mxu0 %v19480_v62  ;;  %v16130_v32 = vpop.permute.xlu1 %2017 }
 0x13a   : > { %vm16085_vm0 = vmand %vm19496_vm8, %vm16055_vm1  ;;  %vm2189_vm5 = vcmp.eq.s32.totalorder %v15892_v58, 1  ;;  %vm19501_vm4 = vcmp.lt.s32.totalorder %v19500_v52, 15  ;;  %v1431_v24 = vadd.f32 %v1415_v31, %v1186_v20  ;;  %v2485_v4 = vmul.f32 %v15505_v44, %v2465_v12  ;;  %3060 = vmatmul.mubr.f32.vlgmr.msra.gmra.mxu1 %v19504_v13 }
 0x13b   : > { %vm16105_vm7 = vmand %vm19501_vm4, %vm15587_vm2  ;;  %v1396_v60 = vsel %vm1380_vm13, %v1243_v17, 0.0  ;;  %v2077_v0 = vrot.slane %v15498_v39, %v15220_v57  ;;  %v1792_v40 = vsel %vm19332_vm14, %v15806_v43, %v16001_v23  ;;  %v1187_v3 = vadd.f32 %v1171_v37, %v886_v42  ;;  %3177 = vmatpush1.msra.mxu1 %v15926_v41  ;;  %3210 = vmatprep.mubr.f32.mxu1 %v19480_v62  ;;  %v16132_v43 = vpop.permute.xlu0 %1513  ;;  %v19505_v41 = vld [vmem:[#allocation40_spill] sm:$0xff] }
 0x13c   : > { %v1416_v11 = vmul.f32 %v15142_v34, %v1396_v60  ;;  %v16125_v6 = vsel %vm16085_vm0, 1, %v19388_v47  ;;  %v1699_v10 = vsel %vm1683_vm3, %v1547_v18, 0.0  ;;  %v2240_v31 = vadd.f32 %v2224_v59, %v1995_v49  ;;  %v14662_v59 = vld [vmem:[%s14985_s20 + $0x10] sm:$0xff] }
 0x13d   : > { %v1836_v37 = vrot.slane %v19505_v41, %v15208_v55  ;;  %v16141_v12 = vsel %vm16105_vm7, 1, %v19388_v47  ;;  %v1472_v53 = vcombine.high %v15966_v50, %v15966_v50  ;;  %v2053_v49 = vsel %vm2041_vm9, %v15956_v16, %v16130_v32  ;;  %v19513_v41 = vld [vmem:[#allocation32_spill] sm:$0xff] }
 0x13e   : > { %v1432_v20 = vadd.f32 %v1416_v11, %v1187_v3  ;;  %v16151_v42 = vmul.f32 %v14662_v59, %v19506_v8  ;;  %v1960_v18 = vsel %vm1944_vm6, %v1792_v40, 0.0  ;;  %v2501_v17 = vadd.f32 %v2485_v4, %v2240_v31  ;;  %3212 = vmatmul.mubr.f32.vlgmr.msra.gmra.mxu1 %v19493_v19  ;;  %v16171_v4 = vpop.permute.xlu1 %908  ;;  %v19510_v11 = vld [vmem:[#allocation60_spill] sm:$0xff]  ;;  %v19516_v59 = vld [vmem:[#allocation42_spill] sm:$0xff] }
 0x13f   : > { %v1030_v50 = vrot.slane %v16125_v6, %v15220_v57  ;;  %v487_v52 = vrot.slane %v19508_v63, %v15208_v55  ;;  %v1490_v16 = vadd.f32 %v1472_v53, %v1431_v24  ;;  %v1719_v35 = vmul.f32 %v19428_v25, %v1699_v10  ;;  %3370 = vmatprep.mubr.f32.mxu1 %v19480_v62  ;;  %v16173_v40 = vpop.permute.xlu0 %1758  ;;  %v19511_v24 = vld [vmem:[#allocation47_spill] sm:$0xff] }
 0x140   : > { %19507 = vst [vmem:[#allocation41_spill] sm:$0xff] %v16151_v42  ;;  %v16164_v60 = vadd.f32 %v16151_v42, %v1432_v20  ;;  %v2338_v3 = vrot.slane %v16141_v12, %v15220_v57  ;;  %v2205_v56 = vsel %vm2189_vm5, %v2053_v49, 0.0  ;;  %375 = vrot.lane.b32.xlu1 %v19510_v11, %s14803_s30  ;;  %vm2450_vm2 = vcmp.eq.s32.totalorder %v19511_v24, 1  ;;  %v16190_v20 = vld [vmem:[#allocation5 + $0x20] sm:$0x77]  ;;  %1529 = vrot.lane.b32.xlu0 %v19510_v11, %s14810_s29  ;;  %v19534_v24 = vld [vmem:[#allocation45_spill] sm:$0xff] }
 0x141   : > { %v19512_v10 = vrot.slane %v19508_v63, %v15220_v57  ;;  %v19514_v58 = vrot.slane %v15345_v15, %v19475_v9  ;;  %19515 = vst [vmem:[#allocation55_spill] sm:$0xff] %v16190_v20  ;;  %v1980_v49 = vmul.f32 %v19429_v33, %v1960_v18  ;;  %vm835_vm3 = vcmp.eq.s32.totalorder %v19516_v59, 1  ;;  %v19517_v18 = vld [vmem:[#allocation16_spill] sm:$0xff]  ;;  %v19518_v15 = vld [vmem:[#allocation38_spill] sm:$0xff]  ;;  %v16313_v33 = vld [vmem:[%s14985_s20 + $0x38] sm:$0xff] }
 0x142   : > { %19509 = vst [vmem:[#allocation56_spill] sm:$0xff] %v16164_v60  ;;  %v16200_v63 = vrot.slane %v729_v29, %v15220_v57  ;;  %vm589_vm10 = vcmp.eq.s32.totalorder %v19517_v18, 1  ;;  %v16213_v13 = vadd.f32 %v19518_v15, %v2501_v17  ;;  %v16216_v38 = vrot.slane %v1836_v37, %v15220_v57  ;;  %v14664_v60 = vld [vmem:[%s14985_s20 + $0x20] sm:$0xff] }
 0x143   : > { %v16182_v31 = vrot.slane %v19512_v10, %v15220_v57  ;;  %v16188_v53 = vrot.slane %v19514_v58, %v19513_v41  ;;  %v16206_v10 = vrot.slane %v1575_v2, %v19513_v41  ;;  %v16209_v58 = vrot.slane %v2077_v0, %v15220_v57 }
 0x144   : > { %19519 = vst [vmem:[#allocation58_spill] sm:$0xff] %v16213_v13  ;;  %v16219_v29 = vrot.slane %v1030_v50, %v15220_v57  ;;  %v16222_v19 = vrot.slane %v487_v52, %v15220_v57  ;;  %vm19522_vm13 = vcmp.lt.s32.totalorder %v15631_v14, 15  ;;  %v1735_v9 = vadd.f32 %v1719_v35, %v1490_v16  ;;  %v16237_v50 = vpop.permute.xlu1 %2262  ;;  %v16239_v52 = vpop.permute.xlu0 %361  ;;  %679 = vrot.lane.b32.xlu1 %v19510_v11, %s14805_s15  ;;  %v19527_v14 = vld [vmem:[#allocation33_spill] sm:$0xff] }
 0x145   : > { %vm16228_vm6 = vmand %vm19522_vm13, %vm15812_vm12  ;;  %v2225_v17 = vmul.f32 %v19494_v27, %v2205_v56  ;;  %v16234_v37 = vrot.slane %v2338_v3, %v15220_v57  ;;  %vm404_vm8 = vcmp.ge.s32.totalorder %v16190_v20, 1  ;;  %19525 = vst [vmem:[#allocation30_spill] sm:$0xff] %v16239_v52  ;;  %v733_v16 = vrot.slane %v15729_v46, %v15208_v55  ;;  %v14663_v3 = vld [vmem:[%s14985_s20 + $0x18] sm:$0xff]  ;;  %1774 = vrot.lane.b32.xlu0 %v19510_v11, %s14814_s10 }
 0x146   : > { %19520 = vst [vmem:[#allocation51_spill] sm:$0xff] %v16222_v19  ;;  %v1275_v35 = vrot.slane %v15729_v46, %v19513_v41  ;;  %v16251_v56 = vmul.f32 %v14663_v3, %v19506_v8  ;;  %v1996_v19 = vadd.f32 %v1980_v49, %v1735_v9  ;;  %vm1684_vm12 = vcmp.eq.s32.totalorder %v19527_v14, 1  ;;  %v19530_v3 = vld [vmem:[#allocation43_spill] sm:$0xff] }
 0x147   : > { %vm19528_vm0 = vcmp.lt.s32.totalorder %v15251_v7, 111  ;;  %v2081_v2 = vrot.slane %v15498_v39, %v15208_v55  ;;  %v16265_v42 = vsel %vm16228_vm6, 1, %v19388_v47  ;;  %vm1136_vm11 = vcmp.eq.s32.totalorder %v19530_v3, 1 }
 0x148   : > { %19526 = vst [vmem:[#allocation40_spill] sm:$0xff] %v16251_v56  ;;  %v2298_v27 = vsel %vm19528_vm0, %v16044_v36, %v16237_v50  ;;  %19529 = vst [vmem:[#allocation49_spill] sm:$0xff] %v16265_v42  ;;  %vm19531_vm5 = vcmask 1043456   ;;  %v1579_v36 = vrot.slane %v15947_v45, %v19513_v41  ;;  %v16277_v39 = vsel %vm404_vm8, 1, %v19388_v47  ;;  %v19536_v45 = vld [vmem:[#allocation59_spill] sm:$0xff]  ;;  %v16291_v51 = vpop.permute.xlu1 %1209  ;;  %2033 = vrot.lane.b32.xlu1 %v15908_v30, %s14815_s13 }
 0x149   : > { %v2466_v9 = vsel %vm2450_vm2, %v2298_v27, 0.0  ;;  %v2712_v49 = vsel %vm19531_vm5, %v16213_v13, 0  ;;  %19532 = vst [vmem:[#allocation22_spill] sm:$0xff] %v16277_v39  ;;  %v2241_v46 = vadd.f32 %v2225_v17, %v1996_v19  ;;  %vm836_vm4 = vcmp.eq.s32.totalorder %v16200_v63, 1  ;;  %v16293_v19 = vpop.permute.xlu0 %665  ;;  %377 = vrot.lane.b32.xlu0 %v16313_v33, %s14803_s30 }
 0x14a   : > { %v2486_v0 = vmul.f32 %v15505_v44, %v2466_v9  ;;  %v16283_v27 = vmul.f32 %v14664_v60, %v19506_v8  ;;  %v16287_v13 = vmul.f32 %v19506_v8, %v19534_v24  ;;  %vm1945_vm7 = vcmp.eq.s32.totalorder %v19536_v45, 1 }
 0x14b   : > { %vm1381_vm2 = vcmp.eq.s32.totalorder %v16188_v53, 1  ;;  %v16298_v17 = vrot.slane %v733_v16, %v15220_v57  ;;  %v16301_v60 = vrot.slane %v1275_v35, %v19513_v41  ;;  %v1034_v9 = vrot.slane %v16125_v6, %v15208_v55 }
 0x14c   : > { %19533 = vst [vmem:[#allocation60_spill] sm:$0xff] %v16283_v27  ;;  %19535 = vst [vmem:[#allocation47_spill] sm:$0xff] %v16287_v13  ;;  %v1840_v24 = vrot.slane %v16265_v42, %v15220_v57  ;;  %vm19538_vm13 = vcmp.lt.s32.totalorder %v15251_v7, 16  ;;  %v2502_v34 = vadd.f32 %v2486_v0, %v2241_v46  ;;  %vm590_vm6 = vcmp.eq.s32.totalorder %v16182_v31, 1  ;;  %924 = vrot.lane.b32.xlu1 %v19510_v11, %s14807_s16 }
 0x14d   : > { %19537 = vst [vmem:[#allocation42_spill] sm:$0xff] %v16298_v17  ;;  %v696_v44 = vsel %vm19538_vm13, %v15905_v54, %v16075_v5  ;;  %vm1137_vm0 = vcmp.eq.s32.totalorder %v16219_v29, 1  ;;  %v16318_v16 = vand.u32 4294901760, %v2712_v49  ;;  %v14499_v6 = vrot.slane %v16277_v39, 9  ;;  %v16347_v54 = vpop.permute.xlu1 %1515  ;;  %v16349_v56 = vpop.permute.xlu0 %2019  ;;  %2035 = vrot.lane.b32.xlu0 %v19510_v11, %s14815_s13 }
 0x14e   : > { %vm19539_vm5 = vcmp.lt.s32.totalorder %v15251_v7, 17  ;;  %v16327_v46 = vrot.slane %v2081_v2, %v15220_v57  ;;  %v16333_v0 = vmul.f32 %v19506_v8, %v15908_v30  ;;  %v16336_v42 = vadd.f32 %v19518_v15, %v2502_v34 }
 0x14f   : > { %v394_v35 = vsel %vm19539_vm5, %v15847_v1, %v16042_v48  ;;  %v16339_v17 = vrot.slane %v1579_v36, %v19513_v41  ;;  %v851_v39 = vsel %vm835_vm3, %v696_v44, 0.0  ;;  %v16355_v34 = vrot.slane %v1034_v9, %v15220_v57 }
 0x150   : > { %19540 = vst [vmem:[#allocation16_spill] sm:$0xff] %v16333_v0  ;;  %19541 = vst [vmem:[#allocation15_spill] sm:$0xff] %v16336_v42  ;;  %v16358_v36 = vrot.slane %v1840_v24, %v15220_v57  ;;  %vm19249_vm13 = vcmp.lt.s32.totalorder %v16190_v20, 15  ;;  %v605_v44 = vsel %vm589_vm10, %v394_v35, 0.0  ;;  %v1546_v59 = vsel %vm19223_vm15, %v15953_v28, %v16132_v43  ;;  %v19544_v24 = vld [vmem:[#allocation13_spill] sm:$0xff]  ;;  %2278 = vrot.lane.b32.xlu1 %v15908_v30, %s14816_s23  ;;  %v19597_v0 = vld [vmem:[#allocation51_spill] sm:$0xff] }
 0x151   : > { %v16370_v2 = vsub.f32 %v2712_v49, %v16318_v16  ;;  %vm16372_vm3 = vcmp.ne.s32.totalorder %v14499_v6, 0  ;;  %vm19545_vm5 = vcmp.lt.s32.totalorder %v15251_v7, 15  ;;  %vm19546_vm10 = vcmask 1043456   ;;  %v16414_v27 = vpop.permute.xlu0 %910  ;;  %926 = vrot.lane.b32.xlu0 %v16313_v33, %s14807_s16 }
 0x152   : > { %v941_v18 = vsel %vm19545_vm5, %v19544_v24, %v16171_v4  ;;  %v2715_v35 = vsel %vm19546_vm10, %v16336_v42, 0  ;;  %v16386_v1 = vmul.f32 %v16313_v33, %v19506_v8  ;;  %v871_v49 = vmul.f32 %v15104_v22, %v851_v39  ;;  %v16412_v42 = vpop.permute.xlu1 %1760  ;;  %19550 = vst [vmem:[#allocation43_spill] sm:$0xff] %v16414_v27 }
 0x153   : > { %vm19548_vm15 = vcmp.lt.s32.totalorder %v15251_v7, 16  ;;  %v16393_v13 = vand.u32 4294901760, %v2715_v35  ;;  %vm1382_vm5 = vcmp.eq.s32.totalorder %v16301_v60, 1  ;;  %v16399_v24 = vsel %vm19249_vm13, 1, %v19388_v47  ;;  %v16532_v60 = vld [vmem:[#allocation5 + $0x28] sm:$0x77] }
 0x154   : > { %19547 = vst [vmem:[#allocation33_spill] sm:$0xff] %v16386_v1  ;;  %v695_v6 = vsel %vm19548_vm15, %v16075_v5, %v16293_v19  ;;  %v626_v28 = vmul.f32 %v19461_v26, %v605_v44  ;;  %v1700_v8 = vsel %vm1684_vm12, %v1546_v59, 0.0  ;;  %v1791_v39 = vsel %vm19332_vm14, %v16001_v23, %v16173_v40  ;;  %1225 = vrot.lane.b32.xlu1 %v19510_v11, %s14808_s17 }
 0x155   : > { %vm19549_vm15 = vcmp.lt.s32.totalorder %v15251_v7, 1  ;;  %v1152_v14 = vsel %vm1136_vm11, %v941_v18, 0.0  ;;  %vm19551_vm12 = vcmp.lt.s32.totalorder %v15251_v7, 17  ;;  %vm1685_vm10 = vcmp.eq.s32.totalorder %v16206_v10, 1  ;;  %3249 = vmatprep.subr.mxu0 %v16393_v13  ;;  %2282 = vrot.lane.b32.xlu0 %v16313_v33, %s14816_s23  ;;  %19573 = vst [vmem:[#allocation59_spill] sm:$0xff] %v16532_v60 }
 0x156   : > { %v1242_v5 = vsel %vm19549_vm15, %v16077_v61, %v16291_v51  ;;  %v393_v23 = vsel %vm19551_vm12, %v16042_v48, %v16239_v52  ;;  %vm19552_vm15 = vcmp.lt.s32.totalorder %v15251_v7, 15  ;;  %v3334_v44 = vand.u32 4294901760, %v16370_v2  ;;  %3251 = vmatpush1.msra.mxu0 %v16318_v16 }
 0x157   : > { %v940_v61 = vsel %vm19552_vm15, %v16171_v4, %v16414_v27  ;;  %v852_v30 = vsel %vm836_vm4, %v695_v6, 0.0  ;;  %v2052_v3 = vsel %vm2041_vm9, %v16130_v32, %v16349_v56  ;;  %v3327_v48 = vsub.f32 %v2715_v35, %v16393_v13  ;;  %v19553_v32 = vld [vmem:[#allocation24_spill] sm:$0xff]  ;;  %vm16453_vm4 = vmand %vm404_vm8, %vm16372_vm3 }
 0x158   : > { %v14507_v59 = vrot.slane %v16399_v24, 9  ;;  %v887_v4 = vadd.f32 %v871_v49, %v626_v28  ;;  %v1720_v18 = vmul.f32 %v19428_v25, %v1700_v8  ;;  %v1961_v63 = vsel %vm1945_vm7, %v1791_v39, 0.0  ;;  %3290 = vmatmul.mubr.f32.vlgmr.msra.gmra.mxu0 %v19553_v32  ;;  %v16462_v49 = vpop.permute.xlu1 %363  ;;  %v16464_v39 = vpop.permute.xlu0 %2264  ;;  %1531 = vrot.lane.b32.xlu1 %v16313_v33, %s14810_s29 }
 0x159   : > { %v1397_v6 = vsel %vm1381_vm2, %v1242_v5, 0.0  ;;  %vm1946_vm11 = vcmp.eq.s32.totalorder %v16216_v38, 1  ;;  %v1172_v28 = vmul.f32 %v15102_v21, %v1152_v14  ;;  %v606_v45 = vsel %vm590_vm6, %v393_v23, 0.0  ;;  %3410 = vmatprep.subr.mxu0 %v3327_v48  ;;  %3446 = vmatprep.mubr.f32.mxu0 %v19480_v62  ;;  %v19558_v14 = vld [vmem:[#allocation29_spill] sm:$0xff] }
 0x15a   : > { %v1153_v53 = vsel %vm1137_vm0, %v940_v61, 0.0  ;;  %v3328_v8 = vand.u32 4294901760, %v3327_v48  ;;  %v872_v5 = vmul.f32 %v15104_v22, %v852_v30  ;;  %vm19556_vm7 = vcmp.eq.s32.totalorder %v16209_v58, 1  ;;  %3413 = vmatpush1.msra.mxu0 %v16370_v2  ;;  %v19559_v61 = vld [vmem:[#allocation20_spill] sm:$0xff]  ;;  %v19584_v38 = vld [vmem:[#allocation25_spill] sm:$0xff] }
 0x15b   : > { %v2206_v32 = vsel %vm19556_vm7, %v2052_v3, 0.0  ;;  %vm19557_vm2 = vcmp.lt.s32.totalorder %v15251_v7, 111  ;;  %v3335_v29 = vsub.f32 %v16370_v2, %v3334_v44  ;;  %v1981_v23 = vmul.f32 %v19558_v14, %v1961_v63  ;;  %v19561_v63 = vld [vmem:[#allocation50_spill] sm:$0xff]  ;;  %v19566_v22 = vld [vmem:[#allocation28_spill] sm:$0xff] }
 0x15c   : > { %v2297_v31 = vsel %vm19557_vm2, %v16237_v50, %v16464_v39  ;;  %v1417_v27 = vmul.f32 %v19559_v61, %v1397_v6  ;;  %3564 = vmatprep.subr.mxu0 %v3328_v8  ;;  %v3329_v30 = vsub.f32 %v3327_v48, %v3328_v8  ;;  %v16483_v58 = vsel %vm16453_vm4, 1, %v19388_v47  ;;  %3449 = vmatmul.mubr.f32.vlgmr.msra.gmra.mxu0 %v19561_v63  ;;  %v19565_v48 = vld [vmem:[#allocation56_spill] sm:$0xff] }
 0x15d   : > { %v627_v3 = vmul.f32 %v19461_v26, %v606_v45  ;;  %v1173_v50 = vmul.f32 %v15102_v21, %v1153_v53  ;;  %vm19560_vm6 = vcmp.eq.s32.totalorder %v16234_v37, 1  ;;  %vm16492_vm0 = vcmp.ne.s32.totalorder %v14507_v59, 0  ;;  %3568 = vmatpush1.msra.mxu0 %v3334_v44  ;;  %v16498_v45 = vpop.permute.xlu1 %667  ;;  %v16500_v37 = vpop.permute.xlu0 %1211  ;;  %3601 = vmatprep.mubr.f32.mxu0 %v19480_v62 }
 0x15e   : > { %v2467_v2 = vsel %vm19560_vm6, %v2297_v31, 0.0  ;;  %v19562_v6 = vmov 0  ;;  %v1736_v35 = vadd.f32 %v1720_v18, %v19565_v48  ;;  %v1188_v8 = vadd.f32 %v1172_v28, %v887_v4  ;;  %v19569_v28 = vld [vmem:[#allocation44_spill] sm:$0xff]  ;;  %1776 = vrot.lane.b32.xlu1 %v16313_v33, %s14814_s10 }
 0x15f   : > { %v19563_v6 = vsel %vm16492_vm0, 4294967295, %v19562_v6  ;;  %v2226_v52 = vmul.f32 %v19566_v22, %v2206_v32  ;;  %v3330_v53 = vand.u32 4294901760, %v3329_v30  ;;  %v888_v31 = vadd.f32 %v872_v5, %v627_v3  ;;  %v19570_v5 = vld [vmem:[#allocation12_spill] sm:$0xff] }
 0x160   : > { %19564 = vst [vmem:[#allocation45_spill] sm:$0xff] %v19563_v6  ;;  %vm19567_vm12 = vcmp.lt.s32.totalorder %v15251_v7, 127  ;;  %vm19568_vm15 = vcmp.lt.s32.totalorder %v15251_v7, 1  ;;  %v3336_v18 = vand.u32 4294901760, %v3335_v29  ;;  %v1997_v44 = vadd.f32 %v1981_v23, %v1736_v35  ;;  %1533 = vrot.lane.b32.xlu0 %v19570_v5, %s14810_s29  ;;  %v19574_v23 = vld [vmem:[#allocation46_spill] sm:$0xff] }
 0x161   : > { %v1545_v59 = vsel %vm19567_vm12, %v16132_v43, %v16347_v54  ;;  %v1241_v4 = vsel %vm19568_vm15, %v16291_v51, %v16500_v37  ;;  %v1433_v32 = vadd.f32 %v1417_v27, %v1188_v8  ;;  %v2487_v30 = vmul.f32 %v19569_v28, %v2467_v2  ;;  %3331 = vmatprep.subr.mxu1 %v3330_v53  ;;  %v16540_v2 = vpop.permute.xlu0 %1517 }
 0x162   : > { %v1398_v48 = vsel %vm1382_vm5, %v1241_v4, 0.0  ;;  %v1790_v43 = vsel %vm19332_vm14, %v16173_v40, %v16412_v42  ;;  %v1189_v3 = vadd.f32 %v1173_v50, %v888_v31  ;;  %3337 = vmatpush1.msra.mxu1 %v3336_v18  ;;  %vm2191_vm4 = vcmp.eq.s32.totalorder %v16327_v46, 1  ;;  %vm16528_vm5 = vmand %vm404_vm8, %vm16492_vm0  ;;  %v16538_v50 = vpop.permute.xlu1 %2021  ;;  %v19576_v31 = vld [vmem:[#allocation31_spill] sm:$0xff]  ;;  %v19578_v18 = vld [vmem:[#allocation22_spill] sm:$0xff]  ;;  %3603 = vmatmul.mubr.f32.vlgmr.msra.gmra.mxu0 %v19574_v23 }
 0x163   : > { %v1418_v51 = vmul.f32 %v19559_v61, %v1398_v48  ;;  %v1701_v40 = vsel %vm1685_vm10, %v1545_v59, 0.0  ;;  %v2242_v29 = vadd.f32 %v2226_v52, %v1997_v44  ;;  %3372 = vmatmul.mubr.f32.vlgmr.msra.gmra.mxu1 %v19574_v23  ;;  %3486 = vmatprep.subr.mxu1 %v16393_v13  ;;  %v19575_v35 = vrot.slane %v16141_v12, %v15208_v55  ;;  %v19577_v59 = vld [vmem:[#allocation57_spill] sm:$0xff] }
 0x164   : > { %v491_v53 = vrot.slane %v16483_v58, %v15220_v57  ;;  %3488 = vmatpush1.msra.mxu1 %v16318_v16  ;;  %v2051_v52 = vsel %vm2041_vm9, %v16349_v56, %v16538_v50  ;;  %v1279_v4 = vrot.slane %v19577_v59, %v19576_v31  ;;  %v737_v44 = vrot.slane %v19578_v18, %v15220_v57  ;;  %v19588_v59 = vld [vmem:[#allocation40_spill] sm:$0xff] }
 0x165   : > { %v16546_v8 = vrot.slane %v19575_v35, %v15220_v57  ;;  %v1434_v10 = vadd.f32 %v1418_v51, %v1189_v3  ;;  %v1962_v12 = vsel %vm1946_vm11, %v1790_v43, 0.0  ;;  %v2503_v48 = vadd.f32 %v2487_v30, %v2242_v29  ;;  %3640 = vmatprep.subr.mxu1 %v16393_v13  ;;  %2039 = vrot.lane.b32.xlu0 %v19570_v5, %s14815_s13  ;;  %v19580_v51 = vld [vmem:[#allocation53_spill] sm:$0xff]  ;;  %v14209_v56 = vld [vmem:[%s19103_s5] sm:$0xf] }
 0x166   : > { %v16567_v3 = vsel %vm16528_vm5, 1, %v19388_v47  ;;  %vm19581_vm8 = vcmp.lt.s32.totalorder %v19580_v51, 15  ;;  %vm19251_vm11 = vcmp.ge.s32.totalorder %v16532_v60, 1  ;;  %v16579_v13 = vsub.s32 0, %v19584_v38  ;;  %v19586_v30 = vld [vmem:[#allocation41_spill] sm:$0xff]  ;;  %3521 = vmatprep.mubr.f32.mxu1 %v19480_v62  ;;  %3749 = vmatprep.mubr.f32.mxu0 %v19480_v62  ;;  %vm16689_vm5 = vmand %vm19249_vm13, %vm16372_vm3 }
 0x167   : > { %vm16573_vm10 = vmand %vm19581_vm8, %vm16055_vm1  ;;  %v19587_v43 = vcombine.high %v19586_v30, %v19586_v30  ;;  %v1721_v27 = vmul.f32 %v19428_v25, %v1701_v40  ;;  %v16586_v6 = vadd.f32 %v19588_v59, %v1434_v10  ;;  %v2207_v51 = vsel %vm2191_vm4, %v2051_v52, 0.0  ;;  %v16599_v40 = vpop.permute.xlu0 %1762  ;;  %v19591_v10 = vld [vmem:[#allocation61_spill] sm:$0xff]  ;;  %681 = vrot.lane.b32.xlu1 %v16313_v33, %s14805_s15 }
 0x168   : > { %19585 = vst [vmem:[#allocation13_spill] sm:$0xff] %v16579_v13  ;;  %v19590_v13 = vld [vmem:[#allocation54_spill] sm:$0xff]  ;;  %v2085_v30 = vrot.slane %v19591_v10, %v15220_v57  ;;  %v1982_v46 = vmul.f32 %v19558_v14, %v1962_v12  ;;  %v1038_v52 = vrot.slane %v16567_v3, %v15220_v57  ;;  %v16626_v12 = vadd.f32 %v19518_v15, %v2503_v48 }
 0x169   : > { %v1492_v29 = vadd.f32 %v19587_v43, %v1433_v32  ;;  %19589 = vst [vmem:[#allocation29_spill] sm:$0xff] %v16586_v6  ;;  %3525 = vmatmul.mubr.f32.vlgmr.msra.gmra.mxu1 %v19590_v13  ;;  %v16597_v32 = vpop.permute.xlu1 %912  ;;  %v16615_v13 = vsel %vm16573_vm10, 1, %v19388_v47  ;;  %v16620_v6 = vsel %vm19251_vm11, 1, %v19388_v47  ;;  %v16623_v43 = vsub.s32 4, %v19584_v38  ;;  %14212 = vperm.xlu0 %14619, %v14209_v56  }
 0x16a   : > { %3642 = vmatpush1.msra.mxu1 %v16318_v16  ;;  %19592 = vst [vmem:[#allocation56_spill] sm:$0xff] %v16620_v6  ;;  %19594 = vst [vmem:[#allocation52_spill] sm:$0xff] %v16626_v12  ;;  %v16629_v16 = vrot.slane %v491_v53, %v15220_v57  ;;  %v16632_v59 = vrot.slane %v1279_v4, %v19513_v41  ;;  %v2227_v1 = vmul.f32 %v19566_v22, %v2207_v51  ;;  %v19595_v53 = vld [vmem:[#allocation42_spill] sm:$0xff]  ;;  %vm19600_vm4 = vcmask 1043456  }
 0x16b   : > { %19593 = vst [vmem:[#allocation12_spill] sm:$0xff] %v16623_v43  ;;  %v1737_v35 = vadd.f32 %v1721_v27, %v1492_v29  ;;  %vm2452_vm1 = vcmp.eq.s32.totalorder %v16546_v8, 1  ;;  %v16640_v48 = vrot.slane %v737_v44, %v15220_v57  ;;  %3675 = vmatprep.mubr.f32.mxu1 %v19480_v62  ;;  %vm837_vm7 = vcmp.eq.s32.totalorder %v19595_v53, 1  ;;  %v16646_v4 = vpop.permute.xlu0 %365  ;;  %2037 = vrot.lane.b32.xlu1 %v16313_v33, %s14815_s13  ;;  %s18983_s13 = scalar_lea.vmem [#allocation7], %s14492_s19  ;;  %s14535_s19 = sshll.u32 %s14881_s28, 10 }
 0x16c   : > { %19596 = vst [vmem:[#allocation53_spill] sm:$0xff] %v16646_v4  ;;  %v1583_v29 = vrot.slane %v19591_v10, %v19576_v31  ;;  %v16651_v27 = vrot.slane %v2085_v30, %v15220_v57  ;;  %v2346_v56 = vrot.slane %v16615_v13, %v15220_v57  ;;  %v14500_v44 = vrot.slane %v16620_v6, 9  ;;  %v19599_v30 = vld [vmem:[#allocation49_spill] sm:$0xff]  ;;  %s14402_s1 = scalar_lea.hbm %s19105_s7, %s14535_s19  ;;  %s14732_s28 = sshll.u32 %s14819_s11, 4  ;;  %s14733_s28 = int_to_ptr.vmem [resolvable:$false] %s14732_s28 }
 0x16d   : > { %v16644_v38 = vpop.permute.xlu1 %2266  ;;  %3677 = vmatmul.mubr.f32.vlgmr.msra.gmra.mxu1 %v19574_v23  ;;  %v1998_v51 = vadd.f32 %v1982_v46, %v1737_v35  ;;  %vm591_vm2 = vcmp.eq.s32.totalorder %v19597_v0, 1  ;;  %vm1686_vm6 = vcmp.eq.s32.totalorder %v16339_v17, 1  ;;  %vm19598_vm12 = vcmp.lt.s32.totalorder %v15251_v7, 111  ;;  %s14734_s30 = scalar_lea.vmem %s14733_s28, 2048 }
 0x16e   : > { %v2296_v43 = vsel %vm19598_vm12, %v16464_v39, %v16644_v38  ;;  %v1844_v31 = vrot.slane %v19599_v30, %v15208_v55  ;;  %v16666_v22 = vrot.slane %v1038_v52, %v15220_v57  ;;  %3835 = vmatprep.mubr.f32.mxu1 %v19480_v62  ;;  %vm1138_vm15 = vcmp.eq.s32.totalorder %v16355_v34, 1 }
 0x16f   : > { %v2468_v46 = vsel %vm2452_vm1, %v2296_v43, 0.0  ;;  %v2718_v35 = vsel %vm19600_vm4, %v16626_v12, 0  ;;  %v495_v6 = vrot.slane %v16483_v58, %v15208_v55  ;;  %v741_v39 = vrot.slane %v19578_v18, %v15208_v55  ;;  %v16698_v43 = vpop.permute.xlu0 %669  ;;  %2280 = vrot.lane.b32.xlu1 %v19510_v11, %s14816_s23 }
 0x170   : > { %v2243_v30 = vadd.f32 %v2227_v1, %v1998_v51  ;;  %v2488_v52 = vmul.f32 %v19569_v28, %v2468_v46  ;;  %v1283_v23 = vrot.slane %v19578_v18, %v19513_v41  ;;  %v2089_v8 = vrot.slane %v19591_v10, %v15208_v55 }
 0x171   : > { %vm1947_vm8 = vcmp.eq.s32.totalorder %v16358_v36, 1  ;;  %v16695_v1 = vpop.permute.xlu1 %1213  ;;  %vm838_vm1 = vcmp.eq.s32.totalorder %v16640_v48, 1  ;;  %v16701_v10 = vrot.slane %v2346_v56, %v15220_v57  ;;  %v1587_v9 = vrot.slane %v16399_v24, %v19513_v41 }
 0x172   : > { %vm16705_vm3 = vcmp.ne.s32.totalorder %v14500_v44, 0  ;;  %v19603_v51 = vmov 0  ;;  %v2504_v46 = vadd.f32 %v2488_v52, %v2243_v30  ;;  %vm592_vm12 = vcmp.eq.s32.totalorder %v16629_v16, 1 }
 0x173   : > { %v19604_v51 = vsel %vm16705_vm3, 4294967295, %v19603_v51  ;;  %v16711_v12 = vrot.slane %v1583_v29, %v19513_v41  ;;  %v16713_v20 = vand.u32 4294901760, %v2718_v35  ;;  %vm19254_vm4 = vcmp.lt.s32.totalorder %v16532_v60, 15  ;;  %1227 = vrot.lane.b32.xlu1 %v16313_v33, %s14808_s17 }
 0x174   : > { %19605 = vst [vmem:[#allocation25_spill] sm:$0xff] %v19604_v51  ;;  %v16718_v56 = vrot.slane %v1844_v31, %v15220_v57  ;;  %v16722_v44 = vrot.slane %v495_v6, %v15220_v57  ;;  %v16727_v30 = vsel %vm16689_vm5, 1, %v19388_v47  ;;  %v16730_v29 = vadd.f32 %v19518_v15, %v2504_v46  ;;  %vm445_vm5 = vmand %vm19251_vm11, %vm16705_vm3 }
 0x175   : > { %v16735_v52 = vrot.slane %v741_v39, %v15220_v57  ;;  %v16738_v31 = vrot.slane %v1283_v23, %v19513_v41  ;;  %v16741_v6 = vrot.slane %v2089_v8, %v15220_v57  ;;  %vm19609_vm13 = vcmp.lt.s32.totalorder %v15251_v7, 16  ;;  %v16751_v11 = vpop.permute.xlu1 %1519  ;;  %v16753_v39 = vpop.permute.xlu0 %2023 }
 0x176   : > { %19606 = vst [vmem:[#allocation41_spill] sm:$0xff] %v16722_v44  ;;  %19607 = vst [vmem:[#allocation61_spill] sm:$0xff] %v16730_v29  ;;  %v694_v58 = vsel %vm19609_vm13, %v16293_v19, %v16498_v45  ;;  %v16757_v23 = vrot.slane %v1587_v9, %v19513_v41  ;;  %v16764_v46 = vsel %vm19254_vm4, 1, %v19388_v47  ;;  %v19612_v44 = vld [vmem:[#allocation30_spill] sm:$0xff]  ;;  %vm19613_vm13 = vcmp.lt.s32.totalorder %v15251_v7, 17 }
 0x177   : > { %19608 = vst [vmem:[#allocation42_spill] sm:$0xff] %v16735_v52  ;;  %19611 = vst [vmem:[#allocation49_spill] sm:$0xff] %v16764_v46  ;;  %v392_v19 = vsel %vm19613_vm13, %v19612_v44, %v16462_v49  ;;  %vm19614_vm11 = vcmp.lt.s32.totalorder %v15251_v7, 127  ;;  %v16775_v9 = vsub.f32 %v2718_v35, %v16713_v20  ;;  %vm19616_vm4 = vcmp.lt.s32.totalorder %v15251_v7, 15  ;;  %1778 = vrot.lane.b32.xlu1 %v19570_v5, %s14814_s10 }
 0x178   : > { %19610 = vst [vmem:[#allocation51_spill] sm:$0xff] %v16757_v23  ;;  %v1544_v52 = vsel %vm19614_vm11, %v16347_v54, %v16540_v2  ;;  %v19615_v23 = vld [vmem:[#allocation43_spill] sm:$0xff]  ;;  %vm19617_vm10 = vcmask 1043456   ;;  %v16788_v15 = vsel %vm445_vm5, 1, %v19388_v47  ;;  %v853_v54 = vsel %vm837_vm7, %v694_v58, 0.0 }
 0x179   : > { %v939_v51 = vsel %vm19616_vm4, %v19615_v23, %v16597_v32  ;;  %v2721_v41 = vsel %vm19617_vm10, %v16730_v29, 0  ;;  %vm19618_vm11 = vcmp.lt.s32.totalorder %v15251_v7, 16  ;;  %vm1384_vm10 = vcmp.eq.s32.totalorder %v16738_v31, 1  ;;  %v16814_v58 = vpop.permute.xlu1 %1764  ;;  %v16816_v29 = vpop.permute.xlu0 %914  ;;  %v19639_v31 = vld [vmem:[#allocation46_spill] sm:$0xff] }
 0x17a   : > { %v693_v35 = vsel %vm19618_vm11, %v16498_v45, %v16698_v43  ;;  %v16798_v23 = vand.u32 4294901760, %v2721_v41  ;;  %v14508_v8 = vrot.slane %v16764_v46, 9  ;;  %v607_v44 = vsel %vm591_vm2, %v392_v19, 0.0  ;;  %19620 = vst [vmem:[#allocation30_spill] sm:$0xff] %v16816_v29  ;;  %vm19621_vm2 = vmmov %vm19613_vm13 }
 0x17b   : > { %v1702_v53 = vsel %vm1686_vm6, %v1544_v52, 0.0  ;;  %v1789_v45 = vsel %vm19332_vm14, %v16412_v42, %v16599_v40  ;;  %vm19619_vm7 = vcmp.lt.s32.totalorder %v15251_v7, 1  ;;  %v1154_v0 = vsel %vm1138_vm15, %v939_v51, 0.0  ;;  %v19622_v52 = vld [vmem:[#allocation14_spill] sm:$0xff]  ;;  %2284 = vrot.lane.b32.xlu1 %v19570_v5, %s14816_s23  ;;  %s14404_s23 = sshll.u32 %s18983_s13, 4  ;;  %s14405_s23 = int_to_ptr.vmem [resolvable:$true] %s14404_s23 }
 0x17c   : > { %v1240_v33 = vsel %vm19619_vm7, %v16500_v37, %v16695_v1  ;;  %v391_v17 = vsel %vm19621_vm2, %v16462_v49, %v16646_v4  ;;  %vm1687_vm6 = vcmp.eq.s32.totalorder %v16711_v12, 1  ;;  %3714 = vmatprep.subr.mxu0 %v16798_v23  ;;  %v938_v42 = vsel %vm19616_vm4, %v16597_v32, %v16816_v29  ;;  %s14728_s20 = scalar_lea.vmem %s14405_s23, 1024  ;;  %p14735_p1 = scmp.lt.s32.totalorder %s14405_s23, %s14733_s28 }
 0x17d   : > { %v3799_v37 = vand.u32 4294901760, %v16775_v9  ;;  %v873_v19 = vmul.f32 %v19622_v52, %v853_v54  ;;  %v854_v34 = vsel %vm838_vm1, %v693_v35, 0.0  ;;  %v2050_v49 = vsel %vm2041_vm9, %v16538_v50, %v16753_v39  ;;  %3716 = vmatpush1.msra.mxu0 %v16713_v20  ;;  %v19624_v50 = vld [vmem:[#allocation24_spill] sm:$0xff]  ;;  %v16855_v36 = vpop.permute.xlu1 %367  ;;  %v16857_v35 = vpop.permute.xlu0 %2268  ;;  %p14729_p9 = scmp.ne.s32.totalorder %s14405_s23, %s14728_s20  ;;  %p14736_p2 = scmp.lt.s32.totalorder %s14734_s30, %s14728_s20 }
 0x17e   : > { %v3792_v51 = vsub.f32 %v2721_v41, %v16798_v23  ;;  %v628_v4 = vmul.f32 %v19461_v26, %v607_v44  ;;  %v1722_v32 = vmul.f32 %v19428_v25, %v1702_v53  ;;  %v1963_v29 = vsel %vm1947_vm8, %v1789_v45, 0.0  ;;  %3755 = vmatmul.mubr.f32.vlgmr.msra.gmra.mxu0 %v19624_v50 }
 0x17f   : > { %vm19623_vm15 = vcmp.eq.s32.totalorder %v16632_v59, 1  ;;  %vm1948_vm1 = vcmp.eq.s32.totalorder %v16718_v56, 1  ;;  %v1174_v54 = vmul.f32 %v15102_v21, %v1154_v0  ;;  %v608_v41 = vsel %vm592_vm12, %v391_v17, 0.0  ;;  %3911 = vmatprep.mubr.f32.mxu0 %v19480_v62  ;;  %v19648_v56 = vld [vmem:[#allocation40_spill] sm:$0xff]  ;;  %p14730_p13 = pnand %p14729_p9, %p19943_p11  ;;  %p14737_p0 = por %p14736_p2, %p14735_p1 }
 0x180   : > { %v1399_v48 = vsel %vm19623_vm15, %v1240_v33, 0.0  ;;  %vm19625_vm5 = vcmp.eq.s32.totalorder %v16666_v22, 1  ;;  %3875 = vmatprep.subr.mxu0 %v3792_v51  ;;  %v3793_v59 = vand.u32 4294901760, %v3792_v51  ;;  %v874_v53 = vmul.f32 %v19622_v52, %v854_v34 }
 0x181   : > { %v1155_v44 = vsel %vm19625_vm5, %v938_v42, 0.0  ;;  %vm19626_vm8 = vcmp.eq.s32.totalorder %v16651_v27, 1  ;;  %3878 = vmatpush1.msra.mxu0 %v16775_v9  ;;  %vm19627_vm12 = vcmp.lt.s32.totalorder %v15251_v7, 111  ;;  %v3800_v16 = vsub.f32 %v16775_v9, %v3799_v37  ;;  %p14731_p10 = pneg %p14730_p13 }
 0x182   : > { %v2208_v45 = vsel %vm19626_vm8, %v2050_v49, 0.0  ;;  %v2295_v22 = vsel %vm19627_vm12, %v16644_v38, %v16857_v35  ;;  %v889_v33 = vadd.f32 %v873_v19, %v628_v4  ;;  %v1983_v0 = vmul.f32 %v19558_v14, %v1963_v29  ;;  %4029 = vmatprep.subr.mxu0 %v3793_v59  ;;  %3914 = vmatmul.mubr.f32.vlgmr.msra.gmra.mxu0 %v19561_v63  ;;  %v19632_v4 = vld [vmem:[#allocation29_spill] sm:$0xff]  ;;  %v19633_v19 = vld [vmem:[#allocation28_spill] sm:$0xff] }
 0x183   : > { %v1419_v17 = vmul.f32 %v19559_v61, %v1399_v48  ;;  %v3794_v42 = vsub.f32 %v3792_v51, %v3793_v59  ;;  %v629_v34 = vmul.f32 %v19461_v26, %v608_v41  ;;  %v1175_v27 = vmul.f32 %v15102_v21, %v1155_v44  ;;  %4033 = vmatpush1.msra.mxu0 %v3799_v37  ;;  %v16884_v48 = vpop.permute.xlu1 %671  ;;  %p14738_p3 = pnand %p14737_p0, %p14731_p10 }
 0x184   : > { %vm19628_vm13 = vcmp.eq.s32.totalorder %v16701_v10, 1  ;;  %vm16878_vm11 = vcmp.ne.s32.totalorder %v14508_v8, 0  ;;  %v19629_v38 = vmov 0  ;;  %v1738_v29 = vadd.f32 %v1722_v32, %v19632_v4  ;;  %v16886_v10 = vpop.permute.xlu0 %1215  ;;  %4066 = vmatprep.mubr.f32.mxu0 %v19480_v62 }
 0x185   : > { %v2469_v49 = vsel %vm19628_vm13, %v2295_v22, 0.0  ;;  %v19630_v38 = vsel %vm16878_vm11, 4294967295, %v19629_v38  ;;  %v1190_v9 = vadd.f32 %v1174_v54, %v889_v33  ;;  %v2228_v51 = vmul.f32 %v19633_v19, %v2208_v45 }
 0x186   : > { %19631 = vst [vmem:[#allocation43_spill] sm:$0xff] %v19630_v38  ;;  %v3795_v41 = vand.u32 4294901760, %v3794_v42  ;;  %v890_v5 = vadd.f32 %v874_v53, %v629_v34  ;;  %vm19634_vm7 = vcmp.lt.s32.totalorder %v15251_v7, 127  ;;  %vm19635_vm2 = vcmp.lt.s32.totalorder %v15251_v7, 1  ;;  %4068 = vmatmul.mubr.f32.vlgmr.msra.gmra.mxu0 %v19639_v31 }
 0x187   : > { %v1543_v8 = vsel %vm19634_vm7, %v16540_v2, %v16751_v11  ;;  %v1239_v32 = vsel %vm19635_vm2, %v16695_v1, %v16886_v10  ;;  %v3801_v54 = vand.u32 4294901760, %v3800_v16  ;;  %v1999_v37 = vadd.f32 %v1983_v0, %v1738_v29  ;;  %v16919_v0 = vpop.permute.xlu1 %2025  ;;  %4214 = vmatprep.mubr.f32.mxu0 %v19480_v62 }
 0x188   : > { %v1435_v44 = vadd.f32 %v1419_v17, %v1190_v9  ;;  %v2489_v59 = vmul.f32 %v19569_v28, %v2469_v49  ;;  %3796 = vmatprep.subr.mxu1 %v3795_v41  ;;  %v1400_v45 = vsel %vm1384_vm10, %v1239_v32, 0.0  ;;  %vm19636_vm4 = vcmp.ge.s32.totalorder %v16532_v60, 1  ;;  %v16921_v17 = vpop.permute.xlu0 %1521  ;;  %v19641_v49 = vld [vmem:[#allocation31_spill] sm:$0xff] }
 0x189   : > { %vm16904_vm15 = vmand %vm19636_vm4, %vm16878_vm11  ;;  %v1788_v1 = vsel %vm19332_vm14, %v16599_v40, %v16814_v58  ;;  %v1191_v53 = vadd.f32 %v1175_v27, %v890_v5  ;;  %v1420_v22 = vmul.f32 %v19559_v61, %v1400_v45  ;;  %3802 = vmatpush1.msra.mxu1 %v3801_v54  ;;  %vm2193_vm5 = vcmp.eq.s32.totalorder %v16741_v6, 1 }
 0x18a   : > { %v1703_v16 = vsel %vm1687_vm6, %v1543_v8, 0.0  ;;  %v2244_v33 = vadd.f32 %v2228_v51, %v1999_v37  ;;  %3837 = vmatmul.mubr.f32.vlgmr.msra.gmra.mxu1 %v19639_v31  ;;  %3951 = vmatprep.subr.mxu1 %v16798_v23  ;;  %v19640_v40 = vrot.slane %v16615_v13, %v15208_v55  ;;  %v499_v34 = vrot.slane %v16788_v15, %v15220_v57  ;;  %v19642_v51 = vld [vmem:[#allocation56_spill] sm:$0xff]  ;;  %v19644_v8 = vld [vmem:[#allocation55_spill] sm:$0xff] }
 0x18b   : > { %v1436_v27 = vadd.f32 %v1420_v22, %v1191_v53  ;;  %3953 = vmatpush1.msra.mxu1 %v16713_v20  ;;  %v2049_v12 = vsel %vm2041_vm9, %v16753_v39, %v16919_v0  ;;  %v1287_v4 = vrot.slane %v19578_v18, %v19641_v49  ;;  %v16939_v29 = vsel %vm16904_vm15, 1, %v19388_v47  ;;  %3986 = vmatprep.mubr.f32.mxu1 %v19480_v62  ;;  %v19652_v53 = vld [vmem:[#allocation54_spill] sm:$0xff] }
 0x18c   : > { %v2414_v42 = vrot.slane %v19640_v40, %v15220_v57  ;;  %v1964_v13 = vsel %vm1948_vm1, %v1788_v1, 0.0  ;;  %v2505_v9 = vadd.f32 %v2489_v59, %v2244_v33  ;;  %4105 = vmatprep.subr.mxu1 %v16798_v23  ;;  %v745_v41 = vrot.slane %v19642_v51, %v15220_v57  ;;  %v19650_v59 = vld [vmem:[#allocation60_spill] sm:$0xff] }
 0x18d   : > { %v1591_v39 = vrot.slane %v16399_v24, %v19641_v49  ;;  %vm19645_vm10 = vcmp.lt.s32.totalorder %v19644_v8, 15  ;;  %v19649_v54 = vcombine.high %v19648_v56, %v19648_v56  ;;  %v1723_v37 = vmul.f32 %v19428_v25, %v1703_v16  ;;  %v16976_v16 = vpop.permute.xlu1 %916  ;;  %v16998_v8 = vld [vmem:[#allocation5 + $0x30] sm:$0x77] }
 0x18e   : > { %vm16953_vm6 = vmand %vm19645_vm10, %vm16492_vm0  ;;  %v16962_v45 = vadd.f32 %v19650_v59, %v1436_v27  ;;  %v2093_v2 = vrot.slane %v16399_v24, %v15220_v57  ;;  %v2209_v1 = vsel %vm2193_vm5, %v2049_v12, 0.0  ;;  %3990 = vmatmul.mubr.f32.vlgmr.msra.gmra.mxu1 %v19652_v53  ;;  %v19653_v22 = vrot.slane %v16567_v3, %v15208_v55  ;;  %v16984_v27 = vpop.permute.xlu0 %1766  ;;  %19655 = vst [vmem:[#allocation29_spill] sm:$0xff] %v16998_v8  ;;  %v19656_v56 = vld [vmem:[#allocation38_spill] sm:$0xff] }
 0x18f   : > { %v1494_v23 = vadd.f32 %v19649_v54, %v1435_v44  ;;  %v19654_v33 = vrot.slane %v16727_v30, %v15220_v57  ;;  %v1046_v6 = vrot.slane %v16939_v29, %v15220_v57  ;;  %v1984_v12 = vmul.f32 %v19558_v14, %v1964_v13  ;;  %4107 = vmatpush1.msra.mxu1 %v16713_v20 }
 0x190   : > { %19651 = vst [vmem:[#allocation14_spill] sm:$0xff] %v16962_v45  ;;  %v16974_v44 = vrot.slane %v19653_v22, %v15220_v57  ;;  %vm2454_vm0 = vcmp.eq.s32.totalorder %v2414_v42, 1  ;;  %v16991_v3 = vrot.slane %v499_v34, %v15220_v57  ;;  %v16996_v5 = vsel %vm16953_vm6, 1, %v19388_v47  ;;  %v19658_v22 = vld [vmem:[#allocation32_spill] sm:$0xff]  ;;  %4140 = vmatprep.mubr.f32.mxu1 %v19480_v62 }
 0x191   : > { %v16982_v40 = vrot.slane %v19654_v33, %v15220_v57  ;;  %v17001_v54 = vadd.f32 %v19656_v56, %v2505_v9  ;;  %v17004_v33 = vrot.slane %v1287_v4, %v19658_v22  ;;  %v17007_v13 = vrot.slane %v745_v41, %v15220_v57  ;;  %v17028_v53 = vpop.permute.xlu1 %2270 }
 0x192   : > { %v17010_v20 = vrot.slane %v1591_v39, %v19658_v22  ;;  %vm19660_vm1 = vcmp.lt.s32.totalorder %v16532_v60, 15  ;;  %v1739_v9 = vadd.f32 %v1723_v37, %v1494_v23  ;;  %v2229_v4 = vmul.f32 %v19633_v19, %v2209_v1  ;;  %v19663_v39 = vld [vmem:[#allocation42_spill] sm:$0xff]  ;;  %v17030_v34 = vpop.permute.xlu0 %369  ;;  %4142 = vmatmul.mubr.f32.vlgmr.msra.gmra.mxu1 %v19639_v31  ;;  %v19665_v1 = vld [vmem:[#allocation51_spill] sm:$0xff] }
 0x193   : > { %19657 = vst [vmem:[#allocation31_spill] sm:$0xff] %v17001_v54  ;;  %vm17017_vm8 = vmand %vm19660_vm1, %vm16705_vm3  ;;  %v17023_v18 = vrot.slane %v2093_v2, %v15220_v57  ;;  %v1852_v41 = vrot.slane %v16727_v30, %v15208_v55  ;;  %vm839_vm12 = vcmp.eq.s32.totalorder %v19663_v39, 1  ;;  %v17033_v59 = vrot.slane %v1046_v6, %v15220_v57  ;;  %v19664_v2 = vld [vmem:[#allocation41_spill] sm:$0xff]  ;;  %4300 = vmatprep.mubr.f32.mxu1 %v19480_v62 }
 0x194   : > { %v503_v23 = vrot.slane %v16788_v15, %v15208_v55  ;;  %v2354_v37 = vrot.slane %v16996_v5, %v15220_v57  ;;  %vm19274_vm3 = vcmp.ge.s32.totalorder %v16998_v8, 1  ;;  %v2000_v30 = vadd.f32 %v1984_v12, %v1739_v9 }
 0x195   : > { %vm593_vm13 = vcmp.eq.s32.totalorder %v19664_v2, 1  ;;  %vm1688_vm7 = vcmp.eq.s32.totalorder %v19665_v1, 1  ;;  %vm19666_vm2 = vcmp.lt.s32.totalorder %v15251_v7, 111  ;;  %v749_v15 = vrot.slane %v19642_v51, %v15208_v55 }
 0x196   : > { %v2294_v6 = vsel %vm19666_vm2, %v16857_v35, %v17028_v53  ;;  %v17053_v60 = vsel %vm17017_vm8, 1, %v19388_v47  ;;  %vm1140_vm4 = vcmp.eq.s32.totalorder %v16974_v44, 1  ;;  %vm19668_vm15 = vcmask 1043456  }
 0x197   : > { %19667 = vst [vmem:[#allocation45_spill] sm:$0xff] %v17053_v60  ;;  %v2470_v12 = vsel %vm2454_vm0, %v2294_v6, 0.0  ;;  %v2724_v9 = vsel %vm19668_vm15, %v17001_v54, 0  ;;  %v1291_v35 = vrot.slane %v19642_v51, %v19658_v22  ;;  %v2097_v38 = vrot.slane %v16399_v24, %v15208_v55  ;;  %v17074_v6 = vpop.permute.xlu1 %1217  ;;  %v17076_v24 = vpop.permute.xlu0 %673 }
 0x198   : > { %v2245_v31 = vadd.f32 %v2229_v4, %v2000_v30  ;;  %v2490_v19 = vmul.f32 %v19569_v28, %v2470_v12  ;;  %vm840_vm5 = vcmp.eq.s32.totalorder %v17007_v13, 1  ;;  %v1595_v32 = vrot.slane %v16764_v46, %v19658_v22 }
 0x199   : > { %v17070_v42 = vsel %vm19274_vm3, 1, %v19388_v47  ;;  %vm1949_vm10 = vcmp.eq.s32.totalorder %v16982_v40, 1  ;;  %vm1385_vm6 = vcmp.eq.s32.totalorder %v17004_v33, 1  ;;  %v17079_v4 = vrot.slane %v1852_v41, %v15220_v57 }
 0x19a   : > { %19669 = vst [vmem:[#allocation55_spill] sm:$0xff] %v17070_v42  ;;  %v17082_v30 = vrot.slane %v2354_v37, %v15220_v57  ;;  %v1050_v12 = vrot.slane %v16939_v29, %v15208_v55  ;;  %v1856_v54 = vrot.slane %v17053_v60, %v15220_v57  ;;  %v2506_v46 = vadd.f32 %v2490_v19, %v2245_v31 }
 0x19b   : > { %vm594_vm0 = vcmp.eq.s32.totalorder %v16991_v3, 1  ;;  %v17089_v28 = vand.u32 4294901760, %v2724_v9  ;;  %v2358_v45 = vrot.slane %v16996_v5, %v15208_v55  ;;  %vm19277_vm1 = vcmp.lt.s32.totalorder %v16998_v8, 15 }
 0x19c   : > { %v17097_v41 = vrot.slane %v503_v23, %v15220_v57  ;;  %v17100_v29 = vrot.slane %v749_v15, %v15220_v57  ;;  %v14501_v19 = vrot.slane %v17070_v42, 9  ;;  %v17104_v31 = vadd.f32 %v19656_v56, %v2506_v46  ;;  %v17119_v15 = vpop.permute.xlu1 %1523 }
 0x19d   : > { %v17107_v37 = vrot.slane %v1291_v35, %v19658_v22  ;;  %v17110_v5 = vrot.slane %v2097_v38, %v15220_v57  ;;  %v17113_v60 = vrot.slane %v1595_v32, %v19658_v22  ;;  %vm19674_vm15 = vcmp.lt.s32.totalorder %v15251_v7, 16  ;;  %v19677_v32 = vld [vmem:[#allocation53_spill] sm:$0xff] }
 0x19e   : > { %19670 = vst [vmem:[#allocation40_spill] sm:$0xff] %v17097_v41  ;;  %19671 = vst [vmem:[#allocation32_spill] sm:$0xff] %v17100_v29  ;;  %v692_v23 = vsel %vm19674_vm15, %v16698_v43, %v16884_v48  ;;  %v17121_v41 = vpop.permute.xlu0 %2027  ;;  %v17125_v46 = vrot.slane %v1050_v12, %v15220_v57  ;;  %v17128_v38 = vrot.slane %v1856_v54, %v15220_v57  ;;  %v17133_v35 = vsel %vm19277_vm1, 1, %v19388_v47 }
 0x19f   : > { %19672 = vst [vmem:[#allocation25_spill] sm:$0xff] %v17104_v31  ;;  %19673 = vst [vmem:[#allocation42_spill] sm:$0xff] %v17113_v60  ;;  %vm19678_vm15 = vcmp.lt.s32.totalorder %v15251_v7, 17  ;;  %vm19679_vm3 = vcmp.lt.s32.totalorder %v15251_v7, 127  ;;  %v4263_v12 = vsub.f32 %v2724_v9, %v17089_v28  ;;  %v17145_v54 = vrot.slane %v2358_v45, %v15220_v57 }
 0x1a0   : > { %19675 = vst [vmem:[#allocation41_spill] sm:$0xff] %v17125_v46  ;;  %19676 = vst [vmem:[#allocation51_spill] sm:$0xff] %v17128_v38  ;;  %v390_v43 = vsel %vm19678_vm15, %v19677_v32, %v16855_v36  ;;  %v1542_v60 = vsel %vm19679_vm3, %v16751_v11, %v16921_v17  ;;  %v19680_v38 = vld [vmem:[#allocation30_spill] sm:$0xff]  ;;  %vm19681_vm1 = vcmp.lt.s32.totalorder %v15251_v7, 15  ;;  %vm19682_vm8 = vcmask 1043456  }
 0x1a1   : > { %v937_v46 = vsel %vm19681_vm1, %v19680_v38, %v16976_v16  ;;  %v2727_v29 = vsel %vm19682_vm8, %v17104_v31, 0  ;;  %vm17153_vm2 = vcmp.ne.s32.totalorder %v14501_v19, 0  ;;  %v855_v9 = vsel %vm839_vm12, %v692_v23, 0.0  ;;  %v17181_v23 = vpop.permute.xlu1 %1768 }
 0x1a2   : > { %vm19685_vm3 = vcmp.lt.s32.totalorder %v15251_v7, 16  ;;  %v17165_v56 = vand.u32 4294901760, %v2727_v29  ;;  %vm1386_vm1 = vcmp.eq.s32.totalorder %v17107_v37, 1  ;;  %v609_v38 = vsel %vm593_vm13, %v390_v43, 0.0  ;;  %v17183_v31 = vpop.permute.xlu0 %918  ;;  %vm19687_vm13 = vmmov %vm19678_vm15 }
 0x1a3   : > { %v691_v45 = vsel %vm19685_vm3, %v16884_v48, %v17076_v24  ;;  %v1704_v11 = vsel %vm1688_vm7, %v1542_v60, 0.0  ;;  %v1787_v39 = vsel %vm19332_vm14, %v16814_v58, %v16984_v27  ;;  %vm19686_vm12 = vcmp.lt.s32.totalorder %v15251_v7, 1 }
 0x1a4   : > { %v1238_v48 = vsel %vm19686_vm12, %v16886_v10, %v17074_v6  ;;  %v1156_v2 = vsel %vm1140_vm4, %v937_v46, 0.0  ;;  %v389_v60 = vsel %vm19687_vm13, %v16855_v36, %v17030_v34  ;;  %vm1689_vm7 = vcmp.eq.s32.totalorder %v17010_v20, 1  ;;  %4179 = vmatprep.subr.mxu0 %v17165_v56 }
 0x1a5   : > { %vm19688_vm8 = vcmp.lt.s32.totalorder %v15251_v7, 15  ;;  %v4264_v10 = vand.u32 4294901760, %v4263_v12  ;;  %v875_v1 = vmul.f32 %v19622_v52, %v855_v9  ;;  %v856_v44 = vsel %vm840_vm5, %v691_v45, 0.0  ;;  %4181 = vmatpush1.msra.mxu0 %v17089_v28 }
 0x1a6   : > { %v936_v58 = vsel %vm19688_vm8, %v16976_v16, %v17183_v31  ;;  %v2048_v36 = vsel %vm2041_vm9, %v16919_v0, %v17121_v41  ;;  %v4257_v46 = vsub.f32 %v2727_v29, %v17165_v56  ;;  %v630_v43 = vmul.f32 %v19461_v26, %v609_v38  ;;  %4220 = vmatmul.mubr.f32.vlgmr.msra.gmra.mxu0 %v19624_v50  ;;  %v17221_v45 = vpop.permute.xlu0 %2272 }
 0x1a7   : > { %v1724_v19 = vmul.f32 %v19428_v25, %v1704_v11  ;;  %v1965_v16 = vsel %vm1949_vm10, %v1787_v39, 0.0  ;;  %v1401_v13 = vsel %vm1385_vm6, %v1238_v48, 0.0  ;;  %vm1950_vm4 = vcmp.eq.s32.totalorder %v17079_v4, 1  ;;  %v17219_v11 = vpop.permute.xlu1 %371  ;;  %4376 = vmatprep.mubr.f32.mxu0 %v19480_v62  ;;  %v19714_v4 = vld [vmem:[#allocation60_spill] sm:$0xff] }
 0x1a8   : > { %v1176_v0 = vmul.f32 %v15102_v21, %v1156_v2  ;;  %v610_v9 = vsel %vm594_vm0, %v389_v60, 0.0  ;;  %vm19689_vm5 = vcmp.eq.s32.totalorder %v17033_v59, 1  ;;  %4340 = vmatprep.subr.mxu0 %v4257_v46  ;;  %19690 = vst [vmem:[#allocation53_spill] sm:$0xff] %v17219_v11  ;;  %v4258_v40 = vand.u32 4294901760, %v4257_v46 }
 0x1a9   : > { %v1157_v29 = vsel %vm19689_vm5, %v936_v58, 0.0  ;;  %v876_v33 = vmul.f32 %v19622_v52, %v856_v44  ;;  %vm19691_vm10 = vcmp.eq.s32.totalorder %v17023_v18, 1  ;;  %4343 = vmatpush1.msra.mxu0 %v4263_v12  ;;  %vm19692_vm6 = vcmp.lt.s32.totalorder %v15251_v7, 111  ;;  %v17234_v58 = vld [vmem:[#allocation5 + $0x38] sm:$0x77] }
 0x1aa   : > { %v2210_v38 = vsel %vm19691_vm10, %v2048_v36, 0.0  ;;  %v2293_v59 = vsel %vm19692_vm6, %v17028_v53, %v17221_v45  ;;  %v4265_v3 = vsub.f32 %v4263_v12, %v4264_v10  ;;  %vm2195_vm0 = vcmp.eq.s32.totalorder %v17110_v5, 1  ;;  %4494 = vmatprep.subr.mxu0 %v4258_v40  ;;  %4379 = vmatmul.mubr.f32.vlgmr.msra.gmra.mxu0 %v19561_v63  ;;  %v19694_v53 = vld [vmem:[#allocation14_spill] sm:$0xff] }
 0x1ab   : > { %v891_v39 = vadd.f32 %v875_v1, %v630_v43  ;;  %v1985_v48 = vmul.f32 %v19558_v14, %v1965_v16  ;;  %v1421_v2 = vmul.f32 %v19559_v61, %v1401_v13  ;;  %v4259_v60 = vsub.f32 %v4257_v46, %v4258_v40  ;;  %v19695_v43 = vld [vmem:[#allocation28_spill] sm:$0xff]  ;;  %4498 = vmatpush1.msra.mxu0 %v4264_v10  ;;  %v17244_v46 = vpop.permute.xlu1 %675  ;;  %v17246_v40 = vpop.permute.xlu0 %1219 }
 0x1ac   : > { %v631_v18 = vmul.f32 %v19461_v26, %v610_v9  ;;  %v1177_v44 = vmul.f32 %v15102_v21, %v1157_v29  ;;  %vm19693_vm15 = vcmp.eq.s32.totalorder %v17082_v30, 1  ;;  %vm407_vm3 = vcmp.ge.s32.totalorder %v17234_v58, 1  ;;  %4531 = vmatprep.mubr.f32.mxu0 %v19480_v62 }
 0x1ad   : > { %v2471_v36 = vsel %vm19693_vm15, %v2293_v59, 0.0  ;;  %v1740_v12 = vadd.f32 %v1724_v19, %v19694_v53  ;;  %v1192_v1 = vadd.f32 %v1176_v0, %v891_v39  ;;  %v2230_v16 = vmul.f32 %v19695_v43, %v2210_v38  ;;  %v19701_v59 = vld [vmem:[#allocation44_spill] sm:$0xff] }
 0x1ae   : > { %v4260_v13 = vand.u32 4294901760, %v4259_v60  ;;  %vm19696_vm12 = vcmp.ge.s32.totalorder %v16998_v8, 1  ;;  %v892_v19 = vadd.f32 %v876_v33, %v631_v18  ;;  %vm19699_vm8 = vcmp.lt.s32.totalorder %v15251_v7, 127 }
 0x1af   : > { %vm17252_vm13 = vmand %vm19696_vm12, %vm17153_vm2  ;;  %v1541_v10 = vsel %vm19699_vm8, %v16921_v17, %v17119_v15  ;;  %vm19700_vm5 = vcmp.lt.s32.totalorder %v15251_v7, 1  ;;  %v4266_v9 = vand.u32 4294901760, %v4265_v3  ;;  %v2001_v29 = vadd.f32 %v1985_v48, %v1740_v12  ;;  %v19702_v3 = vld [vmem:[#allocation46_spill] sm:$0xff] }
 0x1b0   : > { %v1237_v0 = vsel %vm19700_vm5, %v17074_v6, %v17246_v40  ;;  %v1437_v38 = vadd.f32 %v1421_v2, %v1192_v1  ;;  %v2491_v39 = vmul.f32 %v19701_v59, %v2471_v36  ;;  %4261 = vmatprep.subr.mxu1 %v4260_v13  ;;  %v1786_v33 = vsel %vm19332_vm14, %v16984_v27, %v17181_v23  ;;  %v17282_v27 = vpop.permute.xlu1 %2029  ;;  %v17284_v2 = vpop.permute.xlu0 %1525 }
 0x1b1   : > { %v1402_v60 = vsel %vm1386_vm1, %v1237_v0, 0.0  ;;  %v1193_v17 = vadd.f32 %v1177_v44, %v892_v19  ;;  %4267 = vmatpush1.msra.mxu1 %v4266_v9  ;;  %vm2456_vm10 = vcmp.eq.s32.totalorder %v17145_v54, 1  ;;  %v454_v6 = vsel %vm17252_vm13, 1, %v19388_v47  ;;  %4533 = vmatmul.mubr.f32.vlgmr.msra.gmra.mxu0 %v19702_v3  ;;  %v19710_v9 = vld [vmem:[#allocation59_spill] sm:$0xff] }
 0x1b2   : > { %v1422_v18 = vmul.f32 %v19559_v61, %v1402_v60  ;;  %v1705_v37 = vsel %vm1689_vm7, %v1541_v10, 0.0  ;;  %v2246_v48 = vadd.f32 %v2230_v16, %v2001_v29  ;;  %4302 = vmatmul.mubr.f32.vlgmr.msra.gmra.mxu1 %v19702_v3  ;;  %4416 = vmatprep.subr.mxu1 %v17165_v56  ;;  %v19703_v44 = vrot.slane %v17133_v35, 9  ;;  %v19708_v16 = vld [vmem:[#allocation49_spill] sm:$0xff] }
 0x1b3   : > { %v19704_v36 = vmov 0  ;;  %v17295_v20 = vsel %vm407_vm3, 1, %v19388_v47  ;;  %4418 = vmatpush1.msra.mxu1 %v17089_v28  ;;  %v2047_v12 = vsel %vm2041_vm9, %v17121_v41, %v17282_v27  ;;  %v753_v1 = vrot.slane %v17070_v42, %v15220_v57  ;;  %4451 = vmatprep.mubr.f32.mxu1 %v19480_v62 }
 0x1b4   : > { %vm17288_vm1 = vcmp.ne.s32.totalorder %v19703_v44, 0  ;;  %19707 = vst [vmem:[#allocation14_spill] sm:$0xff] %v17295_v20  ;;  %v1438_v53 = vadd.f32 %v1422_v18, %v1193_v17  ;;  %v1599_v13 = vrot.slane %v19708_v16, %v19641_v49  ;;  %v1966_v30 = vsel %vm1950_vm4, %v1786_v33, 0.0  ;;  %4570 = vmatprep.subr.mxu1 %v17165_v56  ;;  %v19716_v33 = vld [vmem:[#allocation47_spill] sm:$0xff]  ;;  %vm19718_vm4 = vmmov %vm19696_vm12  ;;  %4679 = vmatprep.mubr.f32.mxu0 %v19480_v62  ;;  %v19721_v44 = vld [vmem:[#allocation54_spill] sm:$0xff] }
 0x1b5   : > { %v19705_v36 = vsel %vm17288_vm1, 4294967295, %v19704_v36  ;;  %v2507_v19 = vadd.f32 %v2491_v39, %v2246_v48  ;;  %v507_v10 = vrot.slane %v454_v6, %v15220_v57  ;;  %v2101_v0 = vrot.slane %v19708_v16, %v15220_v57  ;;  %vm17332_vm15 = vmand %vm19718_vm4, %vm17288_vm1 }
 0x1b6   : > { %19706 = vst [vmem:[#allocation30_spill] sm:$0xff] %v19705_v36  ;;  %vm19711_vm7 = vcmp.lt.s32.totalorder %v19710_v9, 15  ;;  %v19715_v39 = vcombine.high %v19714_v4, %v19714_v4  ;;  %v1725_v56 = vmul.f32 %v19428_v25, %v1705_v37  ;;  %v17326_v17 = vadd.f32 %v19716_v33, %v1438_v53  ;;  %4455 = vmatmul.mubr.f32.vlgmr.msra.gmra.mxu1 %v19721_v44  ;;  %v17341_v37 = vpop.permute.xlu1 %920  ;;  %v17343_v53 = vpop.permute.xlu0 %1770  ;;  %v19723_v4 = vld [vmem:[#allocation45_spill] sm:$0xff] }
 0x1b7   : > { %vm17317_vm6 = vmand %vm19711_vm7, %vm16878_vm11  ;;  %v14502_v48 = vrot.slane %v17295_v20, 9  ;;  %v19722_v41 = vrot.slane %v19642_v51, %v19641_v49  ;;  %v511_v33 = vrot.slane %v454_v6, %v15208_v55  ;;  %v1986_v5 = vmul.f32 %v19558_v14, %v1966_v30  ;;  %4572 = vmatpush1.msra.mxu1 %v17089_v28  ;;  %v19725_v51 = vld [vmem:[#allocation38_spill] sm:$0xff]  ;;  %4605 = vmatprep.mubr.f32.mxu1 %v19480_v62 }
 0x1b8   : > { %v1496_v60 = vadd.f32 %v19715_v39, %v1437_v38  ;;  %19717 = vst [vmem:[#allocation49_spill] sm:$0xff] %v17326_v17  ;;  %v2211_v38 = vsel %vm2195_vm0, %v2047_v12, 0.0  ;;  %v1860_v39 = vrot.slane %v19723_v4, %v15208_v55  ;;  %v17357_v12 = vrot.slane %v753_v1, %v15220_v57 }
 0x1b9   : > { %v17349_v9 = vrot.slane %v19722_v41, %v19658_v22  ;;  %v17360_v44 = vrot.slane %v1599_v13, %v19658_v22  ;;  %v17365_v41 = vsel %vm17317_vm6, 1, %v19388_v47  ;;  %v17368_v36 = vadd.f32 %v19725_v51, %v2507_v19 }
 0x1ba   : > { %19724 = vst [vmem:[#allocation43_spill] sm:$0xff] %v17357_v12  ;;  %v17371_v6 = vrot.slane %v507_v10, %v15220_v57  ;;  %v17374_v30 = vrot.slane %v2101_v0, %v15220_v57  ;;  %v1001_v28 = vsel %vm17332_vm15, 1, %v19388_v47  ;;  %vm19728_vm11 = vcmp.lt.s32.totalorder %v16998_v8, 15  ;;  %v17394_v0 = vpop.permute.xlu1 %2274  ;;  %v17396_v29 = vpop.permute.xlu0 %373  ;;  %4607 = vmatmul.mubr.f32.vlgmr.msra.gmra.mxu1 %v19702_v3 }
 0x1bb   : > { %19726 = vst [vmem:[#allocation59_spill] sm:$0xff] %v17368_v36  ;;  %vm17384_vm0 = vmand %vm19728_vm11, %vm17153_vm2  ;;  %v1741_v13 = vadd.f32 %v1725_v56, %v1496_v60  ;;  %v2231_v19 = vmul.f32 %v19695_v43, %v2211_v38  ;;  %vm17389_vm12 = vcmp.ne.s32.totalorder %v14502_v48, 0  ;;  %v19731_v10 = vmov 0  ;;  %v19736_v38 = vld [vmem:[#allocation32_spill] sm:$0xff]  ;;  %4765 = vmatprep.mubr.f32.mxu1 %v19480_v62 }
 0x1bc   : > { %19727 = vst [vmem:[#allocation60_spill] sm:$0xff] %v17371_v6  ;;  %v19732_v10 = vsel %vm17389_vm12, 4294967295, %v19731_v10  ;;  %vm19305_vm13 = vcmp.lt.s32.totalorder %v17234_v58, 15  ;;  %19734 = vst [vmem:[#allocation62_spill] sm:$0xff] %v17396_v29  ;;  %v17399_v32 = vrot.slane %v1860_v39, %v15220_v57  ;;  %v17402_v18 = vrot.slane %v511_v33, %v15220_v57  ;;  %v19738_v29 = vld [vmem:[#allocation40_spill] sm:$0xff]  ;;  %v19745_v6 = vld [vmem:[#allocation51_spill] sm:$0xff] }
 0x1bd   : > { %19733 = vst [vmem:[#allocation45_spill] sm:$0xff] %v19732_v10  ;;  %v2362_v60 = vrot.slane %v17365_v41, %v15220_v57  ;;  %v757_v56 = vrot.slane %v17070_v42, %v15208_v55  ;;  %v2002_v48 = vadd.f32 %v1986_v5, %v1741_v13  ;;  %vm841_vm2 = vcmp.eq.s32.totalorder %v19736_v38, 1  ;;  %v19739_v5 = vld [vmem:[#allocation42_spill] sm:$0xff]  ;;  %vm17433_vm4 = vmand %vm407_vm3, %vm17389_vm12 }
 0x1be   : > { %19735 = vst [vmem:[#allocation63_spill] sm:$0xff] %v17402_v18  ;;  %vm19737_vm8 = vcmp.lt.s32.totalorder %v15251_v7, 111  ;;  %v1299_v33 = vrot.slane %v17070_v42, %v19658_v22  ;;  %v17420_v39 = vsel %vm17384_vm0, 1, %v19388_v47  ;;  %vm595_vm5 = vcmp.eq.s32.totalorder %v19738_v29, 1  ;;  %v17449_v43 = vpop.permute.xlu1 %1221  ;;  %v17451_v12 = vpop.permute.xlu0 %677 }
 0x1bf   : > { %v2292_v4 = vsel %vm19737_vm8, %v17221_v45, %v17394_v0  ;;  %vm1690_vm7 = vcmp.eq.s32.totalorder %v19739_v5, 1  ;;  %v1054_v18 = vrot.slane %v1001_v28, %v15220_v57  ;;  %vm19740_vm6 = vcmask 1043456   ;;  %19746 = vst [vmem:[#allocation40_spill] sm:$0xff] %v17451_v12 }
 0x1c0   : > { %v2472_v13 = vsel %vm2456_vm10, %v2292_v4, 0.0  ;;  %v2730_v45 = vsel %vm19740_vm6, %v17368_v36, 0  ;;  %v17440_v3 = vsel %vm19305_vm13, 1, %v19388_v47  ;;  %v2247_v54 = vadd.f32 %v2231_v19, %v2002_v48  ;;  %v19744_v4 = vld [vmem:[#allocation41_spill] sm:$0xff] }
 0x1c1   : > { %19743 = vst [vmem:[#allocation32_spill] sm:$0xff] %v17440_v3  ;;  %vm1142_vm10 = vcmp.eq.s32.totalorder %v19744_v4, 1  ;;  %v2492_v8 = vmul.f32 %v19701_v59, %v2472_v13  ;;  %v2105_v36 = vrot.slane %v19708_v16, %v15208_v55  ;;  %v1603_v10 = vrot.slane %v17133_v35, %v19658_v22 }
 0x1c2   : > { %vm1951_vm15 = vcmp.eq.s32.totalorder %v19745_v6, 1  ;;  %v17454_v17 = vrot.slane %v2362_v60, %v15220_v57  ;;  %v1058_v19 = vrot.slane %v1001_v28, %v15208_v55  ;;  %v1864_v48 = vrot.slane %v17420_v39, %v15220_v57 }
 0x1c3   : > { %v2366_v16 = vrot.slane %v17365_v41, %v15208_v55  ;;  %v2508_v13 = vadd.f32 %v2492_v8, %v2247_v54  ;;  %vm1387_vm11 = vcmp.eq.s32.totalorder %v17349_v9, 1  ;;  %v17462_v59 = vand.u32 4294901760, %v2730_v45 }
 0x1c4   : > { %v455_v12 = vsel %vm17433_vm4, 1, %v19388_v47  ;;  %v14510_v60 = vrot.slane %v17440_v3, 9  ;;  %v17470_v28 = vrot.slane %v1054_v18, %v15220_v57  ;;  %v17473_v63 = vrot.slane %v757_v56, %v15220_v57  ;;  %v17491_v56 = vpop.permute.xlu1 %1527 }
 0x1c5   : > { %v17476_v8 = vrot.slane %v1299_v33, %v19658_v22  ;;  %v1303_v41 = vrot.slane %v17070_v42, %v19641_v49  ;;  %v17481_v54 = vadd.f32 %v19725_v51, %v2508_v13  ;;  %v17484_v1 = vrot.slane %v2105_v36, %v15220_v57 }
 0x1c6   : > { %19747 = vst [vmem:[#allocation42_spill] sm:$0xff] %v17473_v63  ;;  %v17487_v3 = vrot.slane %v1603_v10, %v19658_v22  ;;  %v2109_v18 = vrot.slane %v17133_v35, %v15220_v57  ;;  %v17493_v63 = vpop.permute.xlu0 %2031  ;;  %v17497_v33 = vrot.slane %v1058_v19, %v15220_v57  ;;  %v17500_v13 = vrot.slane %v1864_v48, %v15220_v57  ;;  %v19804_v19 = vld [vmem:[#allocation38_spill] sm:$0xff] }
 0x1c7   : > { %19748 = vst [vmem:[#allocation41_spill] sm:$0xff] %v17481_v54  ;;  %v515_v36 = vrot.slane %v455_v12, %v15220_v57  ;;  %v1607_v10 = vrot.slane %v17133_v35, %v19641_v49  ;;  %vm19751_vm6 = vcmp.lt.s32.totalorder %v15251_v7, 16  ;;  %v17511_v51 = vrot.slane %v2366_v16, %v15220_v57 }
 0x1c8   : > { %19749 = vst [vmem:[#allocation51_spill] sm:$0xff] %v17487_v3  ;;  %19750 = vst [vmem:[#allocation64_spill] sm:$0xff] %v17500_v13  ;;  %v690_v42 = vsel %vm19751_vm6, %v17076_v24, %v17244_v46  ;;  %v4728_v3 = vsub.f32 %v2730_v45, %v17462_v59  ;;  %vm17513_vm4 = vcmp.ne.s32.totalorder %v14510_v60, 0  ;;  %vm19754_vm13 = vcmp.lt.s32.totalorder %v15251_v7, 17 }
 0x1c9   : > { %v388_v48 = vsel %vm19754_vm13, %v17030_v34, %v17219_v11  ;;  %vm19755_vm8 = vcmp.lt.s32.totalorder %v15251_v7, 127  ;;  %vm19756_vm6 = vcmask 1043456   ;;  %v17528_v45 = vrot.slane %v1303_v41, %v19658_v22  ;;  %vm17560_vm13 = vmand %vm407_vm3, %vm17513_vm4 }
 0x1ca   : > { %v1540_v13 = vsel %vm19755_vm8, %v17119_v15, %v17284_v2  ;;  %v2733_v24 = vsel %vm19756_vm6, %v17481_v54, 0  ;;  %vm19758_vm0 = vcmp.lt.s32.totalorder %v15251_v7, 15  ;;  %v519_v34 = vrot.slane %v455_v12, %v15208_v55  ;;  %v17546_v54 = vpop.permute.xlu1 %1772 }
 0x1cb   : > { %19757 = vst [vmem:[#allocation65_spill] sm:$0xff] %v17528_v45  ;;  %v935_v16 = vsel %vm19758_vm0, %v17183_v31, %v17341_v37  ;;  %v17534_v60 = vand.u32 4294901760, %v2733_v24  ;;  %v17538_v11 = vrot.slane %v2109_v18, %v15220_v57  ;;  %v857_v15 = vsel %vm841_vm2, %v690_v42, 0.0  ;;  %v17548_v45 = vpop.permute.xlu0 %922 }
 0x1cc   : > { %v1785_v41 = vsel %vm19332_vm14, %v17181_v23, %v17343_v53  ;;  %v17551_v31 = vrot.slane %v515_v36, %v15220_v57  ;;  %v17554_v12 = vrot.slane %v1607_v10, %v19658_v22  ;;  %v611_v23 = vsel %vm595_vm5, %v388_v48, 0.0 }
 0x1cd   : > { %19759 = vst [vmem:[#allocation66_spill] sm:$0xff] %v17538_v11  ;;  %v1706_v38 = vsel %vm1690_vm7, %v1540_v13, 0.0  ;;  %vm19763_vm2 = vcmp.lt.s32.totalorder %v15251_v7, 1  ;;  %vm1691_vm0 = vcmp.eq.s32.totalorder %v17360_v44, 1  ;;  %4644 = vmatprep.subr.mxu0 %v17534_v60  ;;  %v4729_v36 = vand.u32 4294901760, %v4728_v3 }
 0x1ce   : > { %19760 = vst [vmem:[#allocation67_spill] sm:$0xff] %v17551_v31  ;;  %v1236_v18 = vsel %vm19763_vm2, %v17246_v40, %v17449_v43  ;;  %v1158_v10 = vsel %vm1142_vm10, %v935_v16, 0.0  ;;  %v2046_v29 = vsel %vm2041_vm9, %v17282_v27, %v17493_v63  ;;  %4646 = vmatpush1.msra.mxu0 %v17462_v59  ;;  %v4722_v5 = vsub.f32 %v2733_v24, %v17534_v60  ;;  %v17599_v6 = vpop.permute.xlu1 %375  ;;  %v19770_v31 = vld [vmem:[#allocation49_spill] sm:$0xff] }
 0x1cf   : > { %v1868_v40 = vrot.slane %v17420_v39, %v15208_v55  ;;  %v877_v13 = vmul.f32 %v19622_v52, %v857_v15  ;;  %v1967_v48 = vsel %vm1951_vm15, %v1785_v41, 0.0  ;;  %vm1952_vm3 = vcmp.eq.s32.totalorder %v17399_v32, 1  ;;  %4685 = vmatmul.mubr.f32.vlgmr.msra.gmra.mxu0 %v19624_v50  ;;  %v17601_v41 = vpop.permute.xlu0 %2276 }
 0x1d0   : > { %v17590_v4 = vrot.slane %v519_v34, %v15220_v57  ;;  %v1002_v27 = vsel %vm17560_vm13, 1, %v19388_v47  ;;  %v632_v24 = vmul.f32 %v19461_v26, %v611_v23  ;;  %v1726_v39 = vmul.f32 %v19428_v25, %v1706_v38  ;;  %4805 = vmatprep.subr.mxu0 %v4722_v5  ;;  %4841 = vmatprep.mubr.f32.mxu0 %v19480_v62 }
 0x1d1   : > { %v1403_v16 = vsel %vm1387_vm11, %v1236_v18, 0.0  ;;  %v4723_v15 = vand.u32 4294901760, %v4722_v5  ;;  %v1178_v34 = vmul.f32 %v15102_v21, %v1158_v10  ;;  %vm19765_vm5 = vcmp.eq.s32.totalorder %v17374_v30, 1  ;;  %4808 = vmatpush1.msra.mxu0 %v4728_v3 }
 0x1d2   : > { %19764 = vst [vmem:[#allocation68_spill] sm:$0xff] %v17590_v4  ;;  %v2212_v42 = vsel %vm19765_vm5, %v2046_v29, 0.0  ;;  %vm19766_vm7 = vcmp.lt.s32.totalorder %v15251_v7, 111  ;;  %v4730_v23 = vsub.f32 %v4728_v3, %v4729_v36  ;;  %vm2197_vm10 = vcmp.eq.s32.totalorder %v17484_v1, 1  ;;  %v19771_v4 = vld [vmem:[#allocation43_spill] sm:$0xff] }
 0x1d3   : > { %v2291_v9 = vsel %vm19766_vm7, %v17394_v0, %v17601_v41  ;;  %v1987_v38 = vmul.f32 %v19558_v14, %v1967_v48  ;;  %4959 = vmatprep.subr.mxu0 %v4723_v15  ;;  %v4724_v18 = vsub.f32 %v4722_v5, %v4723_v15  ;;  %v17614_v50 = vrot.slane %v1868_v40, %v15220_v57  ;;  %v19769_v0 = vld [vmem:[#allocation50_spill] sm:$0xff]  ;;  %v19772_v5 = vld [vmem:[#allocation28_spill] sm:$0xff]  ;;  %v17626_v15 = vpop.permute.xlu1 %679 }
 0x1d4   : > { %v761_v30 = vrot.slane %v17295_v20, %v15220_v57  ;;  %v893_v10 = vadd.f32 %v877_v13, %v632_v24  ;;  %v1423_v29 = vmul.f32 %v19559_v61, %v1403_v16  ;;  %vm19768_vm15 = vcmp.eq.s32.totalorder %v17454_v17, 1  ;;  %4844 = vmatmul.mubr.f32.vlgmr.msra.gmra.mxu0 %v19769_v0  ;;  %v17628_v13 = vpop.permute.xlu0 %1223  ;;  %v19773_v16 = vld [vmem:[#allocation60_spill] sm:$0xff]  ;;  %v19778_v61 = vld [vmem:[#allocation29_spill] sm:$0xff]  ;;  %v19783_v0 = vld [vmem:[#allocation42_spill] sm:$0xff] }
 0x1d5   : > { %19767 = vst [vmem:[#allocation69_spill] sm:$0xff] %v17614_v50  ;;  %v2473_v11 = vsel %vm19768_vm15, %v2291_v9, 0.0  ;;  %v1062_v3 = vrot.slane %v1002_v27, %v15220_v57  ;;  %v1742_v48 = vadd.f32 %v1726_v39, %v19770_v31  ;;  %vm842_vm11 = vcmp.eq.s32.totalorder %v19771_v4, 1  ;;  %4963 = vmatpush1.msra.mxu0 %v4729_v36  ;;  %4996 = vmatprep.mubr.f32.mxu0 %v19480_v62  ;;  %v19775_v9 = vld [vmem:[#allocation44_spill] sm:$0xff] }
 0x1d6   : > { %v2232_v40 = vmul.f32 %v19772_v5, %v2212_v42  ;;  %v4725_v50 = vand.u32 4294901760, %v4724_v18  ;;  %v1066_v24 = vrot.slane %v1002_v27, %v15208_v55  ;;  %v1194_v17 = vadd.f32 %v1178_v34, %v893_v10  ;;  %v19776_v34 = vld [vmem:[#allocation32_spill] sm:$0xff] }
 0x1d7   : > { %vm596_vm8 = vcmp.eq.s32.totalorder %v19773_v16, 1  ;;  %vm19774_vm6 = vcmp.lt.s32.totalorder %v15251_v7, 127  ;;  %v4731_v39 = vand.u32 4294901760, %v4730_v23  ;;  %v765_v36 = vrot.slane %v17295_v20, %v15208_v55 }
 0x1d8   : > { %v1539_v31 = vsel %vm19774_vm6, %v17284_v2, %v17491_v56  ;;  %v2003_v42 = vadd.f32 %v1987_v38, %v1742_v48  ;;  %vm1143_vm13 = vcmp.eq.s32.totalorder %v17470_v28, 1  ;;  %v2493_v18 = vmul.f32 %v19775_v9, %v2473_v11  ;;  %4726 = vmatprep.subr.mxu1 %v4725_v50  ;;  %v19782_v11 = vld [vmem:[#allocation46_spill] sm:$0xff] }
 0x1d9   : > { %v17642_v27 = vrot.slane %v761_v30, %v15220_v57  ;;  %v1611_v10 = vrot.slane %v19776_v34, %v19658_v22  ;;  %vm19779_vm2 = vcmp.lt.s32.totalorder %v19778_v61, 15  ;;  %v1439_v23 = vadd.f32 %v1423_v29, %v1194_v17  ;;  %4732 = vmatpush1.msra.mxu1 %v4731_v39  ;;  %4998 = vmatmul.mubr.f32.vlgmr.msra.gmra.mxu0 %v19782_v11  ;;  %v17667_v29 = vpop.permute.xlu1 %2033  ;;  %v19786_v39 = vld [vmem:[#allocation63_spill] sm:$0xff] }
 0x1da   : > { %vm17650_vm5 = vmand %vm19779_vm2, %vm17288_vm1  ;;  %v1784_v50 = vsel %vm19332_vm14, %v17343_v53, %v17546_v54  ;;  %vm2458_vm7 = vcmp.eq.s32.totalorder %v17511_v51, 1  ;;  %v1615_v38 = vrot.slane %v19776_v34, %v19641_v49  ;;  %v1707_v61 = vsel %vm1691_vm0, %v1539_v31, 0.0  ;;  %4767 = vmatmul.mubr.f32.vlgmr.msra.gmra.mxu1 %v19782_v11  ;;  %4881 = vmatprep.subr.mxu1 %v17534_v60  ;;  %19784 = vst [vmem:[#allocation49_spill] sm:$0xff] %v17667_v29  ;;  %v17669_v53 = vpop.permute.xlu0 %1529 }
 0x1db   : > { %v2248_v30 = vadd.f32 %v2232_v40, %v2003_v42  ;;  %vm843_vm1 = vcmp.eq.s32.totalorder %v19783_v0, 1  ;;  %v17672_v48 = vrot.slane %v1062_v3, %v15220_v57  ;;  %v17675_v17 = vrot.slane %v1066_v24, %v15220_v57  ;;  %4883 = vmatpush1.msra.mxu1 %v17462_v59  ;;  %4916 = vmatprep.mubr.f32.mxu1 %v19480_v62 }
 0x1dc   : > { %vm1388_vm15 = vcmp.eq.s32.totalorder %v17476_v8, 1  ;;  %v2045_v44 = vsel %vm2041_vm9, %v17493_v63, %v17667_v29  ;;  %v2113_v40 = vrot.slane %v17133_v35, %v15208_v55  ;;  %v2117_v31 = vrot.slane %v19776_v34, %v15220_v57  ;;  %5035 = vmatprep.subr.mxu1 %v17534_v60  ;;  %v19787_v29 = vld [vmem:[#allocation47_spill] sm:$0xff]  ;;  %5144 = vmatprep.mubr.f32.mxu0 %v19480_v62 }
 0x1dd   : > { %19785 = vst [vmem:[#allocation43_spill] sm:$0xff] %v17675_v17  ;;  %v2317_v3 = vsel %vm17650_vm5, 1, %v19388_v47  ;;  %v1968_v24 = vsel %vm1952_vm3, %v1784_v50, 0.0  ;;  %vm597_vm0 = vcmp.eq.s32.totalorder %v19786_v39, 1  ;;  %v2509_v42 = vadd.f32 %v2493_v18, %v2248_v30 }
 0x1de   : > { %v17696_v63 = vrot.slane %v765_v36, %v15220_v57  ;;  %v2121_v35 = vrot.slane %v19776_v34, %v15208_v55  ;;  %v19788_v2 = vcombine.high %v19787_v29, %v19787_v29  ;;  %v1727_v32 = vmul.f32 %v19428_v25, %v1707_v61  ;;  %v19797_v61 = vld [vmem:[#allocation54_spill] sm:$0xff]  ;;  %v17729_v30 = vpop.permute.xlu0 %1774 }
 0x1df   : > { %vm1144_vm3 = vcmp.eq.s32.totalorder %v17497_v33, 1  ;;  %v17707_v60 = vrot.slane %v1611_v10, %v19658_v22  ;;  %v17710_v18 = vrot.slane %v1615_v38, %v19658_v22  ;;  %vm19792_vm6 = vcmp.lt.s32.totalorder %v17234_v58, 15  ;;  %4920 = vmatmul.mubr.f32.vlgmr.msra.gmra.mxu1 %v19797_v61  ;;  %v17727_v38 = vpop.permute.xlu1 %924  ;;  %v19799_v36 = vld [vmem:[#allocation62_spill] sm:$0xff]  ;;  %v19802_v61 = vld [vmem:[#allocation65_spill] sm:$0xff] }
 0x1e0   : > { %v1498_v17 = vadd.f32 %v19788_v2, %v1439_v23  ;;  %vm17716_vm2 = vmand %vm19792_vm6, %vm17389_vm12  ;;  %v19795_v23 = vld [vmem:[#allocation40_spill] sm:$0xff]  ;;  %vm19796_vm5 = vcmp.lt.s32.totalorder %v15251_v7, 16  ;;  %v2213_v10 = vsel %vm2197_vm10, %v2045_v44, 0.0  ;;  %v2370_v29 = vrot.slane %v2317_v3, %v15220_v57  ;;  %5037 = vmatpush1.msra.mxu1 %v17462_v59  ;;  %5070 = vmatprep.mubr.f32.mxu1 %v19480_v62 }
 0x1e1   : > { %19789 = vst [vmem:[#allocation28_spill] sm:$0xff] %v17707_v60  ;;  %19790 = vst [vmem:[#allocation60_spill] sm:$0xff] %v17710_v18  ;;  %v689_v50 = vsel %vm19796_vm5, %v17244_v46, %v19795_v23  ;;  %v2374_v2 = vrot.slane %v2317_v3, %v15208_v55  ;;  %v19800_v46 = vld [vmem:[#allocation53_spill] sm:$0xff]  ;;  %vm19801_vm5 = vcmp.lt.s32.totalorder %v15251_v7, 17  ;;  %v1988_v44 = vmul.f32 %v19558_v14, %v1968_v24 }
 0x1e2   : > { %vm19798_vm12 = vmmov %vm19792_vm6  ;;  %v387_v1 = vsel %vm19801_vm5, %v19800_v46, %v19799_v36  ;;  %vm1389_vm10 = vcmp.eq.s32.totalorder %v19802_v61, 1  ;;  %v17745_v18 = vrot.slane %v2113_v40, %v15220_v57  ;;  %v17748_v3 = vrot.slane %v2117_v31, %v15220_v57 }
 0x1e3   : > { %vm2310_vm6 = vmand %vm19798_vm12, %vm17513_vm4  ;;  %vm19803_vm4 = vcmp.lt.s32.totalorder %v15251_v7, 15  ;;  %v17755_v60 = vadd.f32 %v19804_v19, %v2509_v42  ;;  %v17759_v59 = vrot.slane %v2121_v35, %v15220_v57  ;;  %v17764_v40 = vsel %vm17716_vm2, 1, %v19388_v47  ;;  %v17778_v34 = vpop.permute.xlu1 %2278  ;;  %5072 = vmatmul.mubr.f32.vlgmr.msra.gmra.mxu1 %v19782_v11 }
 0x1e4   : > { %v934_v58 = vsel %vm19803_vm4, %v17341_v37, %v17548_v45  ;;  %v858_v31 = vsel %vm842_vm11, %v689_v50, 0.0  ;;  %v1743_v24 = vadd.f32 %v1727_v32, %v1498_v17  ;;  %v2233_v46 = vmul.f32 %v19772_v5, %v2213_v10  ;;  %v19809_v50 = vld [vmem:[#allocation51_spill] sm:$0xff]  ;;  %5230 = vmatprep.mubr.f32.mxu1 %v19480_v62 }
 0x1e5   : > { %19805 = vst [vmem:[#allocation44_spill] sm:$0xff] %v17755_v60  ;;  %19806 = vst [vmem:[#allocation32_spill] sm:$0xff] %v17759_v59  ;;  %v17770_v37 = vsel %vm2310_vm6, 1, %v19388_v47  ;;  %v612_v42 = vsel %vm596_vm8, %v387_v1, 0.0  ;;  %vm19807_vm12 = vcmp.lt.s32.totalorder %v15251_v7, 16  ;;  %v17780_v59 = vpop.permute.xlu0 %377  ;;  %v17784_v4 = vrot.slane %v2370_v29, %v15220_v57 }
 0x1e6   : > { %v688_v35 = vsel %vm19807_vm12, %v19795_v23, %v17626_v15  ;;  %v17787_v17 = vrot.slane %v2374_v2, %v15220_v57  ;;  %v2004_v32 = vadd.f32 %v1988_v44, %v1743_v24  ;;  %v1159_v16 = vsel %vm1143_vm13, %v934_v58, 0.0  ;;  %vm19811_vm13 = vmmov %vm19801_vm5  ;;  %v19814_v58 = vld [vmem:[#allocation64_spill] sm:$0xff] }
 0x1e7   : > { %vm19808_vm11 = vcmp.lt.s32.totalorder %v15251_v7, 1  ;;  %vm1692_vm8 = vcmp.eq.s32.totalorder %v19809_v50, 1  ;;  %vm19810_vm2 = vcmp.lt.s32.totalorder %v15251_v7, 111  ;;  %v878_v29 = vmul.f32 %v19622_v52, %v858_v31  ;;  %vm19813_vm5 = vmmov %vm19803_vm4 }
 0x1e8   : > { %v1235_v23 = vsel %vm19808_vm11, %v17449_v43, %v17628_v13  ;;  %v2290_v10 = vsel %vm19810_vm2, %v17601_v41, %v17778_v34  ;;  %v386_v28 = vsel %vm19811_vm13, %v19799_v36, %v17599_v6  ;;  %vm19812_vm6 = vcmask 1043456  }
 0x1e9   : > { %v2474_v2 = vsel %vm2458_vm7, %v2290_v10, 0.0  ;;  %v2736_v43 = vsel %vm19812_vm6, %v17755_v60, 0  ;;  %v859_v1 = vsel %vm843_vm1, %v688_v35, 0.0  ;;  %v2249_v44 = vadd.f32 %v2233_v46, %v2004_v32  ;;  %v17822_v10 = vpop.permute.xlu0 %2035  ;;  %v17828_v35 = vpop.permute.xlu1 %1225  ;;  %vm19815_vm7 = vmmov %vm19808_vm11  ;;  %v19824_v60 = vld [vmem:[#allocation12_spill] sm:$0xff] }
 0x1ea   : > { %v933_v41 = vsel %vm19813_vm5, %v17548_v45, %v17727_v38  ;;  %vm1953_vm4 = vcmp.eq.s32.totalorder %v19814_v58, 1  ;;  %v2494_v31 = vmul.f32 %v19775_v9, %v2474_v2  ;;  %v633_v36 = vmul.f32 %v19461_v26, %v612_v42  ;;  %vm19821_vm12 = vmmov %vm19812_vm6 }
 0x1eb   : > { %v1179_v51 = vmul.f32 %v15102_v21, %v1159_v16  ;;  %v1404_v24 = vsel %vm1388_vm15, %v1235_v23, 0.0  ;;  %v1307_v0 = vrot.slane %v17295_v20, %v19658_v22  ;;  %v613_v46 = vsel %vm597_vm0, %v386_v28, 0.0  ;;  %v19816_v28 = vld [vmem:[#allocation20_spill] sm:$0xff] }
 0x1ec   : > { %v2510_v45 = vadd.f32 %v2494_v31, %v2249_v44  ;;  %v17830_v32 = vand.u32 4294901760, %v2736_v43  ;;  %v1311_v42 = vrot.slane %v17295_v20, %v19641_v49  ;;  %v894_v16 = vadd.f32 %v878_v29, %v633_v36  ;;  %v19819_v31 = vld [vmem:[#allocation69_spill] sm:$0xff] }
 0x1ed   : > { %v879_v8 = vmul.f32 %v19622_v52, %v859_v1  ;;  %v1160_v23 = vsel %vm1144_vm3, %v933_v41, 0.0  ;;  %v1234_v39 = vsel %vm19815_vm7, %v17628_v13, %v17828_v35  ;;  %vm1693_vm1 = vcmp.eq.s32.totalorder %v17554_v12, 1  ;;  %v19818_v41 = vld [vmem:[#allocation68_spill] sm:$0xff] }
 0x1ee   : > { %v1424_v2 = vmul.f32 %v19816_v28, %v1404_v24  ;;  %v17844_v44 = vadd.f32 %v19804_v19, %v2510_v45  ;;  %v1872_v49 = vrot.slane %v17764_v40, %v15220_v57  ;;  %v1876_v29 = vrot.slane %v17764_v40, %v15208_v55 }
 0x1ef   : > { %v1195_v33 = vadd.f32 %v1179_v51, %v894_v16  ;;  %v634_v1 = vmul.f32 %v19461_v26, %v613_v46  ;;  %vm599_vm15 = vcmp.eq.s32.totalorder %v19818_v41, 1  ;;  %v1405_v13 = vsel %vm1389_vm10, %v1234_v39, 0.0  ;;  %v17862_v51 = vpop.permute.xlu1 %1531  ;;  %v19822_v16 = vld [vmem:[#allocation67_spill] sm:$0xff]  ;;  %v19823_v39 = vld [vmem:[#allocation66_spill] sm:$0xff] }
 0x1f0   : > { %19817 = vst [vmem:[#allocation30_spill] sm:$0xff] %v17844_v44  ;;  %vm1954_vm0 = vcmp.eq.s32.totalorder %v19819_v31, 1  ;;  %v2378_v36 = vrot.slane %v17770_v37, %v15220_v57  ;;  %vm19820_vm3 = vcmp.lt.s32.totalorder %v15251_v7, 127  ;;  %v1180_v40 = vmul.f32 %v15102_v21, %v1160_v23 }
 0x1f1   : > { %v1538_v24 = vsel %vm19820_vm3, %v17491_v56, %v17669_v53  ;;  %v2739_v46 = vsel %vm19821_vm12, %v17844_v44, 0  ;;  %v17867_v61 = vsub.f32 %v2736_v43, %v17830_v32  ;;  %vm844_vm10 = vcmp.eq.s32.totalorder %v17642_v27, 1  ;;  %v17873_v56 = vpop.permute.xlu0 %926  ;;  %v19825_v43 = vld [vmem:[#allocation21_spill] sm:$0xff] }
 0x1f2   : > { %vm845_vm11 = vcmp.eq.s32.totalorder %v17696_v63, 1  ;;  %v895_v45 = vadd.f32 %v879_v8, %v634_v1  ;;  %vm598_vm2 = vcmp.eq.s32.totalorder %v19822_v16, 1  ;;  %vm2198_vm13 = vcmp.eq.s32.totalorder %v19823_v39, 1  ;;  %v19844_v39 = vld [vmem:[#allocation19_spill] sm:$0xff] }
 0x1f3   : > { %v17876_v23 = vrot.slane %v1307_v0, %v19658_v22  ;;  %v2382_v47 = vrot.slane %v17770_v37, %v15208_v55  ;;  %v2544_v20 = vrot.slane %v19825_v43, %v19824_v60  ;;  %v1440_v44 = vadd.f32 %v1424_v2, %v1195_v33  ;;  %v19831_v60 = vld [vmem:[#allocation24_spill] sm:$0xff]  ;;  %v19836_v43 = vld [vmem:[#allocation17_spill] sm:$0xff] }
 0x1f4   : > { %v1783_v8 = vsel %vm19332_vm14, %v17546_v54, %v17729_v30  ;;  %v1425_v1 = vmul.f32 %v19816_v28, %v1405_v13  ;;  %v17887_v19 = vand.u32 4294901760, %v2739_v46  ;;  %v1708_v0 = vsel %vm1692_vm8, %v1538_v24, 0.0  ;;  %v17901_v54 = vpop.permute.xlu1 %1776  ;;  %vm19826_vm8 = vmmov %vm19820_vm3  ;;  %v19832_v28 = vld [vmem:[#allocation18_spill] sm:$0xff] }
 0x1f5   : > { %vm2199_vm6 = vcmp.eq.s32.totalorder %v17745_v18, 1  ;;  %v17893_v55 = vrot.slane %v1311_v42, %v19658_v22  ;;  %v17896_v37 = vrot.slane %v1872_v49, %v15220_v57  ;;  %v17899_v2 = vrot.slane %v1876_v29, %v15220_v57  ;;  %v19827_v29 = vld [vmem:[#allocation13_spill] sm:$0xff] }
 0x1f6   : > { %v1196_v33 = vadd.f32 %v1180_v40, %v895_v45  ;;  %5109 = vmatprep.subr.mxu0 %v17887_v19  ;;  %v5187_v13 = vsub.f32 %v2739_v46, %v17887_v19  ;;  %v5194_v50 = vand.u32 4294901760, %v17867_v61  ;;  %v17907_v24 = vrot.slane %v2378_v36, %v15220_v57  ;;  %v19829_v36 = vld [vmem:[#allocation16_spill] sm:$0xff] }
 0x1f7   : > { %v1969_v22 = vsel %vm1953_vm4, %v1783_v8, 0.0  ;;  %v1537_v42 = vsel %vm19826_vm8, %v17669_v53, %v17862_v51  ;;  %vm1145_vm5 = vcmp.eq.s32.totalorder %v17672_v48, 1  ;;  %5111 = vmatpush1.msra.mxu0 %v17830_v32  ;;  %v17918_v49 = vrot.slane %v2382_v47, %v15220_v57  ;;  %v19830_v8 = vld [vmem:[#allocation43_spill] sm:$0xff] }
 0x1f8   : > { %v17921_v40 = vrot.slane %v2544_v20, %v19827_v29  ;;  %v1499_v46 = vadd.f32 %v19829_v36, %v1440_v44  ;;  %v1728_v58 = vmul.f32 %v19428_v25, %v1708_v0  ;;  %v1441_v45 = vadd.f32 %v1425_v1, %v1196_v33  ;;  %5150 = vmatmul.mubr.f32.vlgmr.msra.gmra.mxu0 %v19831_v60  ;;  %v17935_v20 = vpop.permute.xlu0 %2282  ;;  %v682_v0 = vpop.permute.xlu1 %681  ;;  %v19835_v60 = vld [vmem:[#allocation49_spill] sm:$0xff] }
 0x1f9   : > { %vm1146_vm4 = vcmp.eq.s32.totalorder %v19830_v8, 1  ;;  %5270 = vmatprep.subr.mxu0 %v5187_v13  ;;  %v5188_v53 = vand.u32 4294901760, %v5187_v13  ;;  %vm19833_vm7 = vcmp.lt.s32.totalorder %v15251_v7, 17  ;;  %v1782_v57 = vsel %vm19332_vm14, %v17729_v30, %v17901_v54  ;;  %5306 = vmatprep.mubr.f32.mxu0 %v19480_v62 }
 0x1fa   : > { %19828 = vst [vmem:[#allocation29_spill] sm:$0xff] %v17921_v40  ;;  %v384_v47 = vsel %vm19833_vm7, %v17780_v59, %v19832_v28  ;;  %5273 = vmatpush1.msra.mxu0 %v17867_v61  ;;  %vm2459_vm3 = vcmp.eq.s32.totalorder %v17784_v4, 1  ;;  %v1989_v28 = vmul.f32 %v19558_v14, %v1969_v22  ;;  %v1709_v1 = vsel %vm1693_vm1, %v1537_v42, 0.0  ;;  %vm19834_vm8 = vmmov %vm19833_vm7  ;;  %v19839_v22 = vld [vmem:[#allocation28_spill] sm:$0xff] }
 0x1fb   : > { %5424 = vmatprep.subr.mxu0 %v5188_v53  ;;  %v5189_v30 = vsub.f32 %v5187_v13, %v5188_v53  ;;  %v5195_v33 = vsub.f32 %v17867_v61, %v5194_v50  ;;  %v385_v40 = vsel %vm19834_vm8, %v17599_v6, %v17780_v59  ;;  %v2044_v44 = vsel %vm2041_vm9, %v19835_v60, %v17822_v10  ;;  %v19840_v61 = vld [vmem:[#allocation60_spill] sm:$0xff] }
 0x1fc   : > { %vm19837_vm7 = vcmp.lt.s32.totalorder %v15251_v7, 16  ;;  %vm1694_vm14 = vcmp.eq.s32.totalorder %v19839_v22, 1  ;;  %vm1695_vm12 = vcmp.eq.s32.totalorder %v19840_v61, 1  ;;  %v1744_v42 = vadd.f32 %v1728_v58, %v1499_v46  ;;  %v17983_v27 = vpop.permute.xlu1 %2037 }
 0x1fd   : > { %v686_v12 = vsel %vm19837_vm7, %v682_v0, %v19836_v43  ;;  %vm19838_vm1 = vmmov %vm19837_vm7  ;;  %v615_v6 = vsel %vm599_vm15, %v384_v47, 0.0  ;;  %v19841_v59 = vcombine.high %v19829_v36, %v19829_v36  ;;  %v1970_v53 = vsel %vm1954_vm0, %v1782_v57, 0.0  ;;  %v19842_v43 = vld [vmem:[#allocation50_spill] sm:$0xff]  ;;  %v1534_v57 = vpop.permute.xlu0 %1533 }
 0x1fe   : > { %v687_v13 = vsel %vm19838_vm1, %v17626_v15, %v682_v0  ;;  %5309 = vmatmul.mubr.f32.vlgmr.msra.gmra.mxu0 %v19842_v43  ;;  %v1729_v29 = vmul.f32 %v19428_v25, %v1709_v1  ;;  %v861_v46 = vsel %vm845_vm11, %v686_v12, 0.0  ;;  %v5190_v41 = vand.u32 4294901760, %v5189_v30 }
 0x1ff   : > { %v1500_v60 = vadd.f32 %v19841_v59, %v1441_v45  ;;  %v860_v15 = vsel %vm844_vm10, %v687_v13, 0.0  ;;  %5428 = vmatpush1.msra.mxu0 %v5194_v50  ;;  %vm1390_vm15 = vcmp.eq.s32.totalorder %v17876_v23, 1  ;;  %vm1391_vm8 = vcmp.eq.s32.totalorder %v17893_v55, 1  ;;  %5461 = vmatprep.mubr.f32.mxu0 %v19480_v62 }
 0x200   : > { %v2005_v31 = vadd.f32 %v1989_v28, %v1744_v42  ;;  %v614_v36 = vsel %vm598_vm2, %v385_v40, 0.0  ;;  %v2214_v58 = vsel %vm2198_vm13, %v2044_v44, 0.0  ;;  %v5196_v45 = vand.u32 4294901760, %v5195_v33  ;;  %5191 = vmatprep.subr.mxu1 %v5190_v41  ;;  %v19849_v33 = vld [vmem:[#allocation32_spill] sm:$0xff]  ;;  %v2281_v12 = vpop.permute.xlu1 %2280  ;;  %v19853_v41 = vld [vmem:[#allocation54_spill] sm:$0xff] }
 0x201   : > { %v636_v63 = vmul.f32 %v19461_v26, %v615_v6  ;;  %vm19843_vm0 = vcmp.lt.s32.totalorder %v15251_v7, 15  ;;  %v1990_v47 = vmul.f32 %v19558_v14, %v1970_v53  ;;  %v2043_v16 = vsel %vm2041_vm9, %v17822_v10, %v17983_v27 }
 0x202   : > { %v932_v50 = vsel %vm19843_vm0, %v17727_v38, %v17873_v56  ;;  %vm19845_vm10 = vmmov %vm19843_vm0  ;;  %v880_v44 = vmul.f32 %v19622_v52, %v860_v15  ;;  %v881_v28 = vmul.f32 %v19622_v52, %v861_v46  ;;  %v2215_v38 = vsel %vm2199_vm6, %v2043_v16, 0.0  ;;  %5197 = vmatpush1.msra.mxu1 %v5196_v45  ;;  %5463 = vmatmul.mubr.f32.vlgmr.msra.gmra.mxu0 %v19782_v11 }
 0x203   : > { %v931_v40 = vsel %vm19845_vm10, %v17873_v56, %v19844_v39  ;;  %v2234_v1 = vmul.f32 %v19772_v5, %v2214_v58  ;;  %v1745_v0 = vadd.f32 %v1729_v29, %v1500_v60  ;;  %v2235_v10 = vmul.f32 %v19772_v5, %v2215_v38  ;;  %5232 = vmatmul.mubr.f32.vlgmr.msra.gmra.mxu1 %v19782_v11  ;;  %v19847_v29 = vld [vmem:[#allocation34_spill] sm:$0xff]  ;;  %v19859_v38 = vld [vmem:[#allocation48_spill] sm:$0xff] }
 0x204   : > { %5346 = vmatprep.subr.mxu1 %v17887_v19  ;;  %vm1955_vm11 = vcmp.eq.s32.totalorder %v17896_v37, 1  ;;  %vm1956_vm2 = vcmp.eq.s32.totalorder %v17899_v2, 1  ;;  %v635_v52 = vmul.f32 %v19461_v26, %v614_v36  ;;  %v1161_v18 = vsel %vm1145_vm5, %v932_v50, 0.0  ;;  %5381 = vmatprep.mubr.f32.mxu1 %v19480_v62  ;;  %v2040_v36 = vpop.permute.xlu0 %2039 }
 0x205   : > { %vm19846_vm13 = vcmp.lt.s32.totalorder %v15251_v7, 127  ;;  %vm2200_vm7 = vcmp.eq.s32.totalorder %v17748_v3, 1  ;;  %vm2201_vm1 = vcmp.eq.s32.totalorder %v19849_v33, 1  ;;  %5348 = vmatpush1.msra.mxu1 %v17830_v32  ;;  %v1162_v26 = vsel %vm1146_vm4, %v931_v40, 0.0  ;;  %5609 = vmatprep.mubr.f32.mxu0 %v19480_v62  ;;  %v19858_v40 = vld [vmem:[#allocation20_spill] sm:$0xff] }
 0x206   : > { %v1536_v56 = vsel %vm19846_vm13, %v17862_v51, %v1534_v57  ;;  %vm19848_vm6 = vmmov %vm19846_vm13  ;;  %v2006_v48 = vadd.f32 %v1990_v47, %v1745_v0  ;;  %vm19850_vm5 = vcmp.lt.s32.totalorder %v15251_v7, 111  ;;  %5500 = vmatprep.subr.mxu1 %v17887_v19  ;;  %v896_v42 = vadd.f32 %v880_v44, %v635_v52 }
 0x207   : > { %v1551_v30 = vsel %vm19848_vm6, %v1534_v57, %v19847_v29  ;;  %v2288_v51 = vsel %vm19850_vm5, %v2281_v12, %v17935_v20  ;;  %vm19851_vm0 = vmmov %vm19850_vm5  ;;  %v897_v6 = vadd.f32 %v881_v28, %v636_v63  ;;  %vm19852_vm4 = vcmp.eq.s32.totalorder %v17787_v17, 1  ;;  %5385 = vmatmul.mubr.f32.vlgmr.msra.gmra.mxu1 %v19853_v41  ;;  %v19854_v63 = vld [vmem:[#allocation27_spill] sm:$0xff]  ;;  %v19857_v57 = vld [vmem:[#allocation38_spill] sm:$0xff] }
 0x208   : > { %v2289_v13 = vsel %vm19851_vm0, %v17778_v34, %v2281_v12  ;;  %v2476_v8 = vsel %vm19852_vm4, %v2288_v51, 0.0  ;;  %v2250_v60 = vadd.f32 %v2234_v1, %v2005_v31  ;;  %v2251_v53 = vadd.f32 %v2235_v10, %v2006_v48  ;;  %5502 = vmatpush1.msra.mxu1 %v17830_v32  ;;  %v1228_v31 = vpop.permute.xlu1 %1227  ;;  %5535 = vmatprep.mubr.f32.mxu1 %v19480_v62  ;;  %v19865_v48 = vld [vmem:[#allocation33_spill] sm:$0xff] }
 0x209   : > { %v2475_v59 = vsel %vm2459_vm3, %v2289_v13, 0.0  ;;  %v2496_v46 = vmul.f32 %v19775_v9, %v2476_v8  ;;  %vm2461_vm10 = vcmp.eq.s32.totalorder %v17907_v24, 1  ;;  %vm2462_vm13 = vcmp.eq.s32.totalorder %v17918_v49, 1  ;;  %v19870_v49 = vld [vmem:[#allocation24_spill] sm:$0xff] }
 0x20a   : > { %v2495_v15 = vmul.f32 %v19775_v9, %v2475_v59  ;;  %v1181_v19 = vmul.f32 %v15102_v21, %v1161_v18  ;;  %v1182_v34 = vmul.f32 %v15102_v21, %v1162_v26  ;;  %v1710_v4 = vsel %vm1694_vm14, %v1536_v56, 0.0  ;;  %v19861_v56 = vld [vmem:[#allocation35_spill] sm:$0xff] }
 0x20b   : > { %v1711_v17 = vsel %vm1695_vm12, %v1551_v30, 0.0  ;;  %v2512_v45 = vadd.f32 %v2496_v46, %v2251_v53  ;;  %vm19855_vm3 = vcmp.lt.s32.totalorder %v15251_v7, 1  ;;  %5537 = vmatmul.mubr.f32.vlgmr.msra.gmra.mxu1 %v19782_v11  ;;  %v2042_v55 = vsel %vm2041_vm9, %v17983_v27, %v2040_v36  ;;  %v19868_v53 = vld [vmem:[#allocation37_spill] sm:$0xff] }
 0x20c   : > { %v2511_v58 = vadd.f32 %v2495_v15, %v2250_v60  ;;  %v1232_v50 = vsel %vm19855_vm3, %v1228_v31, %v19854_v63  ;;  %vm19856_vm6 = vmmov %vm19855_vm3  ;;  %v1197_v22 = vadd.f32 %v1181_v19, %v896_v42  ;;  %v1198_v47 = vadd.f32 %v1182_v34, %v897_v6  ;;  %v1779_v0 = vpop.permute.xlu1 %1778  ;;  %5695 = vmatprep.mubr.f32.mxu1 %v19480_v62  ;;  %v19872_v63 = vld [vmem:[#allocation21_spill] sm:$0xff] }
 0x20d   : > { %v1233_v21 = vsel %vm19856_vm6, %v17828_v35, %v1228_v31  ;;  %v1407_v32 = vsel %vm1391_vm8, %v1232_v50, 0.0  ;;  %v18064_v39 = vadd.f32 %v19857_v57, %v2512_v45  ;;  %v1730_v35 = vmul.f32 %v19428_v25, %v1710_v4  ;;  %vm19867_vm8 = vmmov %vm19851_vm0  ;;  %v19871_v45 = vld [vmem:[#allocation13_spill] sm:$0xff] }
 0x20e   : > { %v1406_v61 = vsel %vm1390_vm15, %v1233_v21, 0.0  ;;  %v18061_v16 = vadd.f32 %v19857_v57, %v2511_v58  ;;  %v1427_v28 = vmul.f32 %v19858_v40, %v1407_v32  ;;  %v1731_v23 = vmul.f32 %v19428_v25, %v1711_v17 }
 0x20f   : > { %v1426_v44 = vmul.f32 %v19858_v40, %v1406_v61  ;;  %v2057_v1 = vsel %vm2041_vm9, %v2040_v36, %v19859_v38  ;;  %vm19860_vm14 = vcmp.lt.s32.totalorder %v15251_v7, 113  ;;  %vm19863_vm9 = vcmask 1043456   ;;  %v2697_v7 = vld [vmem:[%s19101_s3] sm:$0xf] }
 0x210   : > { %v1443_v52 = vadd.f32 %v1427_v28, %v1198_v47  ;;  %v1781_v18 = vsel %vm19860_vm14, %v17901_v54, %v1779_v0  ;;  %vm19862_vm12 = vmmov %vm19860_vm14  ;;  %v2745_v30 = vsel %vm19863_vm9, %v18064_v39, 0  ;;  %v2216_v26 = vsel %vm2200_vm7, %v2042_v55, 0.0  ;;  %v2285_v6 = vpop.permute.xlu1 %2284 }
 0x211   : > { %v1442_v10 = vadd.f32 %v1426_v44, %v1197_v22  ;;  %v1796_v25 = vsel %vm19862_vm12, %v1779_v0, %v19861_v56  ;;  %v1971_v27 = vsel %vm1955_vm11, %v1781_v18, 0.0  ;;  %vm19864_vm15 = vmmov %vm19863_vm9  ;;  %v2217_v54 = vsel %vm2201_vm1, %v2057_v1, 0.0  ;;  %v19877_v0 = vld [vmem:[#allocation29_spill] sm:$0xff] }
 0x212   : > { %v1972_v29 = vsel %vm1956_vm2, %v1796_v25, 0.0  ;;  %v2742_v12 = vsel %vm19864_vm15, %v18061_v16, 0  ;;  %v19866_v37 = vcombine.high %v19865_v48, %v19865_v48  ;;  %v1991_v2 = vmul.f32 %v19558_v14, %v1971_v27  ;;  %vm19869_vm11 = vmmov %vm19851_vm0 }
 0x213   : > { %v1501_v51 = vadd.f32 %v19865_v48, %v1442_v10  ;;  %v1992_v42 = vmul.f32 %v19558_v14, %v1972_v29  ;;  %v18102_v59 = vand.u32 4294901760, %v2745_v30  ;;  %v18104_v8 = vand.u32 4294901760, %v2742_v12  ;;  %vm19878_vm5 = vmmov %vm19863_vm9  ;;  %v2826_v29 = vpop.f32.mrf.mxu0 }
 0x214   : > { %v1502_v13 = vadd.f32 %v19866_v37, %v1443_v52  ;;  %v2287_v33 = vsel %vm19867_vm8, %v17935_v20, %v2285_v6  ;;  %v2302_v15 = vsel %vm19869_vm11, %v2285_v6, %v19868_v53  ;;  %v2236_v4 = vmul.f32 %v19772_v5, %v2216_v26  ;;  %vm19879_vm0 = vmmov %vm19878_vm5 }
 0x215   : > { %v1746_v3 = vadd.f32 %v1730_v35, %v1501_v51  ;;  %v2477_v46 = vsel %vm2461_vm10, %v2287_v33, 0.0  ;;  %v2478_v14 = vsel %vm2462_vm13, %v2302_v15, 0.0  ;;  %5574 = vmatprep.subr.mxu0 %v18102_v59  ;;  %v5652_v19 = vsub.f32 %v2745_v30, %v18102_v59  ;;  %v19875_v35 = vld [vmem:[#allocation12_spill] sm:$0xff]  ;;  %vm19880_vm4 = vmmov %vm19879_vm0 }
 0x216   : > { %v1747_v60 = vadd.f32 %v1731_v23, %v1502_v13  ;;  %v5658_v34 = vsub.f32 %v2742_v12, %v18104_v8  ;;  %v2237_v20 = vmul.f32 %v19772_v5, %v2217_v54  ;;  %5576 = vmatpush1.msra.mxu0 %v18104_v8  ;;  %v2497_v24 = vmul.f32 %v19775_v9, %v2477_v46  ;;  %v19876_v23 = vld [vmem:[#allocation26_spill] sm:$0xff]  ;;  %vm19881_vm10 = vmmov %vm19879_vm0  ;;  %v2908_v13 = vpop.f32.mrf.mxu1 }
 0x217   : > { %v2007_v17 = vadd.f32 %v1991_v2, %v1746_v3  ;;  %5615 = vmatmul.mubr.f32.vlgmr.msra.gmra.mxu0 %v19870_v49  ;;  %5735 = vmatprep.subr.mxu0 %v5652_v19  ;;  %v5653_v36 = vand.u32 4294901760, %v5652_v19  ;;  %v19873_v50 = vrot.slane %v19872_v63, %v19871_v45  ;;  %v2498_v47 = vmul.f32 %v19775_v9, %v2478_v14  ;;  %v18178_v3 = vpop.f32.mrf.mxu0  ;;  %vm19884_vm6 = vmmov %vm19879_vm0 }
 0x218   : > { %v2008_v31 = vadd.f32 %v1992_v42, %v1747_v60  ;;  %v5659_v58 = vand.u32 4294901760, %v5658_v34  ;;  %5738 = vmatpush1.msra.mxu0 %v5658_v34  ;;  %5771 = vmatprep.mubr.f32.mxu0 %v19480_v62  ;;  %vm19874_vm2 = vcmask 31744   ;;  %v2552_v55 = vrot.slane %v19876_v23, %v19875_v35  ;;  %v18192_v46 = vpop.f32.mrf.mxu1  ;;  %vm19886_vm14 = vmmov %vm19879_vm0 }
 0x219   : > { %v2604_v5 = vrot.slane %v19873_v50, %v19871_v45  ;;  %v2252_v21 = vadd.f32 %v2236_v4, %v2007_v17  ;;  %5889 = vmatprep.subr.mxu0 %v5653_v36  ;;  %v5654_v61 = vsub.f32 %v5652_v19, %v5653_v36  ;;  %v6474_v40 = vsel %vm19874_vm2, %v2697_v7, 0  ;;  %v2985_v4 = vpop.f32.mrf.mxu0  ;;  %v19883_v7 = vld [vmem:[#allocation36_spill] sm:$0xff]  ;;  %v19885_v50 = vld [vmem:[#allocation39_spill] sm:$0xff]  ;;  %vm19889_vm15 = vmmov %vm19879_vm0 }
 0x21a   : > { %v2253_v22 = vadd.f32 %v2237_v20, %v2008_v31  ;;  %v5660_v32 = vsub.f32 %v5658_v34, %v5659_v58  ;;  %vm2666_vm7 = vcmp.eq.s32.totalorder %v19877_v0, 1  ;;  %v18145_v52 = vand.u32 4294901760, %v6474_v40  ;;  %v19882_v34 = vld [vmem:[#allocation23_spill] sm:$0xff]  ;;  %vm19891_vm8 = vmmov %vm19879_vm0 }
 0x21b   : > { %v2513_v44 = vadd.f32 %v2497_v24, %v2252_v21  ;;  %5774 = vmatmul.mubr.f32.vlgmr.msra.gmra.mxu0 %v19842_v43  ;;  %v5655_v38 = vand.u32 4294901760, %v5654_v61  ;;  %vm2665_vm1 = vcmp.eq.s32.totalorder %v2604_v5, 1  ;;  %v2548_v18 = vrot.slane %v19876_v23, %v19871_v45 }
 0x21c   : > { %v2514_v28 = vadd.f32 %v2498_v47, %v2253_v22  ;;  %v5661_v1 = vand.u32 4294901760, %v5660_v32  ;;  %5893 = vmatpush1.msra.mxu0 %v5659_v58  ;;  %5926 = vmatprep.mubr.f32.mxu0 %v19480_v62  ;;  %v2616_v54 = vrot.slane %v2552_v55, %v19871_v45  ;;  %v18169_v37 = vsub.f32 %v6474_v40, %v18145_v52  ;;  %v3061_v58 = vpop.f32.mrf.mxu1  ;;  %v18212_v22 = vpop.f32.mrf.mxu0 }
 0x21d   : > { %v18139_v9 = vadd.f32 %v19857_v57, %v2513_v44  ;;  %5656 = vmatprep.subr.mxu1 %v5655_v38  ;;  %v2612_v6 = vrot.slane %v2548_v18, %v19871_v45  ;;  %v2560_v24 = vrot.slane %v19883_v7, %v19875_v35  ;;  %v2909_v21 = vadd.f32 %v2908_v13, %v2826_v29  ;;  %v19888_v13 = vld [vmem:[#allocation57_spill] sm:$0xff] }
 0x21e   : > { %v18142_v10 = vadd.f32 %v19857_v57, %v2514_v28  ;;  %5662 = vmatpush1.msra.mxu1 %v5661_v1  ;;  %vm2668_vm13 = vcmp.eq.s32.totalorder %v2616_v54, 1  ;;  %v18190_v15 = vand.u32 4294901760, %v18169_v37  ;;  %v18225_v55 = vpop.f32.mrf.mxu1  ;;  %v3139_v0 = vpop.f32.mrf.mxu0 }
 0x21f   : > { %v2748_v25 = vsel %vm19879_vm0, %v18139_v9, 0  ;;  %v2681_v57 = vsel %vm2665_vm1, %v18139_v9, 0.0  ;;  %5697 = vmatmul.mubr.f32.vlgmr.msra.gmra.mxu1 %v19782_v11  ;;  %5811 = vmatprep.subr.mxu1 %v18102_v59  ;;  %vm2667_vm3 = vcmp.eq.s32.totalorder %v2612_v6, 1  ;;  %v2624_v61 = vrot.slane %v2560_v24, %v19871_v45  ;;  %v19890_v6 = vld [vmem:[#allocation58_spill] sm:$0xff]  ;;  %vm19896_vm1 = vmmov %vm19879_vm0 }
 0x220   : > { %v2751_v56 = vsel %vm19878_vm5, %v18142_v10, 0  ;;  %v2682_v27 = vsel %vm2666_vm7, %v18142_v10, 0.0  ;;  %v18159_v12 = vand.u32 4294901760, %v2748_v25  ;;  %5813 = vmatpush1.msra.mxu1 %v18104_v8  ;;  %5928 = vmatmul.mubr.f32.vlgmr.msra.gmra.mxu0 %v19782_v11  ;;  %v6477_v51 = vsel %vm19881_vm10, %v2681_v57, 0  ;;  %v3213_v29 = vpop.f32.mrf.mxu1  ;;  %vm19894_vm7 = vmmov %vm19879_vm0 }
 0x221   : > { %v18157_v30 = vand.u32 4294901760, %v2751_v56  ;;  %v6480_v26 = vsel %vm19880_vm4, %v2682_v27, 0  ;;  %5965 = vmatprep.subr.mxu1 %v18102_v59  ;;  %5846 = vmatprep.mubr.f32.mxu1 %v19480_v62  ;;  %v18182_v33 = vand.u32 4294901760, %v6477_v51  ;;  %v2683_v5 = vsel %vm2667_vm3, %v19885_v50, 0.0  ;;  %vm19899_vm4 = vmmov %vm19896_vm1 }
 0x222   : > { %v18165_v48 = vand.u32 4294901760, %v6480_v26  ;;  %v6123_v42 = vsub.f32 %v2748_v25, %v18159_v12  ;;  %6074 = vmatprep.mubr.f32.mxu0 %v19480_v62  ;;  %v2986_v32 = vadd.f32 %v2985_v4, %v2909_v21  ;;  %v6483_v23 = vsel %vm19886_vm14, %v2683_v5, 0  ;;  %v18266_v4 = vpop.f32.mrf.mxu0  ;;  %v19893_v5 = vld [vmem:[#allocation22_spill] sm:$0xff]  ;;  %vm19901_vm10 = vmmov %vm19896_vm1 }
 0x223   : > { %v6117_v2 = vsub.f32 %v2751_v56, %v18157_v30  ;;  %6039 = vmatprep.subr.mxu0 %v18157_v30  ;;  %5850 = vmatmul.mubr.f32.vlgmr.msra.gmra.mxu1 %v19853_v41  ;;  %v6639_v31 = vsub.f32 %v6477_v51, %v18182_v33  ;;  %v18234_v56 = vand.u32 4294901760, %v6483_v23  ;;  %vm2670_vm12 = vcmp.eq.s32.totalorder %v2624_v61, 1  ;;  %v19895_v61 = vld [vmem:[#allocation52_spill] sm:$0xff]  ;;  %vm19906_vm14 = vmmov %vm19896_vm1 }
 0x224   : > { %6041 = vmatpush1.msra.mxu0 %v18159_v12  ;;  %v6124_v59 = vand.u32 4294901760, %v6123_v42  ;;  %5967 = vmatpush1.msra.mxu1 %v18104_v8  ;;  %v18187_v53 = vsub.f32 %v6480_v26, %v18165_v48  ;;  %v2684_v8 = vsel %vm2668_vm13, %v19882_v34, 0.0  ;;  %v3062_v38 = vadd.f32 %v3061_v58, %v2986_v32  ;;  %v19887_v26 = vld [vmem:[#allocation15_spill] sm:$0xff] }
 0x225   : > { %v6118_v60 = vand.u32 4294901760, %v6117_v2  ;;  %6080 = vmatmul.mubr.f32.vlgmr.msra.gmra.mxu0 %v19870_v49  ;;  %6200 = vmatprep.subr.mxu0 %v6117_v2  ;;  %v6594_v49 = vsub.f32 %v18169_v37, %v18190_v15  ;;  %v6486_v63 = vsel %vm19884_vm6, %v2684_v8, 0  ;;  %v6640_v47 = vand.u32 4294901760, %v6639_v31  ;;  %vm19905_vm6 = vmmov %vm19896_vm1 }
 0x226   : > { %6000 = vmatprep.mubr.f32.mxu1 %v19480_v62  ;;  %v6125_v19 = vsub.f32 %v6123_v42, %v6124_v59  ;;  %6203 = vmatpush1.msra.mxu0 %v6123_v42  ;;  %v6634_v36 = vand.u32 4294901760, %v18187_v53  ;;  %v18222_v28 = vand.u32 4294901760, %v6486_v63  ;;  %v3140_v25 = vadd.f32 %v3139_v0, %v3062_v38 }
 0x227   : > { %v6119_v14 = vsub.f32 %v6117_v2, %v6118_v60  ;;  %6236 = vmatprep.mubr.f32.mxu0 %v19480_v62  ;;  %6354 = vmatprep.subr.mxu0 %v6118_v60  ;;  %v18219_v40 = vand.u32 4294901760, %v6594_v49  ;;  %v6641_v18 = vsub.f32 %v6639_v31, %v6640_v47  ;;  %v2686_v54 = vsel %vm2670_vm12, %v19887_v26, 0.0  ;;  %v19892_v49 = vld [vmem:[#allocation61_spill] sm:$0xff] }
 0x228   : > { %6002 = vmatmul.mubr.f32.vlgmr.msra.gmra.mxu1 %v19782_v11  ;;  %v6126_v17 = vand.u32 4294901760, %v6125_v19  ;;  %v6635_v44 = vsub.f32 %v18187_v53, %v6634_v36  ;;  %v7098_v57 = vsub.f32 %v6486_v63, %v18222_v28  ;;  %v7104_v51 = vsub.f32 %v6483_v23, %v18234_v56  ;;  %v18294_v23 = vpop.f32.mrf.mxu1 }
 0x229   : > { %v6120_v20 = vand.u32 4294901760, %v6119_v14  ;;  %6239 = vmatmul.mubr.f32.vlgmr.msra.gmra.mxu0 %v19842_v43  ;;  %6160 = vmatprep.mubr.f32.mxu1 %v19480_v62  ;;  %v2556_v43 = vrot.slane %v19883_v7, %v19871_v45  ;;  %v2568_v2 = vrot.slane %v19888_v13, %v19875_v35  ;;  %v6492_v42 = vsel %vm19889_vm15, %v2686_v54, 0  ;;  %vm19909_vm15 = vmmov %vm19896_vm1 }
 0x22a   : > { %6358 = vmatpush1.msra.mxu0 %v6124_v59  ;;  %6391 = vmatprep.mubr.f32.mxu0 %v19480_v62  ;;  %v6636_v27 = vand.u32 4294901760, %v6635_v44  ;;  %v2564_v59 = vrot.slane %v19888_v13, %v19871_v45  ;;  %v18261_v19 = vand.u32 4294901760, %v6492_v42  ;;  %v2576_v21 = vrot.slane %v19893_v5, %v19875_v35 }
 0x22b   : > { %6121 = vmatprep.subr.mxu1 %v6120_v20  ;;  %6555 = vmatprep.subr.mxu0 %v18165_v48  ;;  %v2620_v1 = vrot.slane %v2556_v43, %v19871_v45  ;;  %v2572_v44 = vrot.slane %v19893_v5, %v19871_v45 }
 0x22c   : > { %6127 = vmatpush1.msra.mxu1 %v6126_v17  ;;  %v2628_v20 = vrot.slane %v2564_v59, %v19871_v45  ;;  %v7563_v24 = vsub.f32 %v6492_v42, %v18261_v19 }
 0x22d   : > { %6162 = vmatmul.mubr.f32.vlgmr.msra.gmra.mxu1 %v19782_v11  ;;  %6276 = vmatprep.subr.mxu1 %v18157_v30  ;;  %vm2669_vm9 = vcmp.eq.s32.totalorder %v2620_v1, 1  ;;  %v2640_v1 = vrot.slane %v2576_v21, %v19871_v45 }
 0x22e   : > { %6393 = vmatmul.mubr.f32.vlgmr.msra.gmra.mxu0 %v19782_v11  ;;  %6278 = vmatpush1.msra.mxu1 %v18159_v12  ;;  %v2685_v60 = vsel %vm2669_vm9, %v19890_v6, 0.0  ;;  %vm2671_vm2 = vcmp.eq.s32.totalorder %v2628_v20, 1 }
 0x22f   : > { %6557 = vmatpush1.msra.mxu0 %v18182_v33  ;;  %6430 = vmatprep.subr.mxu1 %v18157_v30  ;;  %v18240_v30 = vadd.f32 %v3213_v29, %v3140_v25  ;;  %v6489_v8 = vsel %vm19891_vm8, %v2685_v60, 0  ;;  %v2687_v32 = vsel %vm2671_vm2, %v19895_v61, 0.0  ;;  %v3373_v29 = vpop.f32.mrf.mxu1  ;;  %vm2674_vm5 = vcmp.eq.s32.totalorder %v2640_v1, 1  ;;  %v19897_v60 = vld [vmem:[#allocation25_spill] sm:$0xff]  ;;  %vm19911_vm8 = vmmov %vm19896_vm1 }
 0x230   : > { %6716 = vmatprep.subr.mxu0 %v18187_v53  ;;  %6311 = vmatprep.mubr.f32.mxu1 %v19480_v62  ;;  %v2632_v53 = vrot.slane %v2568_v2, %v19871_v45  ;;  %v6495_v25 = vsel %vm19896_vm1, %v2687_v32, 0  ;;  %v2690_v59 = vsel %vm2674_vm5, %v19897_v60, 0.0  ;;  %vm19914_vm5 = vmmov %vm19896_vm1 }
 0x231   : > { %6590 = vmatprep.mubr.f32.mxu0 %v19480_v62  ;;  %6315 = vmatmul.mubr.f32.vlgmr.msra.gmra.mxu1 %v19853_v41  ;;  %v6642_v41 = vand.u32 4294901760, %v6641_v18 }
 0x232   : > { %6596 = vmatmul.mubr.f32.vlgmr.msra.gmra.mxu0 %v18219_v40  ;;  %6432 = vmatpush1.msra.mxu1 %v18159_v12  ;;  %v7099_v12 = vand.u32 4294901760, %v7098_v57  ;;  %vm2672_vm11 = vcmp.eq.s32.totalorder %v2632_v53, 1 }
 0x233   : > { %6719 = vmatpush1.msra.mxu0 %v6639_v31  ;;  %6637 = vmatprep.subr.mxu1 %v6636_v27  ;;  %v18272_v31 = vand.u32 4294901760, %v6489_v8 }
 0x234   : > { %6870 = vmatprep.subr.mxu0 %v6634_v36  ;;  %6465 = vmatprep.mubr.f32.mxu1 %v19480_v62  ;;  %v7100_v14 = vsub.f32 %v7098_v57, %v7099_v12  ;;  %v2688_v36 = vsel %vm2672_vm11, %v19892_v49, 0.0 }
 0x235   : > { %6752 = vmatprep.mubr.f32.mxu0 %v19480_v62  ;;  %6467 = vmatmul.mubr.f32.vlgmr.msra.gmra.mxu1 %v19782_v11  ;;  %v7105_v11 = vand.u32 4294901760, %v7104_v51  ;;  %v7569_v63 = vsub.f32 %v6489_v8, %v18272_v31  ;;  %v19898_v8 = vld [vmem:[#allocation56_spill] sm:$0xff] }
 0x236   : > { %6755 = vmatmul.mubr.f32.vlgmr.msra.gmra.mxu0 %v18169_v37  ;;  %6643 = vmatpush1.msra.mxu1 %v6642_v41  ;;  %v7101_v7 = vand.u32 4294901760, %v7100_v14  ;;  %v18310_v41 = vand.u32 4294901760, %v6495_v25  ;;  %v2584_v20 = vrot.slane %v19898_v8, %v19875_v35 }
 0x237   : > { %6874 = vmatpush1.msra.mxu0 %v6640_v47  ;;  %6792 = vmatprep.subr.mxu1 %v18165_v48  ;;  %v7106_v17 = vsub.f32 %v7104_v51, %v7105_v11  ;;  %v6498_v47 = vsel %vm19894_vm7, %v2688_v36, 0  ;;  %v7570_v38 = vand.u32 4294901760, %v7569_v63  ;;  %v19900_v36 = vld [vmem:[#allocation31_spill] sm:$0xff] }
 0x238   : > { %7020 = vmatprep.subr.mxu0 %v18222_v28  ;;  %6676 = vmatprep.mubr.f32.mxu1 %v19480_v62  ;;  %v18301_v18 = vand.u32 4294901760, %v6498_v47  ;;  %v8034_v14 = vsub.f32 %v6495_v25, %v18310_v41 }
 0x239   : > { %6907 = vmatprep.mubr.f32.mxu0 %v19480_v62  ;;  %6678 = vmatmul.mubr.f32.vlgmr.msra.gmra.mxu1 %v18145_v52  ;;  %v7107_v58 = vand.u32 4294901760, %v7106_v17  ;;  %v7571_v54 = vsub.f32 %v7569_v63, %v7570_v38 }
 0x23a   : > { %6909 = vmatmul.mubr.f32.vlgmr.msra.gmra.mxu0 %v18145_v52  ;;  %6794 = vmatpush1.msra.mxu1 %v18182_v33 }
 0x23b   : > { %7022 = vmatpush1.msra.mxu0 %v18234_v56  ;;  %6946 = vmatprep.subr.mxu1 %v18165_v48  ;;  %v3291_v48 = vpop.f32.mrf.mxu0  ;;  %v7572_v53 = vand.u32 4294901760, %v7571_v54 }
 0x23c   : > { %7181 = vmatprep.subr.mxu0 %v7098_v57  ;;  %6827 = vmatprep.mubr.f32.mxu1 %v19480_v62  ;;  %v2636_v57 = vrot.slane %v2572_v44, %v19871_v45 }
 0x23d   : > { %7055 = vmatprep.mubr.f32.mxu0 %v19480_v62  ;;  %6831 = vmatmul.mubr.f32.vlgmr.msra.gmra.mxu1 %v18190_v15  ;;  %v18286_v43 = vpop.f32.mrf.mxu0 }
 0x23e   : > { %7061 = vmatmul.mubr.f32.vlgmr.msra.gmra.mxu0 %v18219_v40  ;;  %6948 = vmatpush1.msra.mxu1 %v18182_v33  ;;  %v7564_v33 = vand.u32 4294901760, %v7563_v24  ;;  %vm2673_vm0 = vcmp.eq.s32.totalorder %v2636_v57, 1 }
 0x23f   : > { %7184 = vmatpush1.msra.mxu0 %v7104_v51  ;;  %7102 = vmatprep.subr.mxu1 %v7101_v7  ;;  %v3450_v27 = vpop.f32.mrf.mxu0  ;;  %v3374_v51 = vadd.f32 %v3373_v29, %v3291_v48  ;;  %v6504_v48 = vsel %vm19899_vm4, %v2690_v59, 0  ;;  %v19904_v59 = vld [vmem:[#allocation59_spill] sm:$0xff] }
 0x240   : > { %7335 = vmatprep.subr.mxu0 %v7099_v12  ;;  %6981 = vmatprep.mubr.f32.mxu1 %v19480_v62  ;;  %v7565_v0 = vsub.f32 %v7563_v24, %v7564_v33  ;;  %v18317_v12 = vpop.f32.mrf.mxu1 }
 0x241   : > { %7217 = vmatprep.mubr.f32.mxu0 %v19480_v62  ;;  %6983 = vmatmul.mubr.f32.vlgmr.msra.gmra.mxu1 %v18145_v52  ;;  %v18315_v2 = vpop.f32.mrf.mxu0  ;;  %v3451_v42 = vadd.f32 %v3450_v27, %v3374_v51 }
 0x242   : > { %7220 = vmatmul.mubr.f32.vlgmr.msra.gmra.mxu0 %v18169_v37  ;;  %7108 = vmatpush1.msra.mxu1 %v7107_v58  ;;  %v7566_v13 = vand.u32 4294901760, %v7565_v0  ;;  %v2689_v58 = vsel %vm2673_vm0, %v19900_v36, 0.0 }
 0x243   : > { %7339 = vmatpush1.msra.mxu0 %v7105_v11  ;;  %7257 = vmatprep.subr.mxu1 %v18222_v28  ;;  %v3526_v11 = vpop.f32.mrf.mxu1  ;;  %v3604_v7 = vpop.f32.mrf.mxu0  ;;  %v6501_v1 = vsel %vm19901_vm10, %v2689_v58, 0 }
 0x244   : > { %7485 = vmatprep.subr.mxu0 %v18261_v19  ;;  %7141 = vmatprep.mubr.f32.mxu1 %v19480_v62  ;;  %v3527_v17 = vadd.f32 %v3526_v11, %v3451_v42  ;;  %v18353_v27 = vand.u32 4294901760, %v6501_v1 }
 0x245   : > { %7372 = vmatprep.mubr.f32.mxu0 %v19480_v62  ;;  %7143 = vmatmul.mubr.f32.vlgmr.msra.gmra.mxu1 %v18145_v52 }
 0x246   : > { %7374 = vmatmul.mubr.f32.vlgmr.msra.gmra.mxu0 %v18145_v52  ;;  %7259 = vmatpush1.msra.mxu1 %v18234_v56  ;;  %v3605_v5 = vadd.f32 %v3604_v7, %v3527_v17 }
 0x247   : > { %7487 = vmatpush1.msra.mxu0 %v18272_v31  ;;  %7411 = vmatprep.subr.mxu1 %v18222_v28  ;;  %v8028_v28 = vsub.f32 %v6498_v47, %v18301_v18  ;;  %v2648_v47 = vrot.slane %v2584_v20, %v19871_v45 }
 0x248   : > { %7646 = vmatprep.subr.mxu0 %v7563_v24  ;;  %7292 = vmatprep.mubr.f32.mxu1 %v19480_v62  ;;  %v18328_v24 = vpop.f32.mrf.mxu1 }
 0x249   : > { %7520 = vmatprep.mubr.f32.mxu0 %v19480_v62  ;;  %7296 = vmatmul.mubr.f32.vlgmr.msra.gmra.mxu1 %v18190_v15  ;;  %vm2676_vm13 = vcmp.eq.s32.totalorder %v2648_v47, 1 }
 0x24a   : > { %7526 = vmatmul.mubr.f32.vlgmr.msra.gmra.mxu0 %v18219_v40  ;;  %7413 = vmatpush1.msra.mxu1 %v18234_v56  ;;  %v8029_v56 = vand.u32 4294901760, %v8028_v28  ;;  %v3678_v21 = vpop.f32.mrf.mxu1 }
 0x24b   : > { %7649 = vmatpush1.msra.mxu0 %v7569_v63  ;;  %7567 = vmatprep.subr.mxu1 %v7566_v13  ;;  %v2580_v63 = vrot.slane %v19898_v8, %v19871_v45  ;;  %v18340_v32 = vadd.f32 %v3678_v21, %v3605_v5  ;;  %v8499_v13 = vsub.f32 %v6501_v1, %v18353_v27  ;;  %v19907_v1 = vld [vmem:[#allocation30_spill] sm:$0xff] }
 0x24c   : > { %7800 = vmatprep.subr.mxu0 %v7564_v33  ;;  %7446 = vmatprep.mubr.f32.mxu1 %v19480_v62  ;;  %v8035_v33 = vand.u32 4294901760, %v8034_v14  ;;  %v8030_v44 = vsub.f32 %v8028_v28, %v8029_v56 }
 0x24d   : > { %7682 = vmatprep.mubr.f32.mxu0 %v19480_v62  ;;  %7448 = vmatmul.mubr.f32.vlgmr.msra.gmra.mxu1 %v18145_v52  ;;  %v2644_v0 = vrot.slane %v2580_v63, %v19871_v45  ;;  %v8500_v20 = vand.u32 4294901760, %v8499_v13 }
 0x24e   : > { %7685 = vmatmul.mubr.f32.vlgmr.msra.gmra.mxu0 %v18169_v37  ;;  %7573 = vmatpush1.msra.mxu1 %v7572_v53  ;;  %v8036_v25 = vsub.f32 %v8034_v14, %v8035_v33  ;;  %v8031_v57 = vand.u32 4294901760, %v8030_v44 }
 0x24f   : > { %7804 = vmatpush1.msra.mxu0 %v7570_v38  ;;  %7722 = vmatprep.subr.mxu1 %v18261_v19  ;;  %v18344_v38 = vand.u32 4294901760, %v6504_v48  ;;  %vm2675_vm3 = vcmp.eq.s32.totalorder %v2644_v0, 1  ;;  %v8501_v21 = vsub.f32 %v8499_v13, %v8500_v20 }
 0x250   : > { %7950 = vmatprep.subr.mxu0 %v18301_v18  ;;  %7606 = vmatprep.mubr.f32.mxu1 %v19480_v62  ;;  %v8037_v51 = vand.u32 4294901760, %v8036_v25  ;;  %v2691_v11 = vsel %vm2675_vm3, %v19904_v59, 0.0  ;;  %v18403_v25 = vpop.f32.mrf.mxu1  ;;  %vm19917_vm3 = vmmov %vm19896_vm1 }
 0x251   : > { %7837 = vmatprep.mubr.f32.mxu0 %v19480_v62  ;;  %7608 = vmatmul.mubr.f32.vlgmr.msra.gmra.mxu1 %v18145_v52  ;;  %v8493_v29 = vsub.f32 %v6504_v48, %v18344_v38  ;;  %v6507_v17 = vsel %vm19906_vm14, %v2691_v11, 0 }
 0x252   : > { %7839 = vmatmul.mubr.f32.vlgmr.msra.gmra.mxu0 %v18145_v52  ;;  %7724 = vmatpush1.msra.mxu1 %v18272_v31  ;;  %v18386_v63 = vand.u32 4294901760, %v6507_v17 }
 0x253   : > { %7952 = vmatpush1.msra.mxu0 %v18310_v41  ;;  %7876 = vmatprep.subr.mxu1 %v18261_v19  ;;  %v19902_v19 = vld [vmem:[#allocation41_spill] sm:$0xff] }
 0x254   : > { %8111 = vmatprep.subr.mxu0 %v8028_v28  ;;  %7757 = vmatprep.mubr.f32.mxu1 %v19480_v62  ;;  %v2692_v54 = vsel %vm2676_vm13, %v19902_v19, 0.0  ;;  %v19903_v28 = vld [vmem:[#allocation55_spill] sm:$0xff]  ;;  %v18400_v44 = vsub.f32 %v6507_v17, %v18386_v63  ;;  %vm19915_vm13 = vcmask 31744  }
 0x255   : > { %7985 = vmatprep.mubr.f32.mxu0 %v19480_v62  ;;  %7761 = vmatmul.mubr.f32.vlgmr.msra.gmra.mxu1 %v18190_v15  ;;  %v2592_v42 = vrot.slane %v19903_v28, %v19875_v35  ;;  %v6510_v53 = vsel %vm19905_vm6, %v2692_v54, 0  ;;  %v2588_v8 = vrot.slane %v19903_v28, %v19871_v45  ;;  %v19910_v28 = vld [vmem:[#allocation44_spill] sm:$0xff]  ;;  %vm19918_vm6 = vmmov %vm19896_vm1 }
 0x256   : > { %7991 = vmatmul.mubr.f32.vlgmr.msra.gmra.mxu0 %v18219_v40  ;;  %7878 = vmatpush1.msra.mxu1 %v18272_v31  ;;  %v8494_v31 = vand.u32 4294901760, %v8493_v29  ;;  %v18381_v48 = vand.u32 4294901760, %v6510_v53 }
 0x257   : > { %8114 = vmatpush1.msra.mxu0 %v8034_v14  ;;  %8032 = vmatprep.subr.mxu1 %v8031_v57  ;;  %v18369_v14 = vpop.f32.mrf.mxu0  ;;  %v2652_v5 = vrot.slane %v2588_v8, %v19871_v45  ;;  %v8502_v57 = vand.u32 4294901760, %v8501_v21 }
 0x258   : > { %8265 = vmatprep.subr.mxu0 %v8029_v56  ;;  %7911 = vmatprep.mubr.f32.mxu1 %v19480_v62  ;;  %v2656_v56 = vrot.slane %v2592_v42, %v19871_v45  ;;  %v8495_v7 = vsub.f32 %v8493_v29, %v8494_v31  ;;  %v18394_v47 = vsub.f32 %v6510_v53, %v18381_v48  ;;  %v3838_v53 = vpop.f32.mrf.mxu1 }
 0x259   : > { %8147 = vmatprep.mubr.f32.mxu0 %v19480_v62  ;;  %7913 = vmatmul.mubr.f32.vlgmr.msra.gmra.mxu1 %v18145_v52  ;;  %v3756_v58 = vpop.f32.mrf.mxu0  ;;  %vm2677_vm9 = vcmp.eq.s32.totalorder %v2652_v5, 1 }
 0x25a   : > { %8150 = vmatmul.mubr.f32.vlgmr.msra.gmra.mxu0 %v18169_v37  ;;  %8038 = vmatpush1.msra.mxu1 %v8037_v51  ;;  %vm2678_vm12 = vcmp.eq.s32.totalorder %v2656_v56, 1  ;;  %v2693_v42 = vsel %vm2677_vm9, %v19910_v28, 0.0  ;;  %v18430_v21 = vpop.f32.mrf.mxu1 }
 0x25b   : > { %8269 = vmatpush1.msra.mxu0 %v8035_v33  ;;  %8187 = vmatprep.subr.mxu1 %v18301_v18  ;;  %v8496_v33 = vand.u32 4294901760, %v8495_v7  ;;  %v2694_v0 = vsel %vm2678_vm12, %v19907_v1, 0.0  ;;  %v6513_v7 = vsel %vm19911_vm8, %v2693_v42, 0  ;;  %vm19923_vm8 = vmmov %vm19896_vm1 }
 0x25c   : > { %8415 = vmatprep.subr.mxu0 %v18344_v38  ;;  %8071 = vmatprep.mubr.f32.mxu1 %v19480_v62 }
 0x25d   : > { %8302 = vmatprep.mubr.f32.mxu0 %v19480_v62  ;;  %8073 = vmatmul.mubr.f32.vlgmr.msra.gmra.mxu1 %v18145_v52 }
 0x25e   : > { %8304 = vmatmul.mubr.f32.vlgmr.msra.gmra.mxu0 %v18145_v52  ;;  %8189 = vmatpush1.msra.mxu1 %v18310_v41 }
 0x25f   : > { %8417 = vmatpush1.msra.mxu0 %v18353_v27  ;;  %8341 = vmatprep.subr.mxu1 %v18301_v18  ;;  %v18396_v18 = vpop.f32.mrf.mxu0 }
 0x260   : > { %8576 = vmatprep.subr.mxu0 %v8493_v29  ;;  %8222 = vmatprep.mubr.f32.mxu1 %v19480_v62  ;;  %v19908_v29 = vld [vmem:[#allocation14_spill] sm:$0xff] }
 0x261   : > { %8450 = vmatprep.mubr.f32.mxu0 %v19480_v62  ;;  %8226 = vmatmul.mubr.f32.vlgmr.msra.gmra.mxu1 %v18190_v15  ;;  %v2600_v54 = vrot.slane %v19908_v29, %v19875_v35  ;;  %v3915_v51 = vpop.f32.mrf.mxu0  ;;  %v2596_v11 = vrot.slane %v19908_v29, %v19871_v45  ;;  %v18440_v29 = vand.u32 4294901760, %v6513_v7 }
 0x262   : > { %8456 = vmatmul.mubr.f32.vlgmr.msra.gmra.mxu0 %v18219_v40  ;;  %8343 = vmatpush1.msra.mxu1 %v18310_v41  ;;  %v8959_v41 = vand.u32 4294901760, %v18394_v47 }
 0x263   : > { %8579 = vmatpush1.msra.mxu0 %v8499_v13  ;;  %8497 = vmatprep.subr.mxu1 %v8496_v33  ;;  %v6516_v13 = vsel %vm19909_vm15, %v2694_v0, 0  ;;  %v2664_v8 = vrot.slane %v2600_v54, %v19871_v45  ;;  %v18428_v5 = vpop.f32.mrf.mxu0  ;;  %v2660_v0 = vrot.slane %v2596_v11, %v19871_v45  ;;  %v14666_v54 = vld [vmem:[#allocation5] sm:$0x77]  ;;  %vm19922_vm15 = vmmov %vm19896_vm1 }
 0x264   : > { %8730 = vmatprep.subr.mxu0 %v8494_v31  ;;  %8376 = vmatprep.mubr.f32.mxu1 %v19480_v62  ;;  %v8965_v31 = vand.u32 4294901760, %v18400_v44  ;;  %v8960_v17 = vsub.f32 %v18394_v47, %v8959_v41  ;;  %v18425_v56 = vand.u32 4294901760, %v6516_v13  ;;  %vm10244_vm2 = vcmp.lt.s32.totalorder %v14666_v54, 7 }
 0x265   : > { %8612 = vmatprep.mubr.f32.mxu0 %v19480_v62  ;;  %8378 = vmatmul.mubr.f32.vlgmr.msra.gmra.mxu1 %v18145_v52  ;;  %vm2680_vm11 = vcmp.eq.s32.totalorder %v2664_v8, 1  ;;  %vm2679_vm7 = vcmp.eq.s32.totalorder %v2660_v0, 1 }
 0x266   : > { %8615 = vmatmul.mubr.f32.vlgmr.msra.gmra.mxu0 %v18169_v37  ;;  %8503 = vmatpush1.msra.mxu1 %v8502_v57  ;;  %v3991_v57 = vpop.f32.mrf.mxu1  ;;  %v2696_v8 = vsel %vm2680_vm11, %v18064_v39, 0.0  ;;  %v2695_v0 = vsel %vm2679_vm7, %v18061_v16, 0.0 }
 0x267   : > { %8734 = vmatpush1.msra.mxu0 %v8500_v20  ;;  %8652 = vmatprep.subr.mxu1 %v18344_v38  ;;  %v3839_v20 = vadd.f32 %v3838_v53, %v3756_v58  ;;  %v8966_v58 = vsub.f32 %v18400_v44, %v8965_v31 }
 0x268   : > { %8880 = vmatprep.subr.mxu0 %v18381_v48  ;;  %8536 = vmatprep.mubr.f32.mxu1 %v19480_v62  ;;  %v18445_v11 = vpop.f32.mrf.mxu1 }
 0x269   : > { %8767 = vmatprep.mubr.f32.mxu0 %v19480_v62  ;;  %8538 = vmatmul.mubr.f32.vlgmr.msra.gmra.mxu1 %v18145_v52  ;;  %v3916_v33 = vadd.f32 %v3915_v51, %v3839_v20  ;;  %v4069_v51 = vpop.f32.mrf.mxu0  ;;  %v19912_v20 = vmov 0  }
 0x26a   : > { %8769 = vmatmul.mubr.f32.vlgmr.msra.gmra.mxu0 %v18145_v52  ;;  %8654 = vmatpush1.msra.mxu1 %v18353_v27 }
 0x26b   : > { %8882 = vmatpush1.msra.mxu0 %v18386_v63  ;;  %8806 = vmatprep.subr.mxu1 %v18344_v38  ;;  %v3992_v42 = vadd.f32 %v3991_v57, %v3916_v33  ;;  %v8961_v38 = vand.u32 4294901760, %v8960_v17  ;;  %v10252_v33 = vsel %vm10244_vm2, 1, %v19912_v20  ;;  %v4143_v57 = vpop.f32.mrf.mxu1  ;;  %v9429_v17 = vsub.f32 %v6513_v7, %v18440_v29 }
 0x26c   : > { %9041 = vmatprep.subr.mxu0 %v18394_v47  ;;  %8687 = vmatprep.mubr.f32.mxu1 %v19480_v62  ;;  %v9423_v47 = vsub.f32 %v6516_v13, %v18425_v56  ;;  %v8967_v13 = vand.u32 4294901760, %v8966_v58 }
 0x26d   : > { %8915 = vmatprep.mubr.f32.mxu0 %v19480_v62  ;;  %8691 = vmatmul.mubr.f32.vlgmr.msra.gmra.mxu1 %v18190_v15  ;;  %v4070_v53 = vadd.f32 %v4069_v51, %v3992_v42  ;;  %v10263_v42 = vrot.slane %v10252_v33, %v19871_v45  ;;  %v9430_v7 = vand.u32 4294901760, %v9429_v17  ;;  %v6519_v51 = vsel %vm19914_vm5, %v2695_v0, 0  ;;  %v18488_v0 = vpop.f32.mrf.mxu0  ;;  %vm19925_vm5 = vmmov %vm19896_vm1 }
 0x26e   : > { %8921 = vmatmul.mubr.f32.vlgmr.msra.gmra.mxu0 %v18219_v40  ;;  %8808 = vmatpush1.msra.mxu1 %v18353_v27  ;;  %v10267_v27 = vrot.slane %v10252_v33, %v19875_v35  ;;  %19916 = vst [vmem:[#allocation42_spill] sm:$0xff] %v18488_v0 }
 0x26f   : > { %9044 = vmatpush1.msra.mxu0 %v18400_v44  ;;  %8962 = vmatprep.subr.mxu1 %v8961_v38  ;;  %v18455_v54 = vadd.f32 %v4143_v57, %v4070_v53  ;;  %v9424_v44 = vand.u32 4294901760, %v9423_v47  ;;  %v10327_v53 = vrot.slane %v10263_v42, %v19871_v45  ;;  %v9431_v33 = vsub.f32 %v9429_v17, %v9430_v7 }
 0x270   : > { %9195 = vmatprep.subr.mxu0 %v8959_v41  ;;  %8841 = vmatprep.mubr.f32.mxu1 %v19480_v62  ;;  %v6522_v41 = vsel %vm19896_vm1, %v2696_v8, 0  ;;  %v10331_v58 = vrot.slane %v10267_v27, %v19871_v45  ;;  %v14512_v8 = vld [vmem:[%s19101_s3 + $0x8] sm:$0xf]  ;;  %v18481_v57 = vand.u32 4294901760, %v6519_v51 }
 0x271   : > { %9077 = vmatprep.mubr.f32.mxu0 %v19480_v62  ;;  %19913 = vst [vmem:[#allocation46_spill] sm:$0xff] %v18455_v54  ;;  %8843 = vmatmul.mubr.f32.vlgmr.msra.gmra.mxu1 %v18145_v52  ;;  %v18469_v38 = vand.u32 4294901760, %v6522_v41  ;;  %vm10388_vm10 = vcmp.eq.s32.totalorder %v10327_v53, 1  ;;  %v10423_v27 = vsel %vm19915_vm13, %v14512_v8, 0  ;;  %v4221_v8 = vpop.f32.mrf.mxu0  ;;  %vm19926_vm13 = vmmov %vm19896_vm1 }
 0x272   : > { %9080 = vmatmul.mubr.f32.vlgmr.msra.gmra.mxu0 %v18169_v37  ;;  %8968 = vmatpush1.msra.mxu1 %v8967_v13  ;;  %vm10389_vm0 = vcmp.eq.s32.totalorder %v10331_v58, 1  ;;  %v14667_v13 = vld [vmem:[#allocation5 + $0x8] sm:$0x77] }
 0x273   : > { %9199 = vmatpush1.msra.mxu0 %v8965_v31  ;;  %9117 = vmatprep.subr.mxu1 %v18381_v48  ;;  %v9425_v31 = vsub.f32 %v9423_v47, %v9424_v44  ;;  %vm10245_vm4 = vcmp.lt.s32.totalorder %v14667_v13, 7  ;;  %v10405_v42 = vsel %vm10389_vm0, %v19887_v26, 0.0  ;;  %v18501_v26 = vand.u32 4294901760, %v10423_v27 }
 0x274   : > { %9345 = vmatprep.subr.mxu0 %v18425_v56  ;;  %9001 = vmatprep.mubr.f32.mxu1 %v19480_v62  ;;  %v10253_v58 = vsel %vm10245_vm4, 1, %v19912_v20  ;;  %v10429_v53 = vsel %vm19917_vm3, %v10405_v42, 0  ;;  %vm19928_vm3 = vmmov %vm19896_vm1 }
 0x275   : > { %9232 = vmatprep.mubr.f32.mxu0 %v19480_v62  ;;  %9003 = vmatmul.mubr.f32.vlgmr.msra.gmra.mxu1 %v18145_v52  ;;  %v18517_v42 = vsub.f32 %v10423_v27, %v18501_v26 }
 0x276   : > { %9234 = vmatmul.mubr.f32.vlgmr.msra.gmra.mxu0 %v18145_v52  ;;  %9119 = vmatpush1.msra.mxu1 %v18386_v63 }
 0x277   : > { %9347 = vmatpush1.msra.mxu0 %v18440_v29  ;;  %9271 = vmatprep.subr.mxu1 %v18381_v48  ;;  %v9426_v48 = vand.u32 4294901760, %v9425_v31  ;;  %v9432_v31 = vand.u32 4294901760, %v9431_v33 }
 0x278   : > { %9506 = vmatprep.subr.mxu0 %v9423_v47  ;;  %9152 = vmatprep.mubr.f32.mxu1 %v19480_v62  ;;  %v9888_v47 = vsub.f32 %v6522_v41, %v18469_v38  ;;  %v18495_v41 = vsub.f32 %v6519_v51, %v18481_v57  ;;  %v10271_v51 = vrot.slane %v10253_v58, %v19871_v45 }
 0x279   : > { %9380 = vmatprep.mubr.f32.mxu0 %v19480_v62  ;;  %9156 = vmatmul.mubr.f32.vlgmr.msra.gmra.mxu1 %v18190_v15 }
 0x27a   : > { %9386 = vmatmul.mubr.f32.vlgmr.msra.gmra.mxu0 %v18219_v40  ;;  %9273 = vmatpush1.msra.mxu1 %v18386_v63  ;;  %v10275_v63 = vrot.slane %v10253_v58, %v19875_v35  ;;  %v9895_v33 = vand.u32 4294901760, %v18495_v41  ;;  %v18519_v58 = vpop.f32.mrf.mxu0 }
 0x27b   : > { %9509 = vmatpush1.msra.mxu0 %v9429_v17  ;;  %9427 = vmatprep.subr.mxu1 %v9426_v48  ;;  %v9889_v17 = vand.u32 4294901760, %v9888_v47  ;;  %v18514_v48 = vand.u32 4294901760, %v10429_v53  ;;  %19919 = vst [vmem:[#allocation63_spill] sm:$0xff] %v18519_v58  ;;  %v14668_v58 = vld [vmem:[#allocation5 + $0x10] sm:$0x77] }
 0x27c   : > { %9660 = vmatprep.subr.mxu0 %v9424_v44  ;;  %9306 = vmatprep.mubr.f32.mxu1 %v19480_v62  ;;  %v10404_v44 = vsel %vm10388_vm10, %v19890_v6, 0.0  ;;  %v10339_v13 = vrot.slane %v10275_v63, %v19871_v45  ;;  %v10335_v63 = vrot.slane %v10271_v51, %v19871_v45  ;;  %v9896_v27 = vsub.f32 %v18495_v41, %v9895_v33 }
 0x27d   : > { %9542 = vmatprep.mubr.f32.mxu0 %v19480_v62  ;;  %9308 = vmatmul.mubr.f32.vlgmr.msra.gmra.mxu1 %v18145_v52  ;;  %v10426_v6 = vsel %vm19918_vm6, %v10404_v44, 0  ;;  %v18527_v44 = vpop.f32.mrf.mxu1  ;;  %vm10246_vm12 = vcmp.lt.s32.totalorder %v14668_v58, 7  ;;  %v18538_v51 = vand.u32 4294901760, %v18517_v42 }
 0x27e   : > { %9545 = vmatmul.mubr.f32.vlgmr.msra.gmra.mxu0 %v18169_v37  ;;  %9433 = vmatpush1.msra.mxu1 %v9432_v31  ;;  %v18524_v31 = vand.u32 4294901760, %v10426_v6  ;;  %19920 = vst [vmem:[#allocation47_spill] sm:$0xff] %v18527_v44  ;;  %vm10391_vm14 = vcmp.eq.s32.totalorder %v10339_v13, 1  ;;  %v4380_v44 = vpop.f32.mrf.mxu0  ;;  %vm10390_vm9 = vcmp.eq.s32.totalorder %v10335_v63, 1 }
 0x27f   : > { %9664 = vmatpush1.msra.mxu0 %v9430_v7  ;;  %9582 = vmatprep.subr.mxu1 %v18425_v56  ;;  %v9890_v7 = vsub.f32 %v9888_v47, %v9889_v17  ;;  %v10407_v58 = vsel %vm10391_vm14, %v19892_v49, 0.0 }
 0x280   : > { %9810 = vmatprep.subr.mxu0 %v18469_v38  ;;  %9466 = vmatprep.mubr.f32.mxu1 %v19480_v62  ;;  %v18543_v13 = vsub.f32 %v10426_v6, %v18524_v31 }
 0x281   : > { %9697 = vmatprep.mubr.f32.mxu0 %v19480_v62  ;;  %9468 = vmatmul.mubr.f32.vlgmr.msra.gmra.mxu1 %v18145_v52 }
 0x282   : > { %9699 = vmatmul.mubr.f32.vlgmr.msra.gmra.mxu0 %v18145_v52  ;;  %9584 = vmatpush1.msra.mxu1 %v18440_v29 }
 0x283   : > { %9812 = vmatpush1.msra.mxu0 %v18481_v57  ;;  %9736 = vmatprep.subr.mxu1 %v18425_v56  ;;  %v9891_v56 = vand.u32 4294901760, %v9890_v7  ;;  %v9897_v7 = vand.u32 4294901760, %v9896_v27  ;;  %v10435_v27 = vsel %vm19922_vm15, %v10407_v58, 0  ;;  %vm19930_vm15 = vmmov %vm19896_vm1 }
 0x284   : > { %9971 = vmatprep.subr.mxu0 %v9888_v47  ;;  %9617 = vmatprep.mubr.f32.mxu1 %v19480_v62  ;;  %v18535_v47 = vsub.f32 %v10429_v53, %v18514_v48  ;;  %v4303_v53 = vpop.f32.mrf.mxu1  ;;  %v18574_v63 = vand.u32 4294901760, %v10435_v27 }
 0x285   : > { %9845 = vmatprep.mubr.f32.mxu0 %v19480_v62  ;;  %9621 = vmatmul.mubr.f32.vlgmr.msra.gmra.mxu1 %v18190_v15  ;;  %v4304_v0 = vadd.f32 %v4303_v53, %v4221_v8  ;;  %v10406_v8 = vsel %vm10390_vm9, %v19895_v61, 0.0  ;;  %vm19929_vm9 = vmmov %vm19896_vm1 }
 0x286   : > { %9851 = vmatmul.mubr.f32.vlgmr.msra.gmra.mxu0 %v18219_v40  ;;  %9738 = vmatpush1.msra.mxu1 %v18440_v29  ;;  %v10254_v40 = vsel %vm10246_vm12, 1, %v19912_v20  ;;  %v10583_v49 = vand.u32 4294901760, %v18535_v47  ;;  %v18557_v6 = vpop.f32.mrf.mxu1 }
 0x287   : > { %9974 = vmatpush1.msra.mxu0 %v18495_v41  ;;  %9892 = vmatprep.subr.mxu1 %v9891_v56  ;;  %v10283_v29 = vrot.slane %v10254_v40, %v19875_v35  ;;  %v10543_v41 = vsub.f32 %v18517_v42, %v18538_v51  ;;  %v4381_v56 = vadd.f32 %v4380_v44, %v4304_v0  ;;  %v10432_v44 = vsel %vm19923_vm8, %v10406_v8, 0 }
 0x288   : > { %10125 = vmatprep.subr.mxu0 %v9889_v17  ;;  %9771 = vmatprep.mubr.f32.mxu1 %v19480_v62  ;;  %v18555_v17 = vpop.f32.mrf.mxu0  ;;  %v10279_v53 = vrot.slane %v10254_v40, %v19871_v45  ;;  %v4456_v54 = vpop.f32.mrf.mxu1  ;;  %v10584_v0 = vsub.f32 %v18535_v47, %v10583_v49  ;;  %v18587_v8 = vand.u32 4294901760, %v10432_v44 }
 0x289   : > { %10007 = vmatprep.mubr.f32.mxu0 %v19480_v62  ;;  %9773 = vmatmul.mubr.f32.vlgmr.msra.gmra.mxu1 %v18145_v52  ;;  %19921 = vst [vmem:[#allocation45_spill] sm:$0xff] %v18555_v17  ;;  %v4457_v58 = vadd.f32 %v4456_v54, %v4381_v56  ;;  %v18571_v61 = vand.u32 4294901760, %v10543_v41 }
 0x28a   : > { %10010 = vmatmul.mubr.f32.vlgmr.msra.gmra.mxu0 %v18169_v37  ;;  %9898 = vmatpush1.msra.mxu1 %v9897_v7  ;;  %v10589_v37 = vand.u32 4294901760, %v18543_v13  ;;  %v4534_v40 = vpop.f32.mrf.mxu0  ;;  %v18577_v7 = vpop.f32.mrf.mxu1  ;;  %v10343_v41 = vrot.slane %v10279_v53, %v19871_v45 }
 0x28b   : > { %10129 = vmatpush1.msra.mxu0 %v9895_v33  ;;  %10047 = vmatprep.subr.mxu1 %v18469_v38  ;;  %v10347_v33 = vrot.slane %v10283_v29, %v19871_v45  ;;  %19924 = vst [vmem:[#allocation40_spill] sm:$0xff] %v18577_v7  ;;  %v4535_v54 = vadd.f32 %v4534_v40, %v4457_v58  ;;  %v14669_v7 = vld [vmem:[#allocation5 + $0x18] sm:$0x77] }
 0x28c   : > { %10504 = vmatprep.subr.mxu0 %v18514_v48  ;;  %9931 = vmatprep.mubr.f32.mxu1 %v19480_v62  ;;  %v10590_v29 = vsub.f32 %v18543_v13, %v10589_v37  ;;  %v4608_v56 = vpop.f32.mrf.mxu1  ;;  %vm10247_vm2 = vcmp.lt.s32.totalorder %v14669_v7, 7  ;;  %vm10392_vm7 = vcmp.eq.s32.totalorder %v10343_v41, 1  ;;  %v11053_v58 = vsub.f32 %v10432_v44, %v18587_v8  ;;  %v18620_v7 = vpop.f32.mrf.mxu0  ;;  %v14670_v41 = vld [vmem:[#allocation5 + $0x20] sm:$0x77] }
 0x28d   : > { %10162 = vmatprep.mubr.f32.mxu0 %v19480_v62  ;;  %9933 = vmatmul.mubr.f32.vlgmr.msra.gmra.mxu1 %v18145_v52  ;;  %vm10393_vm11 = vcmp.eq.s32.totalorder %v10347_v33, 1  ;;  %v18589_v17 = vadd.f32 %v4608_v56, %v4535_v54  ;;  %v10255_v33 = vsel %vm10247_vm2, 1, %v19912_v20  ;;  %vm10248_vm4 = vcmp.lt.s32.totalorder %v14670_v41, 7 }
 0x28e   : > { %10164 = vmatmul.mubr.f32.vlgmr.msra.gmra.mxu0 %v18145_v52  ;;  %10049 = vmatpush1.msra.mxu1 %v18481_v57  ;;  %v10409_v53 = vsel %vm10393_vm11, %v19897_v60, 0.0 }
 0x28f   : > { %10506 = vmatpush1.msra.mxu0 %v18524_v31  ;;  %10201 = vmatprep.subr.mxu1 %v18469_v38  ;;  %v10585_v38 = vand.u32 4294901760, %v10584_v0  ;;  %v10441_v60 = vsel %vm19896_vm1, %v10409_v53, 0  ;;  %v10256_v53 = vsel %vm10248_vm4, 1, %v19912_v20 }
 0x290   : > { %10665 = vmatprep.subr.mxu0 %v18535_v47  ;;  %10082 = vmatprep.mubr.f32.mxu1 %v19480_v62  ;;  %v11047_v47 = vsub.f32 %v10435_v27, %v18574_v63  ;;  %v10291_v27 = vrot.slane %v10255_v33, %v19875_v35  ;;  %v18614_v44 = vand.u32 4294901760, %v10441_v60 }
 0x291   : > { %10539 = vmatprep.mubr.f32.mxu0 %v19480_v62  ;;  %10086 = vmatmul.mubr.f32.vlgmr.msra.gmra.mxu1 %v18190_v15  ;;  %v10591_v15 = vand.u32 4294901760, %v10590_v29 }
 0x292   : > { %10545 = vmatmul.mubr.f32.vlgmr.msra.gmra.mxu0 %v18571_v61  ;;  %10203 = vmatpush1.msra.mxu1 %v18481_v57  ;;  %v11048_v57 = vand.u32 4294901760, %v11047_v47  ;;  %v10355_v0 = vrot.slane %v10291_v27, %v19871_v45  ;;  %v10299_v27 = vrot.slane %v10256_v53, %v19875_v35 }
 0x293   : > { %10668 = vmatpush1.msra.mxu0 %v18543_v13  ;;  %10586 = vmatprep.subr.mxu1 %v10585_v38  ;;  %v10408_v13 = vsel %vm10392_vm7, %v19900_v36, 0.0  ;;  %v11512_v38 = vsub.f32 %v10441_v60, %v18614_v44  ;;  %v10295_v60 = vrot.slane %v10256_v53, %v19871_v45  ;;  %vm19931_vm7 = vmmov %vm19896_vm1 }
 0x294   : > { %10819 = vmatprep.subr.mxu0 %v10583_v49  ;;  %10236 = vmatprep.mubr.f32.mxu1 %v19480_v62  ;;  %v10287_v49 = vrot.slane %v10255_v33, %v19871_v45  ;;  %v10438_v36 = vsel %vm19925_vm5, %v10408_v13, 0  ;;  %vm10395_vm0 = vcmp.eq.s32.totalorder %v10355_v0, 1 }
 0x295   : > { %10701 = vmatprep.mubr.f32.mxu0 %v19480_v62  ;;  %10238 = vmatmul.mubr.f32.vlgmr.msra.gmra.mxu1 %v18145_v52  ;;  %v11054_v52 = vand.u32 4294901760, %v11053_v58  ;;  %v18625_v29 = vand.u32 4294901760, %v10438_v36  ;;  %v10359_v41 = vrot.slane %v10295_v60, %v19871_v45 }
 0x296   : > { %10704 = vmatmul.mubr.f32.vlgmr.msra.gmra.mxu0 %v18517_v42  ;;  %10592 = vmatpush1.msra.mxu1 %v10591_v15  ;;  %v10351_v40 = vrot.slane %v10287_v49, %v19871_v45  ;;  %v18646_v49 = vpop.f32.mrf.mxu1 }
 0x297   : > { %10823 = vmatpush1.msra.mxu0 %v10589_v37  ;;  %10741 = vmatprep.subr.mxu1 %v18514_v48  ;;  %v11049_v37 = vsub.f32 %v11047_v47, %v11048_v57  ;;  %v11055_v54 = vsub.f32 %v11053_v58, %v11054_v52  ;;  %v18636_v15 = vsub.f32 %v10438_v36, %v18625_v29  ;;  %vm10396_vm12 = vcmp.eq.s32.totalorder %v10359_v41, 1 }
 0x298   : > { %10969 = vmatprep.subr.mxu0 %v18574_v63  ;;  %10625 = vmatprep.mubr.f32.mxu1 %v19480_v62  ;;  %vm10394_vm10 = vcmp.eq.s32.totalorder %v10351_v40, 1  ;;  %19927 = vst [vmem:[#allocation62_spill] sm:$0xff] %v18646_v49  ;;  %v14671_v40 = vld [vmem:[#allocation5 + $0x28] sm:$0x77] }
 0x299   : > { %10856 = vmatprep.mubr.f32.mxu0 %v19480_v62  ;;  %10627 = vmatmul.mubr.f32.vlgmr.msra.gmra.mxu1 %v18501_v26  ;;  %v11050_v56 = vand.u32 4294901760, %v11049_v37  ;;  %v11056_v33 = vand.u32 4294901760, %v11055_v54  ;;  %v11519_v0 = vand.u32 4294901760, %v18636_v15  ;;  %vm10249_vm6 = vcmp.lt.s32.totalorder %v14671_v40, 7 }
 0x29a   : > { %10858 = vmatmul.mubr.f32.vlgmr.msra.gmra.mxu0 %v18501_v26  ;;  %10743 = vmatpush1.msra.mxu1 %v18524_v31 }
 0x29b   : > { %10971 = vmatpush1.msra.mxu0 %v18587_v8  ;;  %10895 = vmatprep.subr.mxu1 %v18514_v48  ;;  %v4686_v48 = vpop.f32.mrf.mxu0  ;;  %v11520_v53 = vsub.f32 %v18636_v15, %v11519_v0 }
 0x29c   : > { %11130 = vmatprep.subr.mxu0 %v11047_v47  ;;  %10776 = vmatprep.mubr.f32.mxu1 %v19480_v62  ;;  %v10411_v47 = vsel %vm10395_vm0, %v19902_v19, 0.0  ;;  %v10410_v19 = vsel %vm10394_vm10, %v19904_v59, 0.0  ;;  %vm19932_vm10 = vmmov %vm19896_vm1 }
 0x29d   : > { %11004 = vmatprep.mubr.f32.mxu0 %v19480_v62  ;;  %10780 = vmatmul.mubr.f32.vlgmr.msra.gmra.mxu1 %v18538_v51  ;;  %v10444_v59 = vsel %vm19928_vm3, %v10410_v19, 0  ;;  %v11521_v40 = vand.u32 4294901760, %v11520_v53 }
 0x29e   : > { %11010 = vmatmul.mubr.f32.vlgmr.msra.gmra.mxu0 %v18571_v61  ;;  %10897 = vmatpush1.msra.mxu1 %v18524_v31  ;;  %v4688_v31 = vpop.f32.mrf.mxu0  ;;  %v18660_v54 = vand.u32 4294901760, %v10444_v59 }
 0x29f   : > { %11133 = vmatpush1.msra.mxu0 %v11053_v58  ;;  %11051 = vmatprep.subr.mxu1 %v11050_v56  ;;  %v11513_v58 = vand.u32 4294901760, %v11512_v38 }
 0x2a0   : > { %11284 = vmatprep.subr.mxu0 %v11048_v57  ;;  %10930 = vmatprep.mubr.f32.mxu1 %v19480_v62  ;;  %v10447_v57 = vsel %vm19926_vm13, %v10411_v47, 0  ;;  %v4845_v13 = vpop.f32.mrf.mxu0  ;;  %v4768_v47 = vpop.f32.mrf.mxu1  ;;  %vm19933_vm13 = vmmov %vm19896_vm1 }
 0x2a1   : > { %11166 = vmatprep.mubr.f32.mxu0 %v19480_v62  ;;  %10932 = vmatmul.mubr.f32.vlgmr.msra.gmra.mxu1 %v18501_v26  ;;  %v11514_v37 = vsub.f32 %v11512_v38, %v11513_v58  ;;  %v18655_v36 = vand.u32 4294901760, %v10447_v57 }
 0x2a2   : > { %11169 = vmatmul.mubr.f32.vlgmr.msra.gmra.mxu0 %v18517_v42  ;;  %11057 = vmatpush1.msra.mxu1 %v11056_v33  ;;  %v4847_v56 = vpop.f32.mrf.mxu0  ;;  %v4769_v33 = vadd.f32 %v4768_v47, %v4686_v48  ;;  %v4770_v19 = vpop.f32.mrf.mxu1  ;;  %v18676_v48 = vsub.f32 %v10444_v59, %v18660_v54  ;;  %v10412_v59 = vsel %vm10396_vm12, %v19910_v28, 0.0  ;;  %vm19935_vm12 = vmmov %vm19896_vm1 }
 0x2a3   : > { %11288 = vmatpush1.msra.mxu0 %v11054_v52  ;;  %11206 = vmatprep.subr.mxu1 %v18574_v63  ;;  %v10363_v52 = vrot.slane %v10299_v27, %v19871_v45  ;;  %v10257_v27 = vsel %vm10249_vm6, 1, %v19912_v20  ;;  %v4771_v60 = vadd.f32 %v4770_v19, %v4688_v31 }
 0x2a4   : > { %11434 = vmatprep.subr.mxu0 %v18614_v44  ;;  %11090 = vmatprep.mubr.f32.mxu1 %v19480_v62  ;;  %v4846_v49 = vadd.f32 %v4845_v13, %v4769_v33 }
 0x2a5   : > { %11321 = vmatprep.mubr.f32.mxu0 %v19480_v62  ;;  %11092 = vmatmul.mubr.f32.vlgmr.msra.gmra.mxu1 %v18501_v26  ;;  %vm10397_vm14 = vcmp.eq.s32.totalorder %v10363_v52, 1  ;;  %v4848_v31 = vadd.f32 %v4847_v56, %v4771_v60  ;;  %v10450_v60 = vsel %vm19930_vm15, %v10412_v59, 0 }
 0x2a6   : > { %11323 = vmatmul.mubr.f32.vlgmr.msra.gmra.mxu0 %v18501_v26  ;;  %11208 = vmatpush1.msra.mxu1 %v18587_v8  ;;  %v10413_v52 = vsel %vm10397_vm14, %v19907_v1, 0.0  ;;  %vm19934_vm14 = vmmov %vm19896_vm1 }
 0x2a7   : > { %11436 = vmatpush1.msra.mxu0 %v18625_v29  ;;  %11360 = vmatprep.subr.mxu1 %v18574_v63  ;;  %v11515_v63 = vand.u32 4294901760, %v11514_v37  ;;  %v4921_v37 = vpop.f32.mrf.mxu1  ;;  %v10453_v1 = vsel %vm19929_vm9, %v10413_v52, 0 }
 0x2a8   : > { %11595 = vmatprep.subr.mxu0 %v11512_v38  ;;  %11241 = vmatprep.mubr.f32.mxu1 %v19480_v62  ;;  %v18669_v38 = vsub.f32 %v10447_v57, %v18655_v36  ;;  %v4999_v57 = vpop.f32.mrf.mxu0 }
 0x2a9   : > { %11469 = vmatprep.mubr.f32.mxu0 %v19480_v62  ;;  %11245 = vmatmul.mubr.f32.vlgmr.msra.gmra.mxu1 %v18538_v51  ;;  %v4923_v13 = vpop.f32.mrf.mxu1 }
 0x2aa   : > { %11475 = vmatmul.mubr.f32.vlgmr.msra.gmra.mxu0 %v18571_v61  ;;  %11362 = vmatpush1.msra.mxu1 %v18587_v8  ;;  %v10307_v8 = vrot.slane %v10257_v27, %v19875_v35  ;;  %v4924_v47 = vadd.f32 %v4923_v13, %v4848_v31  ;;  %v5001_v56 = vpop.f32.mrf.mxu0 }
 0x2ab   : > { %11598 = vmatpush1.msra.mxu0 %v18636_v15  ;;  %11516 = vmatprep.subr.mxu1 %v11515_v63  ;;  %v4922_v15 = vadd.f32 %v4921_v37, %v4846_v49  ;;  %v10303_v49 = vrot.slane %v10257_v27, %v19871_v45  ;;  %v5073_v33 = vpop.f32.mrf.mxu1  ;;  %v18700_v27 = vand.u32 4294901760, %v10453_v1  ;;  %v14672_v37 = vld [vmem:[#allocation5 + $0x30] sm:$0x77] }
 0x2ac   : > { %11749 = vmatprep.subr.mxu0 %v11513_v58  ;;  %11395 = vmatprep.mubr.f32.mxu1 %v19480_v62  ;;  %v11978_v58 = vand.u32 4294901760, %v18669_v38  ;;  %v10371_v63 = vrot.slane %v10307_v8, %v19871_v45  ;;  %v5002_v28 = vadd.f32 %v5001_v56, %v4924_v47  ;;  %vm10250_vm8 = vcmp.lt.s32.totalorder %v14672_v37, 7 }
 0x2ad   : > { %11631 = vmatprep.mubr.f32.mxu0 %v19480_v62  ;;  %11397 = vmatmul.mubr.f32.vlgmr.msra.gmra.mxu1 %v18501_v26  ;;  %v5000_v53 = vadd.f32 %v4999_v57, %v4922_v15  ;;  %v5075_v52 = vpop.f32.mrf.mxu1  ;;  %v18713_v15 = vand.u32 4294901760, %v10450_v60 }
 0x2ae   : > { %11634 = vmatmul.mubr.f32.vlgmr.msra.gmra.mxu0 %v18517_v42  ;;  %11522 = vmatpush1.msra.mxu1 %v11521_v40  ;;  %v11979_v19 = vsub.f32 %v18669_v38, %v11978_v58  ;;  %v18705_v57 = vadd.f32 %v5075_v52, %v5002_v28  ;;  %v10367_v40 = vrot.slane %v10303_v49, %v19871_v45  ;;  %vm10399_vm11 = vcmp.eq.s32.totalorder %v10371_v63, 1 }
 0x2af   : > { %11753 = vmatpush1.msra.mxu0 %v11519_v0  ;;  %11671 = vmatprep.subr.mxu1 %v18614_v44  ;;  %v11984_v0 = vand.u32 4294901760, %v18676_v48  ;;  %v18695_v41 = vadd.f32 %v5073_v33, %v5000_v53  ;;  %v10415_v13 = vsel %vm10399_vm11, %v18064_v39, 0.0  ;;  %v12448_v47 = vsub.f32 %v10450_v60, %v18713_v15 }
 0x2b0   : > { %11899 = vmatprep.subr.mxu0 %v18655_v36  ;;  %11555 = vmatprep.mubr.f32.mxu1 %v19480_v62  ;;  %v11980_v31 = vand.u32 4294901760, %v11979_v19  ;;  %vm10398_vm2 = vcmp.eq.s32.totalorder %v10367_v40, 1 }
 0x2b1   : > { %11786 = vmatprep.mubr.f32.mxu0 %v19480_v62  ;;  %11557 = vmatmul.mubr.f32.vlgmr.msra.gmra.mxu1 %v18501_v26  ;;  %v11985_v8 = vsub.f32 %v18676_v48, %v11984_v0  ;;  %v10414_v39 = vsel %vm10398_vm2, %v18061_v16, 0.0  ;;  %v12449_v53 = vand.u32 4294901760, %v12448_v47 }
 0x2b2   : > { %11788 = vmatmul.mubr.f32.vlgmr.msra.gmra.mxu0 %v18501_v26  ;;  %11673 = vmatpush1.msra.mxu1 %v18625_v29  ;;  %v10456_v16 = vsel %vm19896_vm1, %v10414_v39, 0 }
 0x2b3   : > { %11901 = vmatpush1.msra.mxu0 %v18660_v54  ;;  %11825 = vmatprep.subr.mxu1 %v18614_v44  ;;  %v12442_v44 = vsub.f32 %v10453_v1, %v18700_v27  ;;  %v11986_v59 = vand.u32 4294901760, %v11985_v8  ;;  %v12450_v19 = vsub.f32 %v12448_v47, %v12449_v53  ;;  %v18747_v60 = vand.u32 4294901760, %v10456_v16 }
 0x2b4   : > { %12060 = vmatprep.subr.mxu0 %v18669_v38  ;;  %11706 = vmatprep.mubr.f32.mxu1 %v19480_v62  ;;  %v10258_v38 = vsel %vm10250_vm8, 1, %v19912_v20 }
 0x2b5   : > { %11934 = vmatprep.mubr.f32.mxu0 %v19480_v62  ;;  %11710 = vmatmul.mubr.f32.vlgmr.msra.gmra.mxu1 %v18538_v51  ;;  %v10315_v1 = vrot.slane %v10258_v38, %v19875_v35 }
 0x2b6   : > { %11940 = vmatmul.mubr.f32.vlgmr.msra.gmra.mxu0 %v18571_v61  ;;  %11827 = vmatpush1.msra.mxu1 %v18625_v29  ;;  %v12443_v29 = vand.u32 4294901760, %v12442_v44 }
 0x2b7   : > { %12063 = vmatpush1.msra.mxu0 %v18676_v48  ;;  %11981 = vmatprep.subr.mxu1 %v11980_v31  ;;  %v10459_v48 = vsel %vm19931_vm7, %v10415_v13, 0  ;;  %v10379_v49 = vrot.slane %v10315_v1, %v19871_v45 }
 0x2b8   : > { %12214 = vmatprep.subr.mxu0 %v11978_v58  ;;  %11860 = vmatprep.mubr.f32.mxu1 %v19480_v62  ;;  %v10311_v58 = vrot.slane %v10258_v38, %v19871_v45  ;;  %v12444_v56 = vsub.f32 %v12442_v44, %v12443_v29  ;;  %v18738_v33 = vand.u32 4294901760, %v10459_v48  ;;  %v5151_v63 = vpop.f32.mrf.mxu0  ;;  %v18759_v38 = vsub.f32 %v10456_v16, %v18747_v60 }
 0x2b9   : > { %12096 = vmatprep.mubr.f32.mxu0 %v19480_v62  ;;  %11862 = vmatmul.mubr.f32.vlgmr.msra.gmra.mxu1 %v18501_v26  ;;  %vm10401_vm0 = vcmp.eq.s32.totalorder %v10379_v49, 1 }
 0x2ba   : > { %12099 = vmatmul.mubr.f32.vlgmr.msra.gmra.mxu0 %v18517_v42  ;;  %11987 = vmatpush1.msra.mxu1 %v11986_v59  ;;  %v10375_v28 = vrot.slane %v10311_v58, %v19871_v45  ;;  %v5153_v52 = vpop.f32.mrf.mxu0  ;;  %v12445_v40 = vand.u32 4294901760, %v12444_v56  ;;  %v10417_v31 = vsel %vm10401_vm0, %v18142_v10, 0.0 }
 0x2bb   : > { %12218 = vmatpush1.msra.mxu0 %v11984_v0  ;;  %12136 = vmatprep.subr.mxu1 %v18655_v36  ;;  %v14673_v0 = vld [vmem:[#allocation5 + $0x38] sm:$0x77]  ;;  %v10465_v10 = vsel %vm19932_vm10, %v10417_v31, 0 }
 0x2bc   : > { %12364 = vmatprep.subr.mxu0 %v18700_v27  ;;  %12020 = vmatprep.mubr.f32.mxu1 %v19480_v62  ;;  %vm10251_vm5 = vcmp.lt.s32.totalorder %v14673_v0, 7  ;;  %vm10400_vm4 = vcmp.eq.s32.totalorder %v10375_v28, 1  ;;  %v18774_v39 = vand.u32 4294901760, %v10465_v10 }
 0x2bd   : > { %12251 = vmatprep.mubr.f32.mxu0 %v19480_v62  ;;  %12022 = vmatmul.mubr.f32.vlgmr.msra.gmra.mxu1 %v18501_v26  ;;  %v10259_v37 = vsel %vm10251_vm5, 1, %v19912_v20  ;;  %v12451_v20 = vand.u32 4294901760, %v12450_v19  ;;  %v10416_v13 = vsel %vm10400_vm4, %v18139_v9, 0.0 }
 0x2be   : > { %12253 = vmatmul.mubr.f32.vlgmr.msra.gmra.mxu0 %v18501_v26  ;;  %12138 = vmatpush1.msra.mxu1 %v18660_v54  ;;  %v5310_v8 = vpop.f32.mrf.mxu0  ;;  %v10319_v1 = vrot.slane %v10259_v37, %v19871_v45  ;;  %v10462_v58 = vsel %vm19933_vm13, %v10416_v13, 0 }
 0x2bf   : > { %12366 = vmatpush1.msra.mxu0 %v18713_v15  ;;  %12290 = vmatprep.subr.mxu1 %v18655_v36  ;;  %v12907_v36 = vsub.f32 %v10459_v48, %v18738_v33  ;;  %v18784_v19 = vand.u32 4294901760, %v10462_v58 }
 0x2c0   : > { %12525 = vmatprep.subr.mxu0 %v12442_v44  ;;  %12171 = vmatprep.mubr.f32.mxu1 %v19480_v62  ;;  %v10323_v44 = vrot.slane %v10259_v37, %v19875_v35  ;;  %v5312_v35 = vpop.f32.mrf.mxu0 }
 0x2c1   : > { %12399 = vmatprep.mubr.f32.mxu0 %v19480_v62  ;;  %12175 = vmatmul.mubr.f32.vlgmr.msra.gmra.mxu1 %v18538_v51  ;;  %v13378_v13 = vsub.f32 %v10462_v58, %v18784_v19 }
 0x2c2   : > { %12405 = vmatmul.mubr.f32.vlgmr.msra.gmra.mxu0 %v18571_v61  ;;  %12292 = vmatpush1.msra.mxu1 %v18660_v54  ;;  %v12908_v54 = vand.u32 4294901760, %v12907_v36  ;;  %v5464_v16 = vpop.f32.mrf.mxu0 }
 0x2c3   : > { %12528 = vmatpush1.msra.mxu0 %v12448_v47  ;;  %12446 = vmatprep.subr.mxu1 %v12445_v40  ;;  %v5233_v59 = vpop.f32.mrf.mxu1  ;;  %v10387_v47 = vrot.slane %v10323_v44, %v19871_v45 }
 0x2c4   : > { %12679 = vmatprep.subr.mxu0 %v12443_v29  ;;  %12325 = vmatprep.mubr.f32.mxu1 %v19480_v62  ;;  %v12914_v29 = vand.u32 4294901760, %v18759_v38  ;;  %v5234_v48 = vadd.f32 %v5233_v59, %v5151_v63  ;;  %v12909_v9 = vsub.f32 %v12907_v36, %v12908_v54  ;;  %v10383_v63 = vrot.slane %v10319_v1, %v19871_v45  ;;  %v5466_v31 = vpop.f32.mrf.mxu0 }
 0x2c5   : > { %12561 = vmatprep.mubr.f32.mxu0 %v19480_v62  ;;  %12327 = vmatmul.mubr.f32.vlgmr.msra.gmra.mxu1 %v18501_v26  ;;  %vm10403_vm3 = vcmp.eq.s32.totalorder %v10387_v47, 1  ;;  %v13379_v1 = vand.u32 4294901760, %v13378_v13 }
 0x2c6   : > { %12564 = vmatmul.mubr.f32.vlgmr.msra.gmra.mxu0 %v18517_v42  ;;  %12452 = vmatpush1.msra.mxu1 %v12451_v20  ;;  %v5311_v56 = vadd.f32 %v5310_v8, %v5234_v48  ;;  %v12915_v28 = vsub.f32 %v18759_v38, %v12914_v29  ;;  %v10419_v20 = vsel %vm10403_vm3, %v19882_v34, 0.0  ;;  %vm10402_vm6 = vcmp.eq.s32.totalorder %v10383_v63, 1 }
 0x2c7   : > { %12683 = vmatpush1.msra.mxu0 %v12449_v53  ;;  %12601 = vmatprep.subr.mxu1 %v18700_v27  ;;  %v5235_v53 = vpop.f32.mrf.mxu1  ;;  %v10471_v59 = vsel %vm19934_vm14, %v10419_v20, 0  ;;  %v10418_v47 = vsel %vm10402_vm6, %v19885_v50, 0.0  ;;  %v13380_v58 = vsub.f32 %v13378_v13, %v13379_v1 }
 0x2c8   : > { %12829 = vmatprep.subr.mxu0 %v18738_v33  ;;  %12485 = vmatprep.mubr.f32.mxu1 %v19480_v62  ;;  %v5236_v49 = vadd.f32 %v5235_v53, %v5153_v52  ;;  %v13372_v52 = vsub.f32 %v10465_v10, %v18774_v39  ;;  %v12916_v10 = vand.u32 4294901760, %v12915_v28  ;;  %v18810_v48 = vand.u32 4294901760, %v10471_v59 }
 0x2c9   : > { %12716 = vmatprep.mubr.f32.mxu0 %v19480_v62  ;;  %12487 = vmatmul.mubr.f32.vlgmr.msra.gmra.mxu1 %v18501_v26  ;;  %v5386_v0 = vpop.f32.mrf.mxu1 }
 0x2ca   : > { %12718 = vmatmul.mubr.f32.vlgmr.msra.gmra.mxu0 %v18501_v26  ;;  %12603 = vmatpush1.msra.mxu1 %v18713_v15  ;;  %v5387_v37 = vadd.f32 %v5386_v0, %v5311_v56  ;;  %v5313_v40 = vadd.f32 %v5312_v35, %v5236_v49  ;;  %v13837_v56 = vsub.f32 %v10471_v59, %v18810_v48  ;;  %v13381_v0 = vand.u32 4294901760, %v13380_v58 }
 0x2cb   : > { %12831 = vmatpush1.msra.mxu0 %v18747_v60  ;;  %12755 = vmatprep.subr.mxu1 %v18700_v27  ;;  %v12910_v27 = vand.u32 4294901760, %v12909_v9  ;;  %v10468_v9 = vsel %vm19935_vm12, %v10418_v47, 0 }
 0x2cc   : > { %12990 = vmatprep.subr.mxu0 %v12907_v36  ;;  %12636 = vmatprep.mubr.f32.mxu1 %v19480_v62  ;;  %v5388_v36 = vpop.f32.mrf.mxu1  ;;  %v5465_v8 = vadd.f32 %v5464_v16, %v5387_v37  ;;  %v18818_v53 = vand.u32 4294901760, %v10468_v9  ;;  %v13838_v28 = vand.u32 4294901760, %v13837_v56 }
 0x2cd   : > { %12864 = vmatprep.mubr.f32.mxu0 %v19480_v62  ;;  %12640 = vmatmul.mubr.f32.vlgmr.msra.gmra.mxu1 %v18538_v51  ;;  %v5389_v45 = vadd.f32 %v5388_v36, %v5313_v40 }
 0x2ce   : > { %12870 = vmatmul.mubr.f32.vlgmr.msra.gmra.mxu0 %v18571_v61  ;;  %12757 = vmatpush1.msra.mxu1 %v18713_v15  ;;  %v5538_v44 = vpop.f32.mrf.mxu1  ;;  %v13843_v63 = vsub.f32 %v10468_v9, %v18818_v53  ;;  %v13839_v36 = vsub.f32 %v13837_v56, %v13838_v28 }
 0x2cf   : > { %12993 = vmatpush1.msra.mxu0 %v18759_v38  ;;  %12911 = vmatprep.subr.mxu1 %v12910_v27  ;;  %v18796_v15 = vadd.f32 %v5538_v44, %v5465_v8  ;;  %v5467_v38 = vadd.f32 %v5466_v31, %v5389_v45 }
 0x2d0   : > { %13144 = vmatprep.subr.mxu0 %v12908_v54  ;;  %12790 = vmatprep.mubr.f32.mxu1 %v19480_v62  ;;  %v13373_v54 = vand.u32 4294901760, %v13372_v52  ;;  %v5540_v35 = vpop.f32.mrf.mxu1  ;;  %v13844_v40 = vand.u32 4294901760, %v13843_v63 }
 0x2d1   : > { %13026 = vmatprep.mubr.f32.mxu0 %v19480_v62  ;;  %12792 = vmatmul.mubr.f32.vlgmr.msra.gmra.mxu1 %v18501_v26  ;;  %v18800_v34 = vadd.f32 %v5540_v35, %v5467_v38  ;;  %v13840_v35 = vand.u32 4294901760, %v13839_v36 }
 0x2d2   : > { %13029 = vmatmul.mubr.f32.vlgmr.msra.gmra.mxu0 %v18517_v42  ;;  %12917 = vmatpush1.msra.mxu1 %v12916_v10  ;;  %v13845_v10 = vsub.f32 %v13843_v63, %v13844_v40 }
 0x2d3   : > { %13148 = vmatpush1.msra.mxu0 %v12914_v29  ;;  %13066 = vmatprep.subr.mxu1 %v18738_v33  ;;  %v13374_v29 = vsub.f32 %v13372_v52, %v13373_v54 }
 0x2d4   : > { %13294 = vmatprep.subr.mxu0 %v18774_v39  ;;  %12950 = vmatprep.mubr.f32.mxu1 %v19480_v62 }
 0x2d5   : > { %13181 = vmatprep.mubr.f32.mxu0 %v19480_v62  ;;  %12952 = vmatmul.mubr.f32.vlgmr.msra.gmra.mxu1 %v18501_v26  ;;  %v13375_v49 = vand.u32 4294901760, %v13374_v29  ;;  %v2911_v29 = vadd.f32 %v18192_v46, %v18178_v3 }
 0x2d6   : > { %13183 = vmatmul.mubr.f32.vlgmr.msra.gmra.mxu0 %v18501_v26  ;;  %13068 = vmatpush1.msra.mxu1 %v18747_v60 }
 0x2d7   : > { %13296 = vmatpush1.msra.mxu0 %v18784_v19  ;;  %13220 = vmatprep.subr.mxu1 %v18738_v33  ;;  %v5616_v50 = vpop.f32.mrf.mxu0 }
 0x2d8   : > { %13455 = vmatprep.subr.mxu0 %v13372_v52  ;;  %13101 = vmatprep.mubr.f32.mxu1 %v19480_v62 }
 0x2d9   : > { %13329 = vmatprep.mubr.f32.mxu0 %v19480_v62  ;;  %13105 = vmatmul.mubr.f32.vlgmr.msra.gmra.mxu1 %v18538_v51  ;;  %v5618_v33 = vpop.f32.mrf.mxu0 }
 0x2da   : > { %13335 = vmatmul.mubr.f32.vlgmr.msra.gmra.mxu0 %v18571_v61  ;;  %13222 = vmatpush1.msra.mxu1 %v18747_v60 }
 0x2db   : > { %13458 = vmatpush1.msra.mxu0 %v13378_v13  ;;  %13376 = vmatprep.subr.mxu1 %v13375_v49  ;;  %v5775_v16 = vpop.f32.mrf.mxu0 }
 0x2dc   : > { %13609 = vmatprep.subr.mxu0 %v13373_v54  ;;  %13255 = vmatprep.mubr.f32.mxu1 %v19480_v62 }
 0x2dd   : > { %13491 = vmatprep.mubr.f32.mxu0 %v19480_v62  ;;  %13257 = vmatmul.mubr.f32.vlgmr.msra.gmra.mxu1 %v18501_v26  ;;  %v5777_v60 = vpop.f32.mrf.mxu0 }
 0x2de   : > { %13494 = vmatmul.mubr.f32.vlgmr.msra.gmra.mxu0 %v18517_v42  ;;  %13382 = vmatpush1.msra.mxu1 %v13381_v0 }
 0x2df   : > { %13613 = vmatpush1.msra.mxu0 %v13379_v1  ;;  %13531 = vmatprep.subr.mxu1 %v18774_v39  ;;  %v5698_v37 = vpop.f32.mrf.mxu1 }
 0x2e0   : > { %13759 = vmatprep.subr.mxu0 %v18810_v48  ;;  %13415 = vmatprep.mubr.f32.mxu1 %v19480_v62  ;;  %v5699_v27 = vadd.f32 %v5698_v37, %v5616_v50  ;;  %v5929_v52 = vpop.f32.mrf.mxu0 }
 0x2e1   : > { %13646 = vmatprep.mubr.f32.mxu0 %v19480_v62  ;;  %13417 = vmatmul.mubr.f32.vlgmr.msra.gmra.mxu1 %v18501_v26  ;;  %v5700_v45 = vpop.f32.mrf.mxu1 }
 0x2e2   : > { %13648 = vmatmul.mubr.f32.vlgmr.msra.gmra.mxu0 %v18501_v26  ;;  %13533 = vmatpush1.msra.mxu1 %v18784_v19  ;;  %v5701_v8 = vadd.f32 %v5700_v45, %v5618_v33  ;;  %v5931_v31 = vpop.f32.mrf.mxu0  ;;  %v5776_v44 = vadd.f32 %v5775_v16, %v5699_v27  ;;  %v2988_v33 = vadd.f32 %v18212_v22, %v2911_v29 }
 0x2e3   : > { %13761 = vmatpush1.msra.mxu0 %v18818_v53  ;;  %13685 = vmatprep.subr.mxu1 %v18774_v39  ;;  %v5851_v20 = vpop.f32.mrf.mxu1 }
 0x2e4   : > { %13920 = vmatprep.subr.mxu0 %v13837_v56  ;;  %13566 = vmatprep.mubr.f32.mxu1 %v19480_v62  ;;  %v5852_v13 = vadd.f32 %v5851_v20, %v5776_v44  ;;  %v5778_v54 = vadd.f32 %v5777_v60, %v5701_v8  ;;  %v3064_v37 = vadd.f32 %v18225_v55, %v2988_v33 }
 0x2e5   : > { %13794 = vmatprep.mubr.f32.mxu0 %v19480_v62  ;;  %v6081_v38 = vpop.f32.mrf.mxu0  ;;  %13570 = vmatmul.mubr.f32.vlgmr.msra.gmra.mxu1 %v18538_v51  ;;  %v5853_v39 = vpop.f32.mrf.mxu1  ;;  %v3376_v44 = vadd.f32 %v18317_v12, %v18286_v43 }
 0x2e6   : > { %13800 = vmatmul.mubr.f32.vlgmr.msra.gmra.mxu0 %v18571_v61  ;;  %13687 = vmatpush1.msra.mxu1 %v18784_v19  ;;  %v5854_v59 = vadd.f32 %v5853_v39, %v5778_v54  ;;  %v5930_v1 = vadd.f32 %v5929_v52, %v5852_v13  ;;  %v13846_v61 = vand.u32 4294901760, %v13845_v10  ;;  %v14231_v19 = vld [vmem:[%s19104_s6] sm:$0xf] }
 0x2e7   : > { %13923 = vmatpush1.msra.mxu0 %v13843_v63  ;;  %13841 = vmatprep.subr.mxu1 %v13840_v35  ;;  %v6083_v47 = vpop.f32.mrf.mxu0  ;;  %v3453_v54 = vadd.f32 %v18315_v2, %v3376_v44 }
 0x2e8   : > { %14074 = vmatprep.subr.mxu0 %v13838_v28  ;;  %v6003_v9 = vpop.f32.mrf.mxu1  ;;  %13720 = vmatprep.mubr.f32.mxu1 %v19480_v62  ;;  %v5932_v49 = vadd.f32 %v5931_v31, %v5854_v59 }
 0x2e9   : > { %13956 = vmatprep.mubr.f32.mxu0 %v19480_v62  ;;  %v18850_v50 = vadd.f32 %v6003_v9, %v5930_v1  ;;  %v6240_v58 = vpop.f32.mrf.mxu0  ;;  %13722 = vmatmul.mubr.f32.vlgmr.msra.gmra.mxu1 %v18501_v26  ;;  %v3529_v1 = vadd.f32 %v18328_v24, %v3453_v54 }
 0x2ea   : > { %13959 = vmatmul.mubr.f32.vlgmr.msra.gmra.mxu0 %v18517_v42  ;;  %13847 = vmatpush1.msra.mxu1 %v13846_v61  ;;  %v6005_v3 = vpop.f32.mrf.mxu1 }
 0x2eb   : > { %14078 = vmatpush1.msra.mxu0 %v13844_v40  ;;  %v18854_v46 = vadd.f32 %v6005_v3, %v5932_v49  ;;  %13996 = vmatprep.subr.mxu1 %v18810_v48  ;;  %v6242_v56 = vpop.f32.mrf.mxu0  ;;  %v3607_v3 = vadd.f32 %v18369_v14, %v3529_v1 }
 0x2ec   : > { %14234 = vperm.xlu1 %14621, %v14231_v19   ;;  %13880 = vmatprep.mubr.f32.mxu1 %v19480_v62 }
 0x2ed   : > { %v6163_v16 = vpop.f32.mrf.mxu1  ;;  %14111 = vmatprep.mubr.f32.mxu0 %v19480_v62  ;;  %13882 = vmatmul.mubr.f32.vlgmr.msra.gmra.mxu1 %v18501_v26 }
 0x2ee   : > { %v6164_v0 = vadd.f32 %v6163_v16, %v6081_v38  ;;  %v6394_v63 = vpop.f32.mrf.mxu0  ;;  %14113 = vmatmul.mubr.f32.vlgmr.msra.gmra.mxu0 %v18501_v26  ;;  %13998 = vmatpush1.msra.mxu1 %v18818_v53 }
 0x2ef   : > { %v6165_v42 = vpop.f32.mrf.mxu1  ;;  %14031 = vmatprep.mubr.f32.mxu1 %v19480_v62  ;;  %14150 = vmatprep.subr.mxu1 %v18810_v48  ;;  %v3142_v48 = vadd.f32 %v18266_v4, %v3064_v37 }
 0x2f0   : > { %v6166_v28 = vadd.f32 %v6165_v42, %v6083_v47  ;;  %v6396_v22 = vpop.f32.mrf.mxu0  ;;  %v6241_v60 = vadd.f32 %v6240_v58, %v6164_v0 }
 0x2f1   : > { %v6316_v40 = vpop.f32.mrf.mxu1  ;;  %14035 = vmatmul.mubr.f32.vlgmr.msra.gmra.mxu1 %v18538_v51 }
 0x2f2   : > { %v6597_v27 = vpop.f32.mrf.mxu0  ;;  %v6243_v52 = vadd.f32 %v6242_v56, %v6166_v28  ;;  %v6317_v36 = vadd.f32 %v6316_v40, %v6241_v60  ;;  %14152 = vmatpush1.msra.mxu1 %v18818_v53  ;;  %14185 = vmatprep.mubr.f32.mxu1 %v19480_v62  ;;  %v3216_v62 = vadd.f32 %v18294_v23, %v3142_v48 }
 0x2f3   : > { %v6598_v45 = vadd.f32 %v6597_v27, %v18240_v30  ;;  %v6318_v8 = vpop.f32.mrf.mxu1  ;;  %v3841_v56 = vadd.f32 %v18430_v21, %v18396_v18  ;;  %v3681_v60 = vadd.f32 %v18403_v25, %v3607_v3 }
 0x2f4   : > { %v6599_v31 = vpop.f32.mrf.mxu0  ;;  %v6319_v55 = vadd.f32 %v6318_v8, %v6243_v52  ;;  %v6395_v20 = vadd.f32 %v6394_v63, %v6317_v36 }
 0x2f5   : > { %v6468_v10 = vpop.f32.mrf.mxu1  ;;  %14187 = vmatmul.mubr.f32.vlgmr.msra.gmra.mxu1 %v18501_v26  ;;  %v6600_v43 = vadd.f32 %v6599_v31, %v3216_v62 }
 0x2f6   : > { %v6756_v13 = vpop.f32.mrf.mxu0  ;;  %v18874_v51 = vadd.f32 %v6468_v10, %v6395_v20  ;;  %v6397_v30 = vadd.f32 %v6396_v22, %v6319_v55  ;;  %v19936_v55 = vld [vmem:[#allocation46_spill] sm:$0xff] }
 0x2f7   : > { %v6470_v38 = vpop.f32.mrf.mxu1 }
 0x2f8   : > { %v6758_v53 = vpop.f32.mrf.mxu0  ;;  %v18878_v35 = vadd.f32 %v6470_v38, %v6397_v30  ;;  %v19938_v38 = vld [vmem:[#allocation63_spill] sm:$0xff] }
 0x2f9   : > { %v6679_v4 = vpop.f32.mrf.mxu1 }
 0x2fa   : > { %v6910_v39 = vpop.f32.mrf.mxu0  ;;  %v6680_v12 = vadd.f32 %v6679_v4, %v6598_v45 }
 0x2fb   : > { %v6681_v59 = vpop.f32.mrf.mxu1 }
 0x2fc   : > { %v6912_v47 = vpop.f32.mrf.mxu0  ;;  %v6682_v26 = vadd.f32 %v6681_v59, %v6600_v43  ;;  %v6757_v29 = vadd.f32 %v6756_v13, %v6680_v12  ;;  %v19937_v13 = vld [vmem:[#allocation42_spill] sm:$0xff] }
 0x2fd   : > { %v6832_v9 = vpop.f32.mrf.mxu1 }
 0x2fe   : > { %v7062_v61 = vpop.f32.mrf.mxu0  ;;  %v6833_v19 = vadd.f32 %v6832_v9, %v6757_v29  ;;  %v6759_v23 = vadd.f32 %v6758_v53, %v6682_v26  ;;  %v4306_v53 = vadd.f32 %v18557_v6, %v19938_v38  ;;  %v19940_v26 = vld [vmem:[#allocation45_spill] sm:$0xff] }
 0x2ff   : > { %v7063_v58 = vadd.f32 %v7062_v61, %v18340_v32  ;;  %v6834_v49 = vpop.f32.mrf.mxu1  ;;  %v3918_v32 = vadd.f32 %v18428_v5, %v3841_v56 }
 0x300   : > { %v7064_v2 = vpop.f32.mrf.mxu0  ;;  %v6835_v33 = vadd.f32 %v6834_v49, %v6759_v23  ;;  %v6911_v16 = vadd.f32 %v6910_v39, %v6833_v19  ;;  %v4383_v29 = vadd.f32 %v19940_v26, %v4306_v53 }
 0x301   : > { %v6984_v0 = vpop.f32.mrf.mxu1  ;;  %v7065_v27 = vadd.f32 %v7064_v2, %v3681_v60  ;;  %v3994_v36 = vadd.f32 %v18445_v11, %v3918_v32  ;;  %v19941_v2 = vld [vmem:[#allocation40_spill] sm:$0xff] }
 0x302   : > { %v7221_v63 = vpop.f32.mrf.mxu0  ;;  %v18885_v24 = vadd.f32 %v6984_v0, %v6911_v16  ;;  %v6913_v42 = vadd.f32 %v6912_v47, %v6835_v33  ;;  %v19939_v47 = vld [vmem:[#allocation47_spill] sm:$0xff]  ;;  %v4459_v3 = vadd.f32 %v19941_v2, %v4383_v29 }
 0x303   : > { %v6986_v28 = vpop.f32.mrf.mxu1  ;;  %v4072_v30 = vadd.f32 %v19937_v13, %v3994_v36 }
 0x304   : > { %v7223_v22 = vpop.f32.mrf.mxu0  ;;  %v18889_v37 = vadd.f32 %v6986_v28, %v6913_v42  ;;  %v4537_v32 = vadd.f32 %v18620_v7, %v4459_v3 }
 0x305   : > { %v7144_v40 = vpop.f32.mrf.mxu1  ;;  %v4146_v1 = vadd.f32 %v19939_v47, %v4072_v30 }
 0x306   : > { %v7375_v14 = vpop.f32.mrf.mxu0  ;;  %v7145_v52 = vadd.f32 %v7144_v40, %v7063_v58 }
 0x307   : > { %v7146_v18 = vpop.f32.mrf.mxu1 }
 0x308   : > { %v7377_v21 = vpop.f32.mrf.mxu0  ;;  %v7147_v45 = vadd.f32 %v7146_v18, %v7065_v27  ;;  %v7222_v8 = vadd.f32 %v7221_v63, %v7145_v52 }
 0x309   : > { %v7297_v31 = vpop.f32.mrf.mxu1 }
 0x30a   : > { %v7527_v48 = vpop.f32.mrf.mxu0  ;;  %v7298_v44 = vadd.f32 %v7297_v31, %v7222_v8  ;;  %v7224_v25 = vadd.f32 %v7223_v22, %v7147_v45  ;;  %v19942_v8 = vld [vmem:[#allocation62_spill] sm:$0xff] }
 0x30b   : > { %v7528_v20 = vadd.f32 %v7527_v48, %v19936_v55  ;;  %v7299_v10 = vpop.f32.mrf.mxu1  ;;  %v4611_v31 = vadd.f32 %v19942_v8, %v4537_v32 }
 0x30c   : > { %v7529_v5 = vpop.f32.mrf.mxu0  ;;  %v7300_v62 = vadd.f32 %v7299_v10, %v7224_v25  ;;  %v7376_v54 = vadd.f32 %v7375_v14, %v7298_v44 }
 0x30d   : > { %v7449_v4 = vpop.f32.mrf.mxu1  ;;  %v7530_v58 = vadd.f32 %v7529_v5, %v4146_v1 }
 0x30e   : > { %v7686_v39 = vpop.f32.mrf.mxu0  ;;  %v18896_v11 = vadd.f32 %v7449_v4, %v7376_v54  ;;  %v7378_v43 = vadd.f32 %v7377_v21, %v7300_v62 }
 0x30f   : > { %v7451_v12 = vpop.f32.mrf.mxu1 }
 0x310   : > { %v7688_v59 = vpop.f32.mrf.mxu0  ;;  %v18900_v9 = vadd.f32 %v7451_v12, %v7378_v43 }
 0x311   : > { %v7609_v61 = vpop.f32.mrf.mxu1 }
 0x312   : > { %v7840_v19 = vpop.f32.mrf.mxu0  ;;  %v7610_v23 = vadd.f32 %v7609_v61, %v7528_v20 }
 0x313   : > { %v7611_v6 = vpop.f32.mrf.mxu1 }
 0x314   : > { %v7842_v49 = vpop.f32.mrf.mxu0  ;;  %v7612_v56 = vadd.f32 %v7611_v6, %v7530_v58  ;;  %v7687_v33 = vadd.f32 %v7686_v39, %v7610_v23 }
 0x315   : > { %v7762_v16 = vpop.f32.mrf.mxu1 }
 0x316   : > { %v7992_v0 = vpop.f32.mrf.mxu0  ;;  %v7763_v63 = vadd.f32 %v7762_v16, %v7687_v33  ;;  %v7689_v28 = vadd.f32 %v7688_v59, %v7612_v56 }
 0x317   : > { %v7993_v42 = vadd.f32 %v7992_v0, %v18589_v17  ;;  %v7764_v22 = vpop.f32.mrf.mxu1 }
 0x318   : > { %v7994_v60 = vpop.f32.mrf.mxu0  ;;  %v7765_v40 = vadd.f32 %v7764_v22, %v7689_v28  ;;  %v7841_v14 = vadd.f32 %v7840_v19, %v7763_v63 }
 0x319   : > { %v7914_v27 = vpop.f32.mrf.mxu1  ;;  %v7995_v55 = vadd.f32 %v7994_v60, %v4611_v31 }
 0x31a   : > { %v8151_v52 = vpop.f32.mrf.mxu0  ;;  %v18905_v18 = vadd.f32 %v7914_v27, %v7841_v14  ;;  %v7843_v21 = vadd.f32 %v7842_v49, %v7765_v40 }
 0x31b   : > { %v7916_v36 = vpop.f32.mrf.mxu1 }
 0x31c   : > { %v8153_v45 = vpop.f32.mrf.mxu0  ;;  %v18908_v48 = vadd.f32 %v7916_v36, %v7843_v21 }
 0x31d   : > { %v8074_v44 = vpop.f32.mrf.mxu1 }
 0x31e   : > { %v8305_v17 = vpop.f32.mrf.mxu0  ;;  %v8075_v20 = vadd.f32 %v8074_v44, %v7993_v42 }
 0x31f   : > { %v8076_v25 = vpop.f32.mrf.mxu1 }
 0x320   : > { %v8307_v10 = vpop.f32.mrf.mxu0  ;;  %v8077_v7 = vadd.f32 %v8076_v25, %v7995_v55  ;;  %v8152_v5 = vadd.f32 %v8151_v52, %v8075_v20 }
 0x321   : > { %v8227_v13 = vpop.f32.mrf.mxu1 }
 0x322   : > { %v8457_v30 = vpop.f32.mrf.mxu0  ;;  %v8228_v38 = vadd.f32 %v8227_v13, %v8152_v5  ;;  %v8154_v62 = vadd.f32 %v8153_v45, %v8077_v7 }
 0x323   : > { %v8458_v53 = vadd.f32 %v8457_v30, %v18695_v41  ;;  %v8229_v54 = vpop.f32.mrf.mxu1 }
 0x324   : > { %v8459_v4 = vpop.f32.mrf.mxu0  ;;  %v8230_v39 = vadd.f32 %v8229_v54, %v8154_v62  ;;  %v8306_v12 = vadd.f32 %v8305_v17, %v8228_v38 }
 0x325   : > { %v8460_v43 = vadd.f32 %v8459_v4, %v18705_v57  ;;  %v8379_v59 = vpop.f32.mrf.mxu1 }
 0x326   : > { %v8616_v47 = vpop.f32.mrf.mxu0  ;;  %v18912_v1 = vadd.f32 %v8379_v59, %v8306_v12  ;;  %v8308_v26 = vadd.f32 %v8307_v10, %v8230_v39 }
 0x327   : > { %v8381_v29 = vpop.f32.mrf.mxu1 }
 0x328   : > { %v8618_v61 = vpop.f32.mrf.mxu0  ;;  %v18914_v19 = vadd.f32 %v8381_v29, %v8308_v26 }
 0x329   : > { %v8539_v58 = vpop.f32.mrf.mxu1 }
 0x32a   : > { %v8770_v23 = vpop.f32.mrf.mxu0  ;;  %v8540_v6 = vadd.f32 %v8539_v58, %v8458_v53 }
 0x32b   : > { %v8541_v41 = vpop.f32.mrf.mxu1 }
 0x32c   : > { %v8772_v49 = vpop.f32.mrf.mxu0  ;;  %v8542_v2 = vadd.f32 %v8541_v41, %v8460_v43  ;;  %v8617_v3 = vadd.f32 %v8616_v47, %v8540_v6 }
 0x32d   : > { %v8692_v56 = vpop.f32.mrf.mxu1 }
 0x32e   : > { %v8922_v33 = vpop.f32.mrf.mxu0  ;;  %v8693_v57 = vadd.f32 %v8692_v56, %v8617_v3  ;;  %v8619_v0 = vadd.f32 %v8618_v61, %v8542_v2 }
 0x32f   : > { %v8923_v16 = vadd.f32 %v8922_v33, %v18796_v15  ;;  %v8694_v63 = vpop.f32.mrf.mxu1 }
 0x330   : > { %v8924_v42 = vpop.f32.mrf.mxu0  ;;  %v8695_v28 = vadd.f32 %v8694_v63, %v8619_v0  ;;  %v8771_v60 = vadd.f32 %v8770_v23, %v8693_v57 }
 0x331   : > { %v8925_v22 = vadd.f32 %v8924_v42, %v18800_v34  ;;  %v8844_v32 = vpop.f32.mrf.mxu1 }
 0x332   : > { %v9081_v40 = vpop.f32.mrf.mxu0  ;;  %v18918_v14 = vadd.f32 %v8844_v32, %v8771_v60  ;;  %v8773_v27 = vadd.f32 %v8772_v49, %v8695_v28 }
 0x333   : > { %v8846_v52 = vpop.f32.mrf.mxu1 }
 0x334   : > { %v9083_v21 = vpop.f32.mrf.mxu0  ;;  %v18920_v36 = vadd.f32 %v8846_v52, %v8773_v27 }
 0x335   : > { %v9004_v45 = vpop.f32.mrf.mxu1 }
 0x336   : > { %v9235_v8 = vpop.f32.mrf.mxu0  ;;  %v9005_v31 = vadd.f32 %v9004_v45, %v8923_v16 }
 0x337   : > { %v9006_v15 = vpop.f32.mrf.mxu1 }
 0x338   : > { %v9237_v44 = vpop.f32.mrf.mxu0  ;;  %v9007_v17 = vadd.f32 %v9006_v15, %v8925_v22  ;;  %v9082_v55 = vadd.f32 %v9081_v40, %v9005_v31 }
 0x339   : > { %v9157_v20 = vpop.f32.mrf.mxu1 }
 0x33a   : > { %v9387_v25 = vpop.f32.mrf.mxu0  ;;  %v9158_v34 = vadd.f32 %v9157_v20, %v9082_v55  ;;  %v9084_v7 = vadd.f32 %v9083_v21, %v9007_v17 }
 0x33b   : > { %v9388_v10 = vadd.f32 %v9387_v25, %v18850_v50  ;;  %v9159_v5 = vpop.f32.mrf.mxu1 }
 0x33c   : > { %v9389_v13 = vpop.f32.mrf.mxu0  ;;  %v9160_v30 = vadd.f32 %v9159_v5, %v9084_v7  ;;  %v9236_v53 = vadd.f32 %v9235_v8, %v9158_v34 }
 0x33d   : > { %v9390_v38 = vadd.f32 %v9389_v13, %v18854_v46  ;;  %v9309_v62 = vpop.f32.mrf.mxu1 }
 0x33e   : > { %v9546_v54 = vpop.f32.mrf.mxu0  ;;  %v18924_v4 = vadd.f32 %v9309_v62, %v9236_v53  ;;  %v9238_v39 = vadd.f32 %v9237_v44, %v9160_v30 }
 0x33f   : > { %v9311_v43 = vpop.f32.mrf.mxu1 }
 0x340   : > { %v9548_v12 = vpop.f32.mrf.mxu0  ;;  %v18926_v59 = vadd.f32 %v9311_v43, %v9238_v39 }
 0x341   : > { %v9469_v47 = vpop.f32.mrf.mxu1 }
 0x342   : > { %v9700_v26 = vpop.f32.mrf.mxu0  ;;  %v9470_v29 = vadd.f32 %v9469_v47, %v9388_v10 }
 0x343   : > { %v9471_v50 = vpop.f32.mrf.mxu1 }
 0x344   : > { %v9702_v61 = vpop.f32.mrf.mxu0  ;;  %v9472_v58 = vadd.f32 %v9471_v50, %v9390_v38  ;;  %v9547_v23 = vadd.f32 %v9546_v54, %v9470_v29 }
 0x345   : > { %v9622_v6 = vpop.f32.mrf.mxu1 }
 0x346   : > { %v9852_v41 = vpop.f32.mrf.mxu0  ;;  %v9623_v46 = vadd.f32 %v9622_v6, %v9547_v23  ;;  %v9549_v2 = vadd.f32 %v9548_v12, %v9472_v58 }
 0x347   : > { %v9853_v49 = vadd.f32 %v9852_v41, %v18874_v51  ;;  %v9624_v3 = vpop.f32.mrf.mxu1 }
 0x348   : > { %v9854_v56 = vpop.f32.mrf.mxu0  ;;  %v9625_v33 = vadd.f32 %v9624_v3, %v9549_v2  ;;  %v9701_v16 = vadd.f32 %v9700_v26, %v9623_v46 }
 0x349   : > { %v9855_v57 = vadd.f32 %v9854_v56, %v18878_v35  ;;  %v9774_v0 = vpop.f32.mrf.mxu1 }
 0x34a   : > { %v10011_v63 = vpop.f32.mrf.mxu0  ;;  %v18930_v42 = vadd.f32 %v9774_v0, %v9701_v16  ;;  %v9703_v28 = vadd.f32 %v9702_v61, %v9625_v33 }
 0x34b   : > { %v9776_v22 = vpop.f32.mrf.mxu1 }
 0x34c   : > { %v10013_v60 = vpop.f32.mrf.mxu0  ;;  %v18932_v32 = vadd.f32 %v9776_v22, %v9703_v28 }
 0x34d   : > { %v9934_v40 = vpop.f32.mrf.mxu1 }
 0x34e   : > { %v10165_v27 = vpop.f32.mrf.mxu0  ;;  %v9935_v52 = vadd.f32 %v9934_v40, %v9853_v49 }
 0x34f   : > { %v9936_v51 = vpop.f32.mrf.mxu1 }
 0x350   : > { %v10167_v21 = vpop.f32.mrf.mxu0  ;;  %v9937_v45 = vadd.f32 %v9936_v51, %v9855_v57  ;;  %v10012_v8 = vadd.f32 %v10011_v63, %v9935_v52  ;;  %v18938_v57 = vpop.permute.xlu0 %14212 }
 0x351   : > { %v10087_v31 = vpop.f32.mrf.mxu1 }
 0x352   : > { %v10546_v15 = vpop.f32.mrf.mxu0  ;;  %v10014_v35 = vadd.f32 %v10013_v60, %v9937_v45  ;;  %v10088_v44 = vadd.f32 %v10087_v31, %v10012_v8 }
 0x353   : > { %v10089_v17 = vpop.f32.mrf.mxu1 }
 0x354   : > { %v10548_v55 = vpop.f32.mrf.mxu0  ;;  %v10090_v20 = vadd.f32 %v10089_v17, %v10014_v35  ;;  %v10166_v25 = vadd.f32 %v10165_v27, %v10088_v44 }
 0x355   : > { %v10239_v34 = vpop.f32.mrf.mxu1 }
 0x356   : > { %v10705_v10 = vpop.f32.mrf.mxu0  ;;  %v10168_v7 = vadd.f32 %v10167_v21, %v10090_v20  ;;  %v18934_v5 = vadd.f32 %v10239_v34, %v10166_v25 }
 0x357   : > { %v10241_v13 = vpop.f32.mrf.mxu1 }
 0x358   : > { %v10707_v30 = vpop.f32.mrf.mxu0  ;;  %v18936_v38 = vadd.f32 %v10241_v13, %v10168_v7 }
 0x359   : > { %v10628_v53 = vpop.f32.mrf.mxu1 }
 0x35a   : > { %v10859_v62 = vpop.f32.mrf.mxu0  ;;  %v10629_v54 = vadd.f32 %v10628_v53, %v10546_v15 }
 0x35b   : > { %v10630_v39 = vpop.f32.mrf.mxu1 }
 0x35c   : > { %v10861_v43 = vpop.f32.mrf.mxu0  ;;  %v10631_v12 = vadd.f32 %v10630_v39, %v10548_v55  ;;  %v10706_v47 = vadd.f32 %v10705_v10, %v10629_v54 }
 0x35d   : > { %v10781_v26 = vpop.f32.mrf.mxu1 }
 0x35e   : > { %v11011_v29 = vpop.f32.mrf.mxu0  ;;  %v10708_v50 = vadd.f32 %v10707_v30, %v10631_v12  ;;  %v10782_v61 = vadd.f32 %v10781_v26, %v10706_v47 }
 0x35f   : > { %v10783_v58 = vpop.f32.mrf.mxu1 }
 0x360   : > { %v11013_v23 = vpop.f32.mrf.mxu0  ;;  %v10784_v6 = vadd.f32 %v10783_v58, %v10708_v50  ;;  %v10860_v41 = vadd.f32 %v10859_v62, %v10782_v61 }
 0x361   : > { %v10933_v46 = vpop.f32.mrf.mxu1 }
 0x362   : > { %v11170_v49 = vpop.f32.mrf.mxu0  ;;  %v10862_v2 = vadd.f32 %v10861_v43, %v10784_v6  ;;  %v10934_v3 = vadd.f32 %v10933_v46, %v10860_v41 }
 0x363   : > { %v10935_v56 = vpop.f32.mrf.mxu1 }
 0x364   : > { %v11172_v33 = vpop.f32.mrf.mxu0  ;;  %v14193_v16 = vadd.f32 %v10934_v3, %v18885_v24  ;;  %v10936_v0 = vadd.f32 %v10935_v56, %v10862_v2 }
 0x365   : > { %v11093_v63 = vpop.f32.mrf.mxu1 }
 0x366   : > { %v11324_v28 = vpop.f32.mrf.mxu0  ;;  %v14215_v22 = vmul.f32 %v18938_v57, %v14193_v16  ;;  %v14194_v60 = vadd.f32 %v10936_v0, %v18889_v37  ;;  %v11094_v40 = vadd.f32 %v11093_v63, %v11011_v29 }
 0x367   : > { %v18943_v27 = vpop.permute.xlu1 %14234  ;;  %v11095_v52 = vpop.f32.mrf.mxu1 }
 0x368   : > { %v11326_v51 = vpop.f32.mrf.mxu0  ;;  %v14216_v21 = vmul.f32 %v18938_v57, %v14194_v60  ;;  %v11096_v45 = vadd.f32 %v11095_v52, %v11013_v23  ;;  %v11171_v8 = vadd.f32 %v11170_v49, %v11094_v40  ;;  %v18947_v31 = vadd.f32 %v18943_v27, %v14215_v22 }
 0x369   : > { %v11246_v24 = vpop.f32.mrf.mxu1 }
 0x36a   : > { %v11476_v15 = vpop.f32.mrf.mxu0  ;;  %v11173_v35 = vadd.f32 %v11172_v33, %v11096_v45  ;;  %v11247_v44 = vadd.f32 %v11246_v24, %v11171_v8  ;;  %v18950_v17 = vadd.f32 %v18943_v27, %v14216_v21  ;;  %v14269_v20 = vmin.f32 %v18947_v31, 0.0 }
 0x36b   : > { %v11248_v37 = vpop.f32.mrf.mxu1  ;;  %vm14253_vm9 = vcmp.gt.f32.partialorder %v18947_v31, 0.0 }
 0x36c   : > { %v11478_v55 = vpop.f32.mrf.mxu0  ;;  %v11249_v25 = vadd.f32 %v11248_v37, %v11173_v35  ;;  %v11325_v34 = vadd.f32 %v11324_v28, %v11247_v44  ;;  %v14270_v10 = vmin.f32 %v18950_v17, 0.0  ;;  %v14285_v30 = vmul.f32 1.442695, %v14269_v20 }
 0x36d   : > { %v11398_v7 = vpop.f32.mrf.mxu1  ;;  %vm14254_vm15 = vcmp.gt.f32.partialorder %v18950_v17, 0.0 }
 0x36e   : > { %v11635_v13 = vpop.f32.mrf.mxu0  ;;  %v11327_v53 = vadd.f32 %v11326_v51, %v11249_v25  ;;  %v11399_v62 = vadd.f32 %v11398_v7, %v11325_v34  ;;  %v14287_v54 = vmul.f32 1.442695, %v14270_v10  ;;  %14630 = vpow2.f32 %v14285_v30 }
 0x36f   : > { %v11400_v39 = vpop.f32.mrf.mxu1 }
 0x370   : > { %v11637_v43 = vpop.f32.mrf.mxu0  ;;  %v14195_v12 = vadd.f32 %v11399_v62, %v18896_v11  ;;  %v11401_v47 = vadd.f32 %v11400_v39, %v11327_v53  ;;  %14632 = vpow2.f32 %v14287_v54 }
 0x371   : > { %v11558_v26 = vpop.f32.mrf.mxu1 }
 0x372   : > { %v11789_v29 = vpop.f32.mrf.mxu0  ;;  %v14217_v50 = vmul.f32 %v18938_v57, %v14195_v12  ;;  %v14196_v61 = vadd.f32 %v11401_v47, %v18900_v9  ;;  %v11559_v58 = vadd.f32 %v11558_v26, %v11476_v15 }
 0x373   : > { %v11560_v23 = vpop.f32.mrf.mxu1 }
 0x374   : > { %v11791_v6 = vpop.f32.mrf.mxu0  ;;  %v18958_v41 = vadd.f32 %v18943_v27, %v14217_v50  ;;  %v14218_v46 = vmul.f32 %v18938_v57, %v14196_v61  ;;  %v11561_v49 = vadd.f32 %v11560_v23, %v11478_v55  ;;  %v11636_v2 = vadd.f32 %v11635_v13, %v11559_v58 }
 0x375   : > { %v11711_v3 = vpop.f32.mrf.mxu1 }
 0x376   : > { %v11941_v11 = vpop.f32.mrf.mxu0  ;;  %v14271_v56 = vmin.f32 %v18958_v41, 0.0  ;;  %v18963_v33 = vadd.f32 %v18943_v27, %v14218_v46  ;;  %v11638_v16 = vadd.f32 %v11637_v43, %v11561_v49  ;;  %v11712_v0 = vadd.f32 %v11711_v3, %v11636_v2 }
 0x377   : > { %v11713_v9 = vpop.f32.mrf.mxu1  ;;  %vm14255_vm8 = vcmp.gt.f32.partialorder %v18958_v41, 0.0 }
 0x378   : > { %v11943_v63 = vpop.f32.mrf.mxu0  ;;  %v14289_v28 = vmul.f32 1.442695, %v14271_v56  ;;  %v14272_v22 = vmin.f32 %v18963_v33, 0.0  ;;  %v11714_v60 = vadd.f32 %v11713_v9, %v11638_v16  ;;  %v11790_v40 = vadd.f32 %v11789_v29, %v11712_v0 }
 0x379   : > { %v11863_v52 = vpop.f32.mrf.mxu1  ;;  %vm14256_vm11 = vcmp.gt.f32.partialorder %v18963_v33, 0.0 }
 0x37a   : > { %v12100_v51 = vpop.f32.mrf.mxu0  ;;  %14634 = vpow2.f32 %v14289_v28  ;;  %v14291_v21 = vmul.f32 1.442695, %v14272_v22  ;;  %v11792_v45 = vadd.f32 %v11791_v6, %v11714_v60  ;;  %v11864_v8 = vadd.f32 %v11863_v52, %v11790_v40 }
 0x37b   : > { %v11865_v24 = vpop.f32.mrf.mxu1  ;;  %v14631_v35 = vpop.eup %14630 }
 0x37c   : > { %v12102_v15 = vpop.f32.mrf.mxu0  ;;  %14636 = vpow2.f32 %v14291_v21  ;;  %v11866_v44 = vadd.f32 %v11865_v24, %v11792_v45  ;;  %v14197_v55 = vadd.f32 %v11864_v8, %v18905_v18  ;;  %v14513_v34 = vadd.f32 -1.0, %v14631_v35 }
 0x37d   : > { %v14633_v37 = vpop.eup %14632  ;;  %v12023_v20 = vpop.f32.mrf.mxu1 }
 0x37e   : > { %v12254_v25 = vpop.f32.mrf.mxu0  ;;  %v14198_v10 = vadd.f32 %v11866_v44, %v18908_v48  ;;  %v12024_v7 = vadd.f32 %v12023_v20, %v11941_v11  ;;  %v14514_v13 = vadd.f32 -1.0, %v14633_v37  ;;  %v14219_v30 = vmul.f32 %v18938_v57, %v14197_v55 }
 0x37f   : > { %v12025_v53 = vpop.f32.mrf.mxu1  ;;  %v14333_v54 = vsel %vm14253_vm9, %v18947_v31, %v14513_v34 }
 0x380   : > { %v12256_v62 = vpop.f32.mrf.mxu0  ;;  %v14220_v18 = vmul.f32 %v18938_v57, %v14198_v10  ;;  %v12026_v39 = vadd.f32 %v12025_v53, %v11943_v63  ;;  %v12101_v43 = vadd.f32 %v12100_v51, %v12024_v7  ;;  %v14334_v12 = vsel %vm14254_vm15, %v18950_v17, %v14514_v13 }
 0x381   : > { %v18975_v48 = vadd.f32 %v18943_v27, %v14219_v30  ;;  %v12176_v47 = vpop.f32.mrf.mxu1  ;;  %v14365_v29 = vcombine.low %v14333_v54, %v14334_v12 }
 0x382   : > { %v12406_v26 = vpop.f32.mrf.mxu0  ;;  %v18978_v50 = vadd.f32 %v18943_v27, %v14220_v18  ;;  %v12103_v61 = vadd.f32 %v12102_v15, %v12026_v39  ;;  %v12177_v58 = vadd.f32 %v12176_v47, %v12101_v43 }
 0x383   : > { %v14273_v23 = vmin.f32 %v18975_v48, 0.0  ;;  %v12178_v31 = vpop.f32.mrf.mxu1  ;;  %14381 = vst [vmem:[%s18983_s13] sm:$0xff] %v14365_v29  ;;  %vm14257_vm2 = vcmp.gt.f32.partialorder %v18975_v48, 0.0 }
 0x384   : > { %v12408_v6 = vpop.f32.mrf.mxu0  ;;  %v14274_v17 = vmin.f32 %v18978_v50, 0.0  ;;  %v12179_v46 = vadd.f32 %v12178_v31, %v12103_v61  ;;  %v12255_v49 = vadd.f32 %v12254_v25, %v12177_v58  ;;  %vm14258_vm7 = vcmp.gt.f32.partialorder %v18978_v50, 0.0 }
 0x385   : > { %v14293_v2 = vmul.f32 1.442695, %v14273_v23  ;;  %v12328_v3 = vpop.f32.mrf.mxu1 }
 0x386   : > { %v12565_v11 = vpop.f32.mrf.mxu0  ;;  %v14295_v56 = vmul.f32 1.442695, %v14274_v17  ;;  %v12257_v16 = vadd.f32 %v12256_v62, %v12179_v46  ;;  %v12329_v0 = vadd.f32 %v12328_v3, %v12255_v49 }
 0x387   : > { %v14635_v9 = vpop.eup %14634  ;;  %14638 = vpow2.f32 %v14293_v2  ;;  %v12330_v63 = vpop.f32.mrf.mxu1 }
 0x388   : > { %v12567_v28 = vpop.f32.mrf.mxu0  ;;  %v14515_v22 = vadd.f32 -1.0, %v14635_v9  ;;  %14640 = vpow2.f32 %v14295_v56  ;;  %v14199_v60 = vadd.f32 %v12329_v0, %v18912_v1  ;;  %v12331_v40 = vadd.f32 %v12330_v63, %v12257_v16 }
 0x389   : > { %v14637_v52 = vpop.eup %14636  ;;  %v12488_v51 = vpop.f32.mrf.mxu1 }
 0x38a   : > { %v12719_v21 = vpop.f32.mrf.mxu0  ;;  %v14516_v45 = vadd.f32 -1.0, %v14637_v52  ;;  %v14221_v8 = vmul.f32 %v18938_v57, %v14199_v60  ;;  %v14200_v24 = vadd.f32 %v12331_v40, %v18914_v19  ;;  %v14335_v15 = vsel %vm14255_vm8, %v18958_v41, %v14515_v22 }
 0x38b   : > { %v12489_v35 = vadd.f32 %v12488_v51, %v12406_v26  ;;  %v12490_v44 = vpop.f32.mrf.mxu1 }
 0x38c   : > { %v12721_v37 = vpop.f32.mrf.mxu0  ;;  %v14336_v1 = vsel %vm14256_vm11, %v18963_v33, %v14516_v45  ;;  %v18995_v55 = vadd.f32 %v18943_v27, %v14221_v8  ;;  %v14222_v20 = vmul.f32 %v18938_v57, %v14200_v24  ;;  %v12491_v25 = vadd.f32 %v12490_v44, %v12408_v6 }
 0x38d   : > { %v14366_v34 = vcombine.low %v14335_v15, %v14336_v1  ;;  %v12566_v10 = vadd.f32 %v12565_v11, %v12489_v35  ;;  %v12641_v7 = vpop.f32.mrf.mxu1 }
 0x38e   : > { %v12871_v19 = vpop.f32.mrf.mxu0  ;;  %v14275_v41 = vmin.f32 %v18995_v55, 0.0  ;;  %v19000_v13 = vadd.f32 %v18943_v27, %v14222_v20  ;;  %v12568_v30 = vadd.f32 %v12567_v28, %v12491_v25  ;;  %vm14259_vm1 = vcmp.gt.f32.partialorder %v18995_v55, 0.0 }
 0x38f   : > { %14382 = vst [vmem:[%s18983_s13 + $0x8] sm:$0xff] %v14366_v34  ;;  %v12642_v53 = vadd.f32 %v12641_v7, %v12566_v10  ;;  %v12643_v62 = vpop.f32.mrf.mxu1 }
 0x390   : > { %v12873_v33 = vpop.f32.mrf.mxu0  ;;  %v14297_v54 = vmul.f32 1.442695, %v14275_v41  ;;  %v14276_v18 = vmin.f32 %v19000_v13, 0.0  ;;  %v12644_v39 = vadd.f32 %v12643_v62, %v12568_v30  ;;  %vm14260_vm5 = vcmp.gt.f32.partialorder %v19000_v13, 0.0 }
 0x391   : > { %v12720_v43 = vadd.f32 %v12719_v21, %v12642_v53  ;;  %v12793_v12 = vpop.f32.mrf.mxu1 }
 0x392   : > { %v13030_v47 = vpop.f32.mrf.mxu0  ;;  %14642 = vpow2.f32 %v14297_v54  ;;  %v14299_v26 = vmul.f32 1.442695, %v14276_v18  ;;  %v12722_v29 = vadd.f32 %v12721_v37, %v12644_v39 }
 0x393   : > { %v12794_v61 = vadd.f32 %v12793_v12, %v12720_v43  ;;  %v12795_v58 = vpop.f32.mrf.mxu1 }
 0x394   : > { %v13032_v23 = vpop.f32.mrf.mxu0  ;;  %v14639_v31 = vpop.eup %14638  ;;  %14644 = vpow2.f32 %v14299_v26  ;;  %v12796_v6 = vadd.f32 %v12795_v58, %v12722_v29 }
 0x395   : > { %v14641_v17 = vpop.eup %14640  ;;  %v14517_v46 = vadd.f32 -1.0, %v14639_v31  ;;  %v14201_v49 = vadd.f32 %v12794_v61, %v18918_v14  ;;  %v12953_v2 = vpop.f32.mrf.mxu1 }
 0x396   : > { %v13184_v3 = vpop.f32.mrf.mxu0  ;;  %v14518_v11 = vadd.f32 -1.0, %v14641_v17  ;;  %v14202_v56 = vadd.f32 %v12796_v6, %v18920_v36  ;;  %v12954_v16 = vadd.f32 %v12953_v2, %v12871_v19 }
 0x397   : > { %v14337_v0 = vsel %vm14257_vm2, %v18975_v48, %v14517_v46  ;;  %v14223_v9 = vmul.f32 %v18938_v57, %v14201_v49  ;;  %v12955_v63 = vpop.f32.mrf.mxu1 }
 0x398   : > { %v13186_v28 = vpop.f32.mrf.mxu0  ;;  %v14338_v22 = vsel %vm14258_vm7, %v18978_v50, %v14518_v11  ;;  %v14224_v14 = vmul.f32 %v18938_v57, %v14202_v56  ;;  %v12956_v60 = vadd.f32 %v12955_v63, %v12873_v33  ;;  %v13031_v40 = vadd.f32 %v13030_v47, %v12954_v16 }
 0x399   : > { %v14367_v52 = vcombine.low %v14337_v0, %v14338_v22  ;;  %v19013_v51 = vadd.f32 %v18943_v27, %v14223_v9  ;;  %v13106_v36 = vpop.f32.mrf.mxu1 }
 0x39a   : > { %v13336_v21 = vpop.f32.mrf.mxu0  ;;  %v19016_v48 = vadd.f32 %v18943_v27, %v14224_v14  ;;  %v13033_v45 = vadd.f32 %v13032_v23, %v12956_v60  ;;  %v13107_v8 = vadd.f32 %v13106_v36, %v13031_v40 }
 0x39b   : > { %14383 = vst [vmem:[%s18983_s13 + $0x10] sm:$0xff] %v14367_v52  ;;  %v14277_v24 = vmin.f32 %v19013_v51, 0.0  ;;  %v13108_v15 = vpop.f32.mrf.mxu1  ;;  %vm14261_vm0 = vcmp.gt.f32.partialorder %v19013_v51, 0.0 }
 0x39c   : > { %v13338_v50 = vpop.f32.mrf.mxu0  ;;  %v14278_v35 = vmin.f32 %v19016_v48, 0.0  ;;  %v13109_v44 = vadd.f32 %v13108_v15, %v13033_v45  ;;  %v13185_v37 = vadd.f32 %v13184_v3, %v13107_v8  ;;  %vm14262_vm4 = vcmp.gt.f32.partialorder %v19016_v48, 0.0 }
 0x39d   : > { %v14301_v1 = vmul.f32 1.442695, %v14277_v24  ;;  %v13258_v20 = vpop.f32.mrf.mxu1 }
 0x39e   : > { %v13495_v25 = vpop.f32.mrf.mxu0  ;;  %v14303_v34 = vmul.f32 1.442695, %v14278_v35  ;;  %v13187_v10 = vadd.f32 %v13186_v28, %v13109_v44  ;;  %v13259_v7 = vadd.f32 %v13258_v20, %v13185_v37 }
 0x39f   : > { %v14643_v19 = vpop.eup %14642  ;;  %14646 = vpow2.f32 %v14301_v1  ;;  %v13260_v41 = vpop.f32.mrf.mxu1 }
 0x3a0   : > { %v13497_v30 = vpop.f32.mrf.mxu0  ;;  %v14519_v53 = vadd.f32 -1.0, %v14643_v19  ;;  %14648 = vpow2.f32 %v14303_v34  ;;  %v14203_v62 = vadd.f32 %v13259_v7, %v18924_v4  ;;  %v13261_v33 = vadd.f32 %v13260_v41, %v13187_v10 }
 0x3a1   : > { %v14645_v54 = vpop.eup %14644  ;;  %v13418_v18 = vpop.f32.mrf.mxu1 }
 0x3a2   : > { %v13649_v39 = vpop.f32.mrf.mxu0  ;;  %v14520_v43 = vadd.f32 -1.0, %v14645_v54  ;;  %v14225_v12 = vmul.f32 %v18938_v57, %v14203_v62  ;;  %v14204_v47 = vadd.f32 %v13261_v33, %v18926_v59  ;;  %v14339_v26 = vsel %vm14259_vm1, %v18995_v55, %v14519_v53 }
 0x3a3   : > { %v13419_v29 = vadd.f32 %v13418_v18, %v13336_v21  ;;  %v13420_v61 = vpop.f32.mrf.mxu1 }
 0x3a4   : > { %v13651_v58 = vpop.f32.mrf.mxu0  ;;  %v14340_v4 = vsel %vm14260_vm5, %v19000_v13, %v14520_v43  ;;  %v19029_v23 = vadd.f32 %v18943_v27, %v14225_v12  ;;  %v14226_v31 = vmul.f32 %v18938_v57, %v14204_v47  ;;  %v13421_v6 = vadd.f32 %v13420_v61, %v13338_v50 }
 0x3a5   : > { %v14368_v17 = vcombine.low %v14339_v26, %v14340_v4  ;;  %v13496_v46 = vadd.f32 %v13495_v25, %v13419_v29  ;;  %v13571_v49 = vpop.f32.mrf.mxu1 }
 0x3a6   : > { %v13801_v59 = vpop.f32.mrf.mxu0  ;;  %v14279_v55 = vmin.f32 %v19029_v23, 0.0  ;;  %v19034_v2 = vadd.f32 %v18943_v27, %v14226_v31  ;;  %v13498_v3 = vadd.f32 %v13497_v30, %v13421_v6  ;;  %vm14263_vm10 = vcmp.gt.f32.partialorder %v19029_v23, 0.0 }
 0x3a7   : > { %14384 = vst [vmem:[%s18983_s13 + $0x18] sm:$0xff] %v14368_v17  ;;  %v13572_v11 = vadd.f32 %v13571_v49, %v13496_v46  ;;  %v13573_v56 = vpop.f32.mrf.mxu1 }
 0x3a8   : > { %v13803_v13 = vpop.f32.mrf.mxu0  ;;  %v14305_v16 = vmul.f32 1.442695, %v14279_v55  ;;  %v14280_v0 = vmin.f32 %v19034_v2, 0.0  ;;  %v13574_v9 = vadd.f32 %v13573_v56, %v13498_v3  ;;  %vm14264_vm13 = vcmp.gt.f32.partialorder %v19034_v2, 0.0 }
 0x3a9   : > { %v13650_v63 = vadd.f32 %v13649_v39, %v13572_v11  ;;  %v13723_v28 = vpop.f32.mrf.mxu1 }
 0x3aa   : > { %v13960_v22 = vpop.f32.mrf.mxu0  ;;  %14650 = vpow2.f32 %v14305_v16  ;;  %v14307_v14 = vmul.f32 1.442695, %v14280_v0  ;;  %v13652_v60 = vadd.f32 %v13651_v58, %v13574_v9 }
 0x3ab   : > { %v13724_v40 = vadd.f32 %v13723_v28, %v13650_v63  ;;  %v13725_v52 = vpop.f32.mrf.mxu1 }
 0x3ac   : > { %v14647_v36 = vpop.eup %14646  ;;  %14652 = vpow2.f32 %v14307_v14  ;;  %v13726_v21 = vadd.f32 %v13725_v52, %v13652_v60  ;;  %v13962_v50 = vpop.f32.mrf.mxu0 }
 0x3ad   : > { %v14649_v45 = vpop.eup %14648  ;;  %v14521_v8 = vadd.f32 -1.0, %v14647_v36  ;;  %v14205_v24 = vadd.f32 %v13724_v40, %v18930_v42  ;;  %v13883_v15 = vpop.f32.mrf.mxu1 }
 0x3ae   : > { %v14522_v35 = vadd.f32 -1.0, %v14649_v45  ;;  %v14206_v44 = vadd.f32 %v13726_v21, %v18932_v32  ;;  %v13884_v37 = vadd.f32 %v13883_v15, %v13801_v59  ;;  %v14114_v32 = vpop.f32.mrf.mxu0 }
 0x3af   : > { %v14341_v1 = vsel %vm14261_vm0, %v19013_v51, %v14521_v8  ;;  %v14227_v20 = vmul.f32 %v18938_v57, %v14205_v24  ;;  %v13885_v25 = vpop.f32.mrf.mxu1 }
 0x3b0   : > { %v14342_v34 = vsel %vm14262_vm4, %v19016_v48, %v14522_v35  ;;  %v14228_v42 = vmul.f32 %v18938_v57, %v14206_v44  ;;  %v13886_v10 = vadd.f32 %v13885_v25, %v13803_v13  ;;  %v13961_v7 = vadd.f32 %v13960_v22, %v13884_v37  ;;  %v14116_v12 = vpop.f32.mrf.mxu0 }
 0x3b1   : > { %v14369_v19 = vcombine.low %v14341_v1, %v14342_v34  ;;  %v14249_v41 = vadd.f32 %v18943_v27, %v14227_v20  ;;  %v14036_v30 = vpop.f32.mrf.mxu1 }
 0x3b2   : > { %v14250_v53 = vadd.f32 %v18943_v27, %v14228_v42  ;;  %v13963_v62 = vadd.f32 %v13962_v50, %v13886_v10  ;;  %v14037_v51 = vadd.f32 %v14036_v30, %v13961_v7 }
 0x3b3   : > { %14385 = vst [vmem:[%s18983_s13 + $0x20] sm:$0xff] %v14369_v19  ;;  %v14281_v33 = vmin.f32 %v14249_v41, 0.0  ;;  %v14038_v54 = vpop.f32.mrf.mxu1  ;;  %vm14265_vm3 = vcmp.gt.f32.partialorder %v14249_v41, 0.0 }
 0x3b4   : > { %v14282_v18 = vmin.f32 %v14250_v53, 0.0  ;;  %v14039_v39 = vadd.f32 %v14038_v54, %v13963_v62  ;;  %v14115_v43 = vadd.f32 %v14114_v32, %v14037_v51  ;;  %vm14266_vm6 = vcmp.gt.f32.partialorder %v14250_v53, 0.0 }
 0x3b5   : > { %v14309_v48 = vmul.f32 1.442695, %v14281_v33  ;;  %v14188_v47 = vpop.f32.mrf.mxu1 }
 0x3b6   : > { %v14311_v26 = vmul.f32 1.442695, %v14282_v18  ;;  %v14117_v29 = vadd.f32 %v14116_v12, %v14039_v39  ;;  %v14189_v61 = vadd.f32 %v14188_v47, %v14115_v43 }
 0x3b7   : > { %v14651_v58 = vpop.eup %14650  ;;  %14654 = vpow2.f32 %v14309_v48  ;;  %v14190_v4 = vpop.f32.mrf.mxu1 }
 0x3b8   : > { %v14523_v31 = vadd.f32 -1.0, %v14651_v58  ;;  %14656 = vpow2.f32 %v14311_v26  ;;  %v14207_v6 = vadd.f32 %v14189_v61, %v18934_v5  ;;  %v14191_v17 = vadd.f32 %v14190_v4, %v14117_v29 }
 0x3b9   : > { %v14653_v46 = vpop.eup %14652 }
 0x3ba   : > { %v14524_v49 = vadd.f32 -1.0, %v14653_v46  ;;  %v14229_v59 = vmul.f32 %v18938_v57, %v14207_v6  ;;  %v14208_v55 = vadd.f32 %v14191_v17, %v18936_v38  ;;  %v14343_v3 = vsel %vm14263_vm10, %v19029_v23, %v14523_v31 }
 0x3bc   : > { %v14344_v11 = vsel %vm14264_vm13, %v19034_v2, %v14524_v49  ;;  %v14251_v56 = vadd.f32 %v18943_v27, %v14229_v59  ;;  %v14230_v13 = vmul.f32 %v18938_v57, %v14208_v55 }
 0x3bd   : > { %v14370_v5 = vcombine.low %v14343_v3, %v14344_v11 }
 0x3be   : > { %v14283_v16 = vmin.f32 %v14251_v56, 0.0  ;;  %v14252_v0 = vadd.f32 %v18943_v27, %v14230_v13  ;;  %vm14267_vm14 = vcmp.gt.f32.partialorder %v14251_v56, 0.0 }
 0x3bf   : > { %14386 = vst [vmem:[%s18983_s13 + $0x28] sm:$0xff] %v14370_v5 }
 0x3c0   : > { %v14313_v9 = vmul.f32 1.442695, %v14283_v16  ;;  %v14284_v38 = vmin.f32 %v14252_v0, 0.0  ;;  %vm14268_vm12 = vcmp.gt.f32.partialorder %v14252_v0, 0.0 }
 0x3c2   : > { %14658 = vpow2.f32 %v14313_v9  ;;  %v14315_v63 = vmul.f32 1.442695, %v14284_v38 }
 0x3c4   : > { %v14655_v28 = vpop.eup %14654  ;;  %14660 = vpow2.f32 %v14315_v63 }
 0x3c5   : > { %v14657_v23 = vpop.eup %14656  ;;  %v14525_v2 = vadd.f32 -1.0, %v14655_v28 }
 0x3c6   : > { %v14526_v22 = vadd.f32 -1.0, %v14657_v23 }
 0x3c7   : > { %v14345_v57 = vsel %vm14265_vm3, %v14249_v41, %v14525_v2 }
 0x3c8   : > { %v14346_v14 = vsel %vm14266_vm6, %v14250_v53, %v14526_v22 }
 0x3c9   : > { %v14371_v60 = vcombine.low %v14345_v57, %v14346_v14 }
 0x3cb   : > { %14387 = vst [vmem:[%s18983_s13 + $0x30] sm:$0xff] %v14371_v60 }
 0x3cf   : > { %v14659_v27 = vpop.eup %14658 }
 0x3d0   : > { %v14527_v40 = vadd.f32 -1.0, %v14659_v27 }
 0x3d1   : > { %v14661_v52 = vpop.eup %14660 }
 0x3d2   : > { %v14528_v36 = vadd.f32 -1.0, %v14661_v52  ;;  %v14347_v21 = vsel %vm14267_vm14, %v14251_v56, %v14527_v40 }
 0x3d4   : > { %v14348_v45 = vsel %vm14268_vm12, %v14252_v0, %v14528_v36 }
 0x3d5   : > { %v14372_v8 = vcombine.low %v14347_v21, %v14348_v45 }
 0x3d7   : > { %14388 = vst [vmem:[%s18983_s13 + $0x38] sm:$0xff] %v14372_v8 }
 0x3d8   : > { %14741 = shalt.err (!%p14738_p3)
}
 0x3d9   : > { %s14742_s15 = scalar_lea.hbm %s14402_s1, 1024  ;;  %s14746_s17 = scalar_lea.hbm %s19105_s7, 2048 }
 0x3da   : > { %p14743_p12 = scmp.ne.s32.totalorder %s14402_s1, %s14742_s15  ;;  %p14747_p4 = scmp.lt.s32.totalorder %s14402_s1, %s19105_s7 }
 0x3db   : > { %p14748_p6 = scmp.lt.s32.totalorder %s14746_s17, %s14742_s15 }
 0x3dc   : > { %p14744_p5 = pnand %p14743_p12, %p19943_p11 }
 0x3dd   : > { %p14749_p8 = por %p14748_p6, %p14747_p4 }
 0x3de   : > { %p14745_p7 = pneg %p14744_p5 }
 0x3e0   : > { %p14750_p9 = pnand %p14749_p8, %p14745_p7 }
 0x3e2   : > { %14753 = shalt.err (!%p14750_p9)
}
 0x3e3   : > { %14542 = dma.vmem_to_hbm [thread:$0]  (%p19943_p11), %s14405_s23, 1024, %s14402_s1, %s14390_s9  }
 0x3e4 PF: > { %s14416_s13 = sand.u32 1, %s14784_s24   ;;  %p19944_p13 = scmp.ne.s32.totalorder %s19336_s8, 0 }
 0x3e5   : > { %p19945_p10 = scmp.ge.s32.totalorder %s14796_s27, 2  ;;  %s14417_s19 = scalar_lea.sflag [#allocation4], %s14416_s13 }
 0x3e7   : > { %p14553_p1 = pnand %p19945_p10, %p19944_p13 }
 0x3e9   : > { %p14554_p2 = pneg %p14553_p1 }
 0x3eb   : > { %14779 = dma.done.wait (%p14554_p2), %s14417_s19, 1024  }
 0x3ec   : > { %14781 = vsyncadd (%p14554_p2), %s14417_s19, 4294966272  ;;  %s19946_s14 = sld [smem:[#allocation11_spill]]  ;;  %p21_p0 = scmp.ge.s32.totalorder %s14908_s12, 4  }
 0x3ed   : > { %s19947_s24 = smov %s14788_s25  ;;  %s19948_s25 = smov %s14792_s26 }
 0x3ee   : > { %s19950_s27 = smov %s14908_s12  ;;  %23 = sbr.rel (!%p21_p0) target bundleno = 8 (0x8), region = 99 }
 0x3f2   : > { %s19949_s26 = smov %s19946_s14 }
 0x3f3   :  { %14422 = vsyncpa [#allocation3], 1 }
 0x3f4   :  { %14424 = vsyncpa [#allocation3 + $0x1], 1 }
 0x3f5   :  { %14425 = vsyncpa [#allocation6], 1 }
 0x3f6   :  { %14426 = vsyncpa [#allocation4], 1 }
 0x3f7   :  { %14428 = vsyncpa [#allocation4 + $0x1], 1 }

</bundles_post_ra>
